<compile_context>
chip_gen: v7x
topology: tpu7x:2x2x1
jax: 0.10.0
libtpu: 0.0.40
codegen_flags: <defaults>
</compile_context>

<pallas_src>
import jax
import jax.numpy as jnp
from jax import lax
from jax.experimental import pallas as pl
from jax.experimental.pallas import tpu as pltpu

EPS = 1e-5        # ContBatchNorm3d default eps
KSIZE = 5
PAD = 2
LANES = 128       # Cout padded to full lane width -> lane-dense stores

VMEM_BUDGET = 40 * 1024 * 1024   # allocation target (fits v7x 64 MiB physical VMEM)
VMEM_LIMIT = 48 * 1024 * 1024    # scoped-VMEM cap handed to the compiler


def _round_up(x, m):
    return (x + m - 1) // m * m


def _choose_tk(kpad, cap=2048):
    """Largest multiple of 128 that divides kpad, capped at `cap`."""
    tk = min(kpad, cap)
    while kpad % tk:
        tk -= LANES
    return tk


def _choose_tm1(tk, budget=VMEM_BUDGET, tmax=1024):
    """Largest power-of-two row tile whose pass-1 working set fits `budget`."""
    fixed = 2 * tk * LANES * 2                           # double-buffered bf16 weights
    per_row = 2 * tk * 2 + 2 * LANES * 2 + LANES * 4     # patches(dbuf) + y(dbuf) + f32 acc
    tm = tmax
    while tm > 8 and fixed + tm * per_row > budget:
        tm //= 2
    return tm


# ---------- Pass 1: K-tiled conv GEMM + per-tile partial channel stats -------
def conv_stats_kernel(p_ref, w_ref, y_ref, stat_ref, acc_ref):
    k = pl.program_id(1)

    @pl.when(k == 0)
    def _():
        acc_ref[...] = jnp.zeros_like(acc_ref)

    # Conv3d tile as an MXU GEMM: (TM, TK) bf16 x (TK, 128) bf16 -> f32 acc.
    acc_ref[...] += jnp.dot(p_ref[...], w_ref[...],
                            preferred_element_type=jnp.float32)

    @pl.when(k == pl.num_programs(1) - 1)
    def _():
        acc = acc_ref[...]
        # bf16 y intermediate (halved HBM write / re-read); stats below use the
        # f32 accumulator so they are unaffected by the cast.
        y_ref[...] = acc.astype(y_ref.dtype)
        # Per-M-tile partial statistics: row 0 = sum, row 1 = sum of squares.
        # Per-tile outputs (instead of a resident accumulator) keep the M grid
        # axis "parallel", i.e. megacore-shardable on v7x.
        stat_ref[...] = jnp.zeros_like(stat_ref)
        stat_ref[0:1, :] = jnp.sum(acc, axis=0, keepdims=True)
        stat_ref[1:2, :] = jnp.sum(acc * acc, axis=0, keepdims=True)


# ---------- Pass 2: folded BN affine + ELU ------------------------------------
def bn_elu_kernel(y_ref, scale_ref, shift_ref, o_ref):
    y = y_ref[...].astype(jnp.float32) * scale_ref[...] + shift_ref[...]
    # ELU(alpha=1).  exp() uses the otherwise-idle EUP slot; the select is a
    # VPU op.  (expm1 would be marginally more accurate near 0, but exp-1 is
    # well within the bf16-driven tolerance and known to lower cleanly.)
    o_ref[...] = jnp.where(y > 0, y, jnp.exp(y) - 1.0)


def luconv_forward(x_ncdhw, conv_w, conv_b, gamma, beta):
    """x_ncdhw: (N, C, D, H, W); conv_w: (Cout, Cin, 5, 5, 5) (PyTorch layout)."""
    del conv_b  # conv bias is removed exactly by the batch-mean subtraction in BN.

    N, C, D, H, W = x_ncdhw.shape
    Cout = conv_w.shape[0]
    M = N * D * H * W
    Kdim = KSIZE * KSIZE * KSIZE * C
    Kpad = _round_up(Kdim, LANES)
    Cpad = LANES

    TK = _choose_tk(Kpad)
    TM1 = _choose_tm1(TK)
    TM2 = max(TM1, min(2048, _round_up(M, TM1)))     # bigger tile for the cheap pass
    Mpad = _round_up(M, TM2)                          # TM2 is a multiple of TM1
    m1_tiles = Mpad // TM1
    m2_tiles = Mpad // TM2
    k_tiles = Kpad // TK

    # --- glue: channels-last + spatial zero-pad + im2col, assembled in bf16 ---
    # TODO(synk): build these patches inside pass 1 from a halo'd x tile DMA'd
    # to VMEM (removes the ~Kpad/C HBM read blow-up); interim: assemble the
    # patch slab directly in bf16 so no f32 patch intermediate is materialized.
    x = jnp.transpose(x_ncdhw, (0, 2, 3, 4, 1)).astype(jnp.bfloat16)   # N,D,H,W,C
    xp = jnp.pad(x, ((0, 0), (PAD, PAD), (PAD, PAD), (PAD, PAD), (0, 0)))
    cols = []
    for kd in range(KSIZE):
        for kh in range(KSIZE):
            for kw in range(KSIZE):
                cols.append(xp[:, kd:kd + D, kh:kh + H, kw:kw + W, :])
    patches = jnp.concatenate(cols, axis=-1).reshape(M, Kdim)
    # Zero M-padding rows give y == 0 and do not perturb the statistics because
    # the wrapper divides by the true M; zero K columns match the zero-padded
    # weight rows.
    patches = jnp.pad(patches, ((0, Mpad - M), (0, Kpad - Kdim)))

    # (Cout, Cin, kd, kh, kw) -> (kd, kh, kw, Cin, Cout) -> (Kpad, 128), bf16
    w_mat = jnp.transpose(conv_w, (2, 3, 4, 1, 0)).reshape(Kdim, Cout)
    w_mat = jnp.pad(w_mat, ((0, Kpad - Kdim), (0, Cpad - Cout))).astype(jnp.bfloat16)

    y, stats = pl.pallas_call(
        conv_stats_kernel,
        out_shape=(jax.ShapeDtypeStruct((Mpad, Cpad), jnp.bfloat16),
                   jax.ShapeDtypeStruct((m1_tiles * 8, Cpad), jnp.float32)),
        grid=(m1_tiles, k_tiles),
        in_specs=[
            pl.BlockSpec((TM1, TK), lambda i, k: (i, k)),
            # TODO(synk): pipeline_mode=pl.Buffered(1) on this constant-index
            # weight spec would drop the redundant second buffer on v7x.
            pl.BlockSpec((TK, Cpad), lambda i, k: (k, 0)),
        ],
        out_specs=(
            pl.BlockSpec((TM1, Cpad), lambda i, k: (i, 0)),
            pl.BlockSpec((8, Cpad), lambda i, k: (i, 0)),
        ),
        scratch_shapes=[pltpu.VMEM((TM1, Cpad), jnp.float32)],
        compiler_params=pltpu.CompilerParams(
            dimension_semantics=("parallel", "arbitrary"),
            vmem_limit_bytes=VMEM_LIMIT),
    )(patches, w_mat)

    # --- tiny per-channel math: reduce partial stats, fold BN into one affine --
    ysum = jnp.sum(stats[0::8], axis=0)
    yssq = jnp.sum(stats[1::8], axis=0)
    mean = ysum / jnp.float32(M)
    # TODO(synk): E[y^2]-E[y]^2 in f32 can cancel at very large M; fine here.
    var = jnp.maximum(yssq / jnp.float32(M) - mean * mean, 0.0)   # biased variance
    gamma_pad = jnp.pad(gamma.astype(jnp.float32), (0, Cpad - Cout))
    beta_pad = jnp.pad(beta.astype(jnp.float32), (0, Cpad - Cout))
    scale1 = gamma_pad * lax.rsqrt(var + EPS)
    shift1 = beta_pad - mean * scale1
    scale = scale1.reshape(1, Cpad)
    shift = shift1.reshape(1, Cpad)
    # TODO(synk): running_mean / running_var momentum updates of BatchNorm are
    # stateful bookkeeping with no effect on the forward output; not emitted.

    out_flat = pl.pallas_call(
        bn_elu_kernel,
        out_shape=jax.ShapeDtypeStruct((Mpad, Cpad), jnp.float32),
        grid=(m2_tiles,),
        in_specs=[
            pl.BlockSpec((TM2, Cpad), lambda i: (i, 0)),
            pl.BlockSpec((1, Cpad), lambda i: (0, 0)),
            pl.BlockSpec((1, Cpad), lambda i: (0, 0)),
        ],
        out_specs=pl.BlockSpec((TM2, Cpad), lambda i: (i, 0)),
        compiler_params=pltpu.CompilerParams(
            dimension_semantics=("parallel",),          # megacore-shardable
            vmem_limit_bytes=VMEM_LIMIT),
    )(y, scale, shift)

    # TODO(synk): keep the channels-last slab across a VNet stack; converted
    # back to NCDHW here to match the module contract.
    out = out_flat[:M, :Cout].reshape(N, D, H, W, Cout)
    return jnp.transpose(out, (0, 4, 1, 2, 3))                   # back to NCDHW


def luconv_reference(x, conv_w, conv_b, gamma, beta):
    """Pure-JAX (f32) reference mirroring the PyTorch forward."""
    y = lax.conv_general_dilated(
        x, conv_w, window_strides=(1, 1, 1),
        padding=((PAD, PAD), (PAD, PAD), (PAD, PAD)),
        dimension_numbers=("NCDHW", "OIDHW", "NCDHW"))
    y = y + conv_b.reshape(1, -1, 1, 1, 1)
    mean = jnp.mean(y, axis=(0, 2, 3, 4), keepdims=True)
    var = jnp.var(y, axis=(0, 2, 3, 4), keepdims=True)            # biased
    y = (y - mean) / jnp.sqrt(var + EPS)
    y = y * gamma.reshape(1, -1, 1, 1, 1) + beta.reshape(1, -1, 1, 1, 1)
    return jnp.where(y > 0, y, jnp.exp(y) - 1.0)


if __name__ == "__main__":
    key = jax.random.PRNGKey(0)
    k1, k2, k3, k4, k5 = jax.random.split(key, 5)

    # Small shapes consistent with the module: nchan=4, 5D input (N,C,D,H,W).
    N, C, D, H, W = 2, 4, 8, 8, 8
    x = jax.random.normal(k1, (N, C, D, H, W), jnp.float32)

    fan_in = C * KSIZE * KSIZE * KSIZE
    conv_w = jax.random.normal(k2, (C, C, KSIZE, KSIZE, KSIZE), jnp.float32)
    conv_w = conv_w / jnp.sqrt(jnp.float32(fan_in))
    conv_b = 0.1 * jax.random.normal(k3, (C,), jnp.float32)
    gamma = 1.0 + 0.1 * jax.random.normal(k4, (C,), jnp.float32)
    beta = 0.1 * jax.random.normal(k5, (C,), jnp.float32)

    fwd = jax.jit(luconv_forward)
    out = fwd(x, conv_w, conv_b, gamma, beta)
    out = jax.block_until_ready(out)

    ref = luconv_reference(x, conv_w, conv_b, gamma, beta)
    assert out.shape == (N, C, D, H, W), out.shape
    # Tolerance covers bf16 MXU operands AND the new bf16 y intermediate
    # (stats themselves are accumulated in f32 before the cast).
    assert jnp.allclose(out, ref, atol=4e-2, rtol=4e-2), float(
        jnp.max(jnp.abs(out - ref)))

    print("KERNEL_OK")
</pallas_src>

<mosaic_0001>
module attributes {stable_mosaic.version = 11 : i64} {
  func.func @conv_stats_kernel(%arg0: i32, %arg1: i32, %arg2: memref<1024x512xbf16, #tpu.memory_space<vmem>>, %arg3: memref<512x128xbf16, #tpu.memory_space<vmem>>, %arg4: memref<1024x128xbf16, #tpu.memory_space<vmem>>, %arg5: memref<8x128xf32, #tpu.memory_space<vmem>>, %arg6: memref<1024x128xf32, #tpu.memory_space<vmem>>) attributes {dimension_semantics = [#tpu.dimension_semantics<parallel>, #tpu.dimension_semantics<arbitrary>], iteration_bounds = array<i64: 1, 1>, scalar_prefetch = 0 : i64, scratch_operands = 1 : i64, tpu.core_type = #tpu.core_type<tc>, window_params = [{transform_indices = @transform_0, window_bounds = array<i64: 1024, 512>}, {transform_indices = @transform_1, window_bounds = array<i64: 512, 128>}, {transform_indices = @transform_2, window_bounds = array<i64: 1024, 128>}, {transform_indices = @transform_3, window_bounds = array<i64: 8, 128>}]} {
    %c0_i32 = arith.constant 0 : i32
    %0 = arith.cmpi eq, %arg1, %c0_i32 : i32
    %1 = arith.extui %0 : i1 to i32
    %c0_i32_0 = arith.constant 0 : i32
    %2 = arith.cmpi ne, %1, %c0_i32_0 : i32
    scf.if %2 {
      %cst_10 = arith.constant 0.000000e+00 : f32
      %12 = vector.broadcast %cst_10 : f32 to vector<1024x128xf32>
      %c0_11 = arith.constant 0 : index
      %c0_12 = arith.constant 0 : index
      %13 = vector.load %arg6[%c0_11, %c0_12] : memref<1024x128xf32, #tpu.memory_space<vmem>>, vector<1024x128xf32>
      tpu.vector_store %arg6[%c0_11, %c0_12], %12 {strides = array<i32>} : memref<1024x128xf32, #tpu.memory_space<vmem>>, vector<1024x128xf32>,
    } else {
    }
    %c0 = arith.constant 0 : index
    %c0_1 = arith.constant 0 : index
    %3 = vector.load %arg6[%c0, %c0_1] : memref<1024x128xf32, #tpu.memory_space<vmem>>, vector<1024x128xf32>
    %c0_2 = arith.constant 0 : index
    %c0_3 = arith.constant 0 : index
    %4 = vector.load %arg2[%c0_2, %c0_3] : memref<1024x512xbf16, #tpu.memory_space<vmem>>, vector<1024x512xbf16>
    %c0_4 = arith.constant 0 : index
    %c0_5 = arith.constant 0 : index
    %5 = vector.load %arg3[%c0_4, %c0_5] : memref<512x128xbf16, #tpu.memory_space<vmem>>, vector<512x128xbf16>
    %cst = arith.constant dense<0.000000e+00> : vector<1024x128xf32>
    %6 = tpu.matmul %4, %5, %cst {dimension_numbers = #tpu.dot_dimension_numbers<[1], [0], [0], [1], [0, 0, 1, 1], [], []>} : vector<1024x512xbf16>, vector<512x128xbf16>, vector<1024x128xf32> -> vector<1024x128xf32>
    %7 = arith.addf %3, %6 : vector<1024x128xf32>
    %c0_6 = arith.constant 0 : index
    %c0_7 = arith.constant 0 : index
    %8 = vector.load %arg6[%c0_6, %c0_7] : memref<1024x128xf32, #tpu.memory_space<vmem>>, vector<1024x128xf32>
    tpu.vector_store %arg6[%c0_6, %c0_7], %7 {strides = array<i32>} : memref<1024x128xf32, #tpu.memory_space<vmem>>, vector<1024x128xf32>,
    %c0_i32_8 = arith.constant 0 : i32
    %9 = arith.cmpi eq, %arg1, %c0_i32_8 : i32
    %10 = arith.extui %9 : i1 to i32
    %c0_i32_9 = arith.constant 0 : i32
    %11 = arith.cmpi ne, %10, %c0_i32_9 : i32
    scf.if %11 {
      %c0_10 = arith.constant 0 : index
      %c0_11 = arith.constant 0 : index
      %12 = vector.load %arg6[%c0_10, %c0_11] : memref<1024x128xf32, #tpu.memory_space<vmem>>, vector<1024x128xf32>
      %13 = arith.truncf %12 : vector<1024x128xf32> to vector<1024x128xbf16>
      %c0_12 = arith.constant 0 : index
      %c0_13 = arith.constant 0 : index
      %14 = vector.load %arg4[%c0_12, %c0_13] : memref<1024x128xbf16, #tpu.memory_space<vmem>>, vector<1024x128xbf16>
      tpu.vector_store %arg4[%c0_12, %c0_13], %13 {strides = array<i32>} : memref<1024x128xbf16, #tpu.memory_space<vmem>>, vector<1024x128xbf16>,
      %cst_14 = arith.constant 0.000000e+00 : f32
      %15 = vector.broadcast %cst_14 : f32 to vector<8x128xf32>
      %c0_15 = arith.constant 0 : index
      %c0_16 = arith.constant 0 : index
      %16 = vector.load %arg5[%c0_15, %c0_16] : memref<8x128xf32, #tpu.memory_space<vmem>>, vector<8x128xf32>
      tpu.vector_store %arg5[%c0_15, %c0_16], %15 {strides = array<i32>} : memref<8x128xf32, #tpu.memory_space<vmem>>, vector<8x128xf32>,
      %cst_17 = arith.constant dense<0.000000e+00> : vector<128xf32>
      %17 = vector.multi_reduction <add>, %12, %cst_17 [0] : vector<1024x128xf32> to vector<128xf32>
      %18 = vector.shape_cast %17 : vector<128xf32> to vector<1x128xf32>
      %c0_18 = arith.constant 0 : index
      %c0_19 = arith.constant 0 : index
      %19 = vector.load %arg5[%c0_18, %c0_19] : memref<8x128xf32, #tpu.memory_space<vmem>>, vector<1x128xf32>
      tpu.vector_store %arg5[%c0_18, %c0_19], %18 {strides = array<i32>} : memref<8x128xf32, #tpu.memory_space<vmem>>, vector<1x128xf32>,
      %20 = arith.mulf %12, %12 : vector<1024x128xf32>
      %cst_20 = arith.constant dense<0.000000e+00> : vector<128xf32>
      %21 = vector.multi_reduction <add>, %20, %cst_20 [0] : vector<1024x128xf32> to vector<128xf32>
      %22 = vector.shape_cast %21 : vector<128xf32> to vector<1x128xf32>
      %c1 = arith.constant 1 : index
      %c0_21 = arith.constant 0 : index
      %23 = vector.load %arg5[%c1, %c0_21] : memref<8x128xf32, #tpu.memory_space<vmem>>, vector<1x128xf32>
      tpu.vector_store %arg5[%c1, %c0_21], %22 {strides = array<i32>} : memref<8x128xf32, #tpu.memory_space<vmem>>, vector<1x128xf32>,
    } else {
    }
    return
  }
  func.func @transform_0(%arg0: i32, %arg1: i32) -> (i32, i32) {
    %c0_i32 = arith.constant 0 : i32
    return %arg0, %arg1 : i32, i32
  }
  func.func @transform_1(%arg0: i32, %arg1: i32) -> (i32, i32) {
    %c0_i32 = arith.constant 0 : i32
    %c0_i32_0 = arith.constant 0 : i32
    return %arg1, %c0_i32 : i32, i32
  }
  func.func @transform_2(%arg0: i32, %arg1: i32) -> (i32, i32) {
    %c0_i32 = arith.constant 0 : i32
    %c0_i32_0 = arith.constant 0 : i32
    return %arg0, %c0_i32 : i32, i32
  }
  func.func @transform_3(%arg0: i32, %arg1: i32) -> (i32, i32) {
    %c0_i32 = arith.constant 0 : i32
    %c0_i32_0 = arith.constant 0 : i32
    return %arg0, %c0_i32 : i32, i32
  }
}

module attributes {stable_mosaic.version = 11 : i64} {
  func.func @bn_elu_kernel(%arg0: i32, %arg1: memref<1024x128xbf16, #tpu.memory_space<vmem>>, %arg2: memref<1x128xf32, #tpu.memory_space<vmem>>, %arg3: memref<1x128xf32, #tpu.memory_space<vmem>>, %arg4: memref<1024x128xf32, #tpu.memory_space<vmem>>) attributes {dimension_semantics = [#tpu.dimension_semantics<parallel>], iteration_bounds = array<i64: 1>, scalar_prefetch = 0 : i64, scratch_operands = 0 : i64, tpu.core_type = #tpu.core_type<tc>, window_params = [{transform_indices = @transform_0, window_bounds = array<i64: 1024, 128>}, {pipeline_mode = #tpu.pipeline_mode<synchronous>, transform_indices = @transform_1, window_bounds = array<i64: 1, 128>}, {pipeline_mode = #tpu.pipeline_mode<synchronous>, transform_indices = @transform_2, window_bounds = array<i64: 1, 128>}, {transform_indices = @transform_3, window_bounds = array<i64: 1024, 128>}]} {
    %c0 = arith.constant 0 : index
    %c0_0 = arith.constant 0 : index
    %0 = vector.load %arg1[%c0, %c0_0] : memref<1024x128xbf16, #tpu.memory_space<vmem>>, vector<1024x128xbf16>
    %1 = arith.extf %0 : vector<1024x128xbf16> to vector<1024x128xf32>
    %c0_1 = arith.constant 0 : index
    %c0_2 = arith.constant 0 : index
    %2 = vector.load %arg2[%c0_1, %c0_2] : memref<1x128xf32, #tpu.memory_space<vmem>>, vector<1x128xf32>
    %3 = vector.broadcast %2 : vector<1x128xf32> to vector<1024x128xf32>
    %4 = arith.mulf %1, %3 : vector<1024x128xf32>
    %c0_3 = arith.constant 0 : index
    %c0_4 = arith.constant 0 : index
    %5 = vector.load %arg3[%c0_3, %c0_4] : memref<1x128xf32, #tpu.memory_space<vmem>>, vector<1x128xf32>
    %6 = vector.broadcast %5 : vector<1x128xf32> to vector<1024x128xf32>
    %7 = arith.addf %4, %6 : vector<1024x128xf32>
    %cst = arith.constant 0.000000e+00 : f32
    %8 = vector.broadcast %cst : f32 to vector<1024x128xf32>
    %9 = arith.cmpf ogt, %7, %8 : vector<1024x128xf32>
    %10 = math.exp %7 : vector<1024x128xf32>
    %cst_5 = arith.constant 1.000000e+00 : f32
    %11 = vector.broadcast %cst_5 : f32 to vector<1024x128xf32>
    %12 = arith.subf %10, %11 : vector<1024x128xf32>
    %13 = arith.select %9, %7, %12 : vector<1024x128xi1>, vector<1024x128xf32>
    %c0_6 = arith.constant 0 : index
    %c0_7 = arith.constant 0 : index
    %14 = vector.load %arg4[%c0_6, %c0_7] : memref<1024x128xf32, #tpu.memory_space<vmem>>, vector<1024x128xf32>
    tpu.vector_store %arg4[%c0_6, %c0_7], %13 {strides = array<i32>} : memref<1024x128xf32, #tpu.memory_space<vmem>>, vector<1024x128xf32>,
    return
  }
  func.func @transform_0(%arg0: i32) -> (i32, i32) {
    %c0_i32 = arith.constant 0 : i32
    %c0_i32_0 = arith.constant 0 : i32
    return %arg0, %c0_i32 : i32, i32
  }
  func.func @transform_1(%arg0: i32) -> (i32, i32) {
    %c0_i32 = arith.constant 0 : i32
    %c0_i32_0 = arith.constant 0 : i32
    %c0_i32_1 = arith.constant 0 : i32
    return %c0_i32, %c0_i32_0 : i32, i32
  }
  func.func @transform_2(%arg0: i32) -> (i32, i32) {
    %c0_i32 = arith.constant 0 : i32
    %c0_i32_0 = arith.constant 0 : i32
    %c0_i32_1 = arith.constant 0 : i32
    return %c0_i32, %c0_i32_0 : i32, i32
  }
  func.func @transform_3(%arg0: i32) -> (i32, i32) {
    %c0_i32 = arith.constant 0 : i32
    %c0_i32_0 = arith.constant 0 : i32
    return %arg0, %c0_i32 : i32, i32
  }
}

</mosaic_0001>

<bundles_post_ra>
// kernel: luconv_forward.3
= control target key start
LH: loop header
LB: loop body
LE: loop exit
PB: predicated region body
PF: predicated region fallthrough
CT: control target
= control target key end

     0   :  { %s3741_s0 = inlined_call_operand.vmem [shape: bf16[1024,128], index: 0, kind: input, shape index: {}]   ;;  %s3742_s1 = inlined_call_operand.vmem [shape: f32[1,128], index: 1, kind: input, shape index: {}]   ;;  %s3743_s2 = inlined_call_operand.vmem [shape: f32[1,128], index: 2, kind: input, shape index: {}]   ;;  %s3744_s3 = inlined_call_operand.vmem [shape: f32[1024,128], index: 3, kind: output, shape index: {}]  }
   0x1   :  { %v1443_v0 = vld [vmem:[%s3741_s0] sm:$0xff]   ;;  %v1698_v4 = vld [vmem:[%s3741_s0 + $0x8] sm:$0xff]   ;;  %v1699_v5 = vld [vmem:[%s3741_s0 + $0x10] sm:$0xff]  }
   0x2   :  { %v2047_v1 = vld [vmem:[%s3742_s1] ss:$0 sm:$0xff]  ;;  %v1444_v2 = vunpack.c.l.bf16 %v1443_v0  ;;  %v1445_v3 = vunpack.c.h.bf16 %v1443_v0  ;;  %v1700_v6 = vld [vmem:[%s3741_s0 + $0x18] sm:$0xff]   ;;  %v1448_v8 = vunpack.c.l.bf16 %v1698_v4  ;;  %v1449_v9 = vunpack.c.h.bf16 %v1698_v4  ;;  %v1702_v33 = vld [vmem:[%s3741_s0 + $0x28] sm:$0xff]  }
   0x3   :  { %v2061_v7 = vld [vmem:[%s3743_s2] ss:$0 sm:$0xff]  ;;  %v1452_v10 = vunpack.c.l.bf16 %v1699_v5  ;;  %v1453_v11 = vunpack.c.h.bf16 %v1699_v5  ;;  %v1456_v14 = vunpack.c.l.bf16 %v1700_v6  ;;  %v1457_v15 = vunpack.c.h.bf16 %v1700_v6  ;;  %v1703_v41 = vld [vmem:[%s3741_s0 + $0x30] sm:$0xff]   ;;  %v1704_v55 = vld [vmem:[%s3741_s0 + $0x38] sm:$0xff]  }
   0x4   :  { %v277_v12 = vmul.f32 %v1444_v2, %v2047_v1  ;;  %v278_v13 = vmul.f32 %v1445_v3, %v2047_v1  ;;  %v279_v16 = vmul.f32 %v1448_v8, %v2047_v1  ;;  %v280_v17 = vmul.f32 %v1449_v9, %v2047_v1  ;;  %v1701_v32 = vld [vmem:[%s3741_s0 + $0x20] sm:$0xff]  }
   0x5   :  { %v281_v18 = vmul.f32 %v1452_v10, %v2047_v1  ;;  %v282_v19 = vmul.f32 %v1453_v11, %v2047_v1  ;;  %v283_v22 = vmul.f32 %v1456_v14, %v2047_v1  ;;  %v284_v23 = vmul.f32 %v1457_v15, %v2047_v1 }
   0x6   :  { %v2070_v20 = vadd.f32 %v2061_v7, %v277_v12  ;;  %v2073_v21 = vadd.f32 %v2061_v7, %v278_v13  ;;  %v2078_v24 = vadd.f32 %v2061_v7, %v279_v16  ;;  %v2081_v25 = vadd.f32 %v2061_v7, %v280_v17  ;;  %v1705_v17 = vld [vmem:[%s3741_s0 + $0x40] sm:$0xff]  }
   0x7   :  { %v2084_v26 = vadd.f32 %v2061_v7, %v281_v18  ;;  %v2087_v27 = vadd.f32 %v2061_v7, %v282_v19  ;;  %v2102_v36 = vadd.f32 %v2061_v7, %v283_v22  ;;  %v2105_v37 = vadd.f32 %v2061_v7, %v284_v23 }
   0x8   :  { %v668_v28 = vmul.f32 1.442695, %v2070_v20  ;;  %v670_v29 = vmul.f32 1.442695, %v2073_v21  ;;  %v672_v30 = vmul.f32 1.442695, %v2078_v24  ;;  %v1460_v38 = vunpack.c.l.bf16 %v1701_v32 }
   0x9   :  { %v674_v31 = vmul.f32 1.442695, %v2081_v25  ;;  %v676_v34 = vmul.f32 1.442695, %v2084_v26  ;;  %v678_v35 = vmul.f32 1.442695, %v2087_v27  ;;  %v1461_v39 = vunpack.c.h.bf16 %v1701_v32 }
   0xa   :  { %1761 = vpow2.f32 %v668_v28  ;;  %v1464_v40 = vunpack.c.l.bf16 %v1702_v33  ;;  %vm540_vm0 = vcmp.gt.f32.partialorder %v2070_v20, 0.0  ;;  %vm541_vm1 = vcmp.gt.f32.partialorder %v2073_v21, 0.0 }
   0xb   :  { %1763 = vpow2.f32 %v670_v29  ;;  %v680_v42 = vmul.f32 1.442695, %v2102_v36  ;;  %vm542_vm2 = vcmp.gt.f32.partialorder %v2078_v24, 0.0  ;;  %v682_v43 = vmul.f32 1.442695, %v2105_v37 }
   0xc   :  { %1765 = vpow2.f32 %v672_v30  ;;  %v285_v44 = vmul.f32 %v1460_v38, %v2047_v1  ;;  %v286_v45 = vmul.f32 %v1461_v39, %v2047_v1  ;;  %v287_v46 = vmul.f32 %v1464_v40, %v2047_v1 }
   0xd   :  { %1767 = vpow2.f32 %v674_v31  ;;  %v1465_v47 = vunpack.c.h.bf16 %v1702_v33  ;;  %v1468_v48 = vunpack.c.l.bf16 %v1703_v41  ;;  %v1469_v51 = vunpack.c.h.bf16 %v1703_v41 }
   0xe   :  { %1769 = vpow2.f32 %v676_v34  ;;  %v2119_v49 = vadd.f32 %v2061_v7, %v285_v44  ;;  %v2122_v50 = vadd.f32 %v2061_v7, %v286_v45  ;;  %v2125_v52 = vadd.f32 %v2061_v7, %v287_v46 }
   0xf   :  { %1771 = vpow2.f32 %v678_v35  ;;  %v288_v53 = vmul.f32 %v1465_v47, %v2047_v1  ;;  %v289_v54 = vmul.f32 %v1468_v48, %v2047_v1  ;;  %vm543_vm3 = vcmp.gt.f32.partialorder %v2081_v25, 0.0 }
  0x10   :  { %1773 = vpow2.f32 %v680_v42  ;;  %vm544_vm4 = vcmp.gt.f32.partialorder %v2084_v26, 0.0  ;;  %v684_v56 = vmul.f32 1.442695, %v2119_v49  ;;  %v686_v57 = vmul.f32 1.442695, %v2122_v50 }
  0x11   :  { %1775 = vpow2.f32 %v682_v43  ;;  %vm545_vm5 = vcmp.gt.f32.partialorder %v2087_v27, 0.0  ;;  %v688_v58 = vmul.f32 1.442695, %v2125_v52  ;;  %v2139_v59 = vadd.f32 %v2061_v7, %v288_v53 }
  0x12   :  { %v2142_v60 = vadd.f32 %v2061_v7, %v289_v54  ;;  %vm546_vm6 = vcmp.gt.f32.partialorder %v2102_v36, 0.0  ;;  %1777 = vpow2.f32 %v684_v56  ;;  %v290_v62 = vmul.f32 %v1469_v51, %v2047_v1 }
  0x13   :  { %v1472_v63 = vunpack.c.l.bf16 %v1704_v55  ;;  %vm547_vm7 = vcmp.gt.f32.partialorder %v2105_v37, 0.0  ;;  %1779 = vpow2.f32 %v686_v57  ;;  %v690_v3 = vmul.f32 1.442695, %v2139_v59 }
  0x14   :  { %v1762_v61 = vpop.eup %1761  ;;  %vm548_vm8 = vcmp.gt.f32.partialorder %v2119_v49, 0.0  ;;  %1781 = vpow2.f32 %v688_v58  ;;  %v692_v6 = vmul.f32 1.442695, %v2142_v60  ;;  %v1473_v8 = vunpack.c.h.bf16 %v1704_v55 }
  0x15   :  { %v1764_v0 = vpop.eup %1763  ;;  %v1314_v2 = vadd.f32 -1.0, %v1762_v61  ;;  %1783 = vpow2.f32 %v690_v3  ;;  %v2154_v12 = vadd.f32 %v2061_v7, %v290_v62  ;;  %v291_v16 = vmul.f32 %v1472_v63, %v2047_v1 }
  0x16   :  { %v1766_v4 = vpop.eup %1765  ;;  %v1315_v5 = vadd.f32 -1.0, %v1764_v0  ;;  %1785 = vpow2.f32 %v692_v6  ;;  %vm549_vm9 = vcmp.gt.f32.partialorder %v2122_v50, 0.0  ;;  %v1476_v33 = vunpack.c.l.bf16 %v1705_v17  ;;  %v1708_v6 = vld [vmem:[%s3741_s0 + $0x58] sm:$0xff]  }
  0x17   :  { %v1768_v9 = vpop.eup %1767  ;;  %v1052_v10 = vsel %vm540_vm0, %v2070_v20, %v1314_v2  ;;  %v1316_v11 = vadd.f32 -1.0, %v1766_v4  ;;  %v2181_v29 = vadd.f32 %v2061_v7, %v291_v16  ;;  %vm550_vm10 = vcmp.gt.f32.partialorder %v2125_v52, 0.0  ;;  %v1707_v4 = vld [vmem:[%s3741_s0 + $0x50] sm:$0xff]  }
  0x18   :  { %v1770_v13 = vpop.eup %1769  ;;  %1180 = vst [vmem:[%s3744_s3] sm:$0xff] %v1052_v10  ;;  %v1053_v14 = vsel %vm541_vm1, %v2073_v21, %v1315_v5  ;;  %v1317_v15 = vadd.f32 -1.0, %v1768_v9  ;;  %v694_v21 = vmul.f32 1.442695, %v2154_v12  ;;  %v293_v40 = vmul.f32 %v1476_v33, %v2047_v1  ;;  %v1709_v10 = vld [vmem:[%s3741_s0 + $0x60] sm:$0xff]  }
  0x19   :  { %v1772_v18 = vpop.eup %1771  ;;  %1181 = vst [vmem:[%s3744_s3 + $0x8] sm:$0xff] %v1053_v14  ;;  %v1054_v19 = vsel %vm542_vm2, %v2078_v24, %v1316_v11  ;;  %v1318_v20 = vadd.f32 -1.0, %v1770_v13  ;;  %v292_v24 = vmul.f32 %v1473_v8, %v2047_v1  ;;  %v1477_v41 = vunpack.c.h.bf16 %v1705_v17 }
  0x1a   :  { %v1774_v22 = vpop.eup %1773  ;;  %1182 = vst [vmem:[%s3744_s3 + $0x10] sm:$0xff] %v1054_v19  ;;  %v1055_v23 = vsel %vm543_vm3, %v2081_v25, %v1317_v15  ;;  %v1319_v28 = vadd.f32 -1.0, %v1772_v18  ;;  %1787 = vpow2.f32 %v694_v21  ;;  %v1706_v25 = vld [vmem:[%s3741_s0 + $0x48] sm:$0xff]   ;;  %vm551_vm11 = vcmp.gt.f32.partialorder %v2139_v59, 0.0 }
  0x1b   :  { %v1776_v30 = vpop.eup %1775  ;;  %1183 = vst [vmem:[%s3744_s3 + $0x18] sm:$0xff] %v1055_v23  ;;  %v1056_v31 = vsel %vm544_vm4, %v2084_v26, %v1318_v20  ;;  %v1320_v32 = vadd.f32 -1.0, %v1774_v22  ;;  %v696_v26 = vmul.f32 1.442695, %v2181_v29  ;;  %v2208_v39 = vadd.f32 %v2061_v7, %v292_v24  ;;  %v1710_v24 = vld [vmem:[%s3741_s0 + $0x68] sm:$0xff]  }
  0x1c   :  { %1184 = vst [vmem:[%s3744_s3 + $0x20] sm:$0xff] %v1056_v31  ;;  %v1057_v34 = vsel %vm545_vm5, %v2087_v27, %v1319_v28  ;;  %v1321_v35 = vadd.f32 -1.0, %v1776_v30  ;;  %v1778_v27 = vpop.eup %1777  ;;  %v1480_v43 = vunpack.c.l.bf16 %v1706_v25  ;;  %v1481_v44 = vunpack.c.h.bf16 %v1706_v25 }
  0x1d   :  { %1185 = vst [vmem:[%s3744_s3 + $0x28] sm:$0xff] %v1057_v34  ;;  %v1058_v38 = vsel %vm546_vm6, %v2102_v36, %v1320_v32  ;;  %1789 = vpow2.f32 %v696_v26  ;;  %v1780_v45 = vpop.eup %1779  ;;  %v1322_v36 = vadd.f32 -1.0, %v1778_v27  ;;  %v698_v46 = vmul.f32 1.442695, %v2208_v39 }
  0x1e   :  { %1186 = vst [vmem:[%s3744_s3 + $0x30] sm:$0xff] %v1058_v38  ;;  %v1059_v42 = vsel %vm547_vm7, %v2105_v37, %v1321_v35  ;;  %v2223_v47 = vadd.f32 %v2061_v7, %v293_v40  ;;  %v1782_v48 = vpop.eup %1781  ;;  %v1323_v51 = vadd.f32 -1.0, %v1780_v45  ;;  %v294_v37 = vmul.f32 %v1477_v41, %v2047_v1  ;;  %v1711_v45 = vld [vmem:[%s3741_s0 + $0x70] sm:$0xff]  }
  0x1f   :  { %1187 = vst [vmem:[%s3744_s3 + $0x38] sm:$0xff] %v1059_v42  ;;  %v295_v53 = vmul.f32 %v1480_v43, %v2047_v1  ;;  %v296_v54 = vmul.f32 %v1481_v44, %v2047_v1  ;;  %v1784_v55 = vpop.eup %1783  ;;  %v1060_v56 = vsel %vm548_vm8, %v2119_v49, %v1322_v36  ;;  %v1324_v57 = vadd.f32 -1.0, %v1782_v48 }
  0x20   :  { %vm552_vm12 = vcmp.gt.f32.partialorder %v2142_v60, 0.0  ;;  %1791 = vpow2.f32 %v698_v46  ;;  %v1786_v58 = vpop.eup %1785  ;;  %1188 = vst [vmem:[%s3744_s3 + $0x40] sm:$0xff] %v1060_v56  ;;  %v1061_v61 = vsel %vm549_vm9, %v2122_v50, %v1323_v51  ;;  %v1325_v62 = vadd.f32 -1.0, %v1784_v55 }
  0x21   :  { %v700_v63 = vmul.f32 1.442695, %v2223_v47  ;;  %v2240_v0 = vadd.f32 %v2061_v7, %v294_v37  ;;  %1189 = vst [vmem:[%s3744_s3 + $0x48] sm:$0xff] %v1061_v61  ;;  %v1062_v49 = vsel %vm550_vm10, %v2125_v52, %v1324_v57  ;;  %v1326_v2 = vadd.f32 -1.0, %v1786_v58 }
  0x22   :  { %v2249_v3 = vadd.f32 %v2061_v7, %v295_v53  ;;  %v2252_v50 = vadd.f32 %v2061_v7, %v296_v54  ;;  %1190 = vst [vmem:[%s3744_s3 + $0x50] sm:$0xff] %v1062_v49  ;;  %v1063_v5 = vsel %vm551_vm11, %v2139_v59, %v1325_v62  ;;  %vm553_vm13 = vcmp.gt.f32.partialorder %v2154_v12, 0.0 }
  0x23   :  { %1793 = vpow2.f32 %v700_v63  ;;  %v702_v52 = vmul.f32 1.442695, %v2240_v0  ;;  %1191 = vst [vmem:[%s3744_s3 + $0x58] sm:$0xff] %v1063_v5  ;;  %v1064_v9 = vsel %vm552_vm12, %v2142_v60, %v1326_v2  ;;  %vm554_vm14 = vcmp.gt.f32.partialorder %v2181_v29, 0.0 }
  0x24   :  { %v1788_v8 = vpop.eup %1787  ;;  %v704_v59 = vmul.f32 1.442695, %v2249_v3  ;;  %1192 = vst [vmem:[%s3744_s3 + $0x60] sm:$0xff] %v1064_v9  ;;  %v706_v13 = vmul.f32 1.442695, %v2252_v50  ;;  %v1484_v14 = vunpack.c.l.bf16 %v1707_v4  ;;  %v1485_v60 = vunpack.c.h.bf16 %v1707_v4  ;;  %v1712_v4 = vld [vmem:[%s3741_s0 + $0x78] sm:$0xff]  }
  0x25   :  { %v1327_v11 = vadd.f32 -1.0, %v1788_v8  ;;  %1795 = vpow2.f32 %v702_v52  ;;  %v1488_v15 = vunpack.c.l.bf16 %v1708_v6  ;;  %v1489_v16 = vunpack.c.h.bf16 %v1708_v6 }
  0x26   :  { %1797 = vpow2.f32 %v704_v59  ;;  %v297_v19 = vmul.f32 %v1484_v14, %v2047_v1  ;;  %v1492_v20 = vunpack.c.l.bf16 %v1709_v10  ;;  %v298_v22 = vmul.f32 %v1485_v60, %v2047_v1 }
  0x27   :  { %v1790_v17 = vpop.eup %1789  ;;  %v1065_v18 = vsel %vm553_vm13, %v2154_v12, %v1327_v11  ;;  %1799 = vpow2.f32 %v706_v13  ;;  %v299_v23 = vmul.f32 %v1488_v15, %v2047_v1  ;;  %v300_v28 = vmul.f32 %v1489_v16, %v2047_v1 }
  0x28   :  { %1193 = vst [vmem:[%s3744_s3 + $0x68] sm:$0xff] %v1065_v18  ;;  %v1328_v21 = vadd.f32 -1.0, %v1790_v17  ;;  %vm555_vm15 = vcmp.gt.f32.partialorder %v2208_v39, 0.0  ;;  %v2296_v12 = vadd.f32 %v2061_v7, %v297_v19  ;;  %v301_v30 = vmul.f32 %v1492_v20, %v2047_v1 }
  0x29   :  { %v1493_v31 = vunpack.c.h.bf16 %v1709_v10  ;;  %v2303_v25 = vadd.f32 %v2061_v7, %v298_v22  ;;  %v2306_v34 = vadd.f32 %v2061_v7, %v299_v23  ;;  %v2309_v35 = vadd.f32 %v2061_v7, %v300_v28 }
  0x2a   :  { %v1792_v32 = vpop.eup %1791  ;;  %v1066_v33 = vsel %vm554_vm14, %v2181_v29, %v1328_v21  ;;  %v708_v38 = vmul.f32 1.442695, %v2296_v12  ;;  %v2316_v40 = vadd.f32 %v2061_v7, %v301_v30  ;;  %v1496_v29 = vunpack.c.l.bf16 %v1710_v24 }
  0x2b   :  { %1194 = vst [vmem:[%s3744_s3 + $0x70] sm:$0xff] %v1066_v33  ;;  %v1329_v26 = vadd.f32 -1.0, %v1792_v32  ;;  %vm556_vm0 = vcmp.gt.f32.partialorder %v2223_v47, 0.0  ;;  %vm557_vm1 = vcmp.gt.f32.partialorder %v2240_v0, 0.0  ;;  %v710_v41 = vmul.f32 1.442695, %v2303_v25 }
  0x2c   :  { %v712_v27 = vmul.f32 1.442695, %v2306_v34  ;;  %vm558_vm2 = vcmp.gt.f32.partialorder %v2249_v3, 0.0  ;;  %1801 = vpow2.f32 %v708_v38  ;;  %v714_v44 = vmul.f32 1.442695, %v2309_v35 }
  0x2d   :  { %v1794_v42 = vpop.eup %1793  ;;  %v1067_v43 = vsel %vm555_vm15, %v2208_v39, %v1329_v26  ;;  %vm559_vm3 = vcmp.gt.f32.partialorder %v2252_v50, 0.0  ;;  %1803 = vpow2.f32 %v710_v41  ;;  %v716_v46 = vmul.f32 1.442695, %v2316_v40 }
  0x2e   :  { %1195 = vst [vmem:[%s3744_s3 + $0x78] sm:$0xff] %v1067_v43  ;;  %v1330_v36 = vadd.f32 -1.0, %v1794_v42  ;;  %1805 = vpow2.f32 %v712_v27  ;;  %v302_v48 = vmul.f32 %v1493_v31, %v2047_v1  ;;  %v303_v51 = vmul.f32 %v1496_v29, %v2047_v1  ;;  %v1715_v43 = vld [vmem:[%s3741_s0 + $0x90] sm:$0xff]  }
  0x2f   :  { %v1796_v39 = vpop.eup %1795  ;;  %v1497_v37 = vunpack.c.h.bf16 %v1710_v24  ;;  %1807 = vpow2.f32 %v714_v44  ;;  %v1500_v56 = vunpack.c.l.bf16 %v1711_v45  ;;  %vm560_vm4 = vcmp.gt.f32.partialorder %v2296_v12, 0.0 }
  0x30   :  { %v1798_v53 = vpop.eup %1797  ;;  %v1068_v54 = vsel %vm556_vm0, %v2223_v47, %v1330_v36  ;;  %v1331_v55 = vadd.f32 -1.0, %v1796_v39  ;;  %1809 = vpow2.f32 %v716_v46  ;;  %v2344_v61 = vadd.f32 %v2061_v7, %v302_v48 }
  0x31   :  { %v1800_v57 = vpop.eup %1799  ;;  %1196 = vst [vmem:[%s3744_s3 + $0x80] sm:$0xff] %v1068_v54  ;;  %v1332_v58 = vadd.f32 -1.0, %v1798_v53  ;;  %v2347_v62 = vadd.f32 %v2061_v7, %v303_v51  ;;  %v304_v49 = vmul.f32 %v1497_v37, %v2047_v1  ;;  %v305_v2 = vmul.f32 %v1500_v56, %v2047_v1 }
  0x32   :  { %v1069_v47 = vsel %vm557_vm1, %v2240_v0, %v1331_v55  ;;  %v1333_v63 = vadd.f32 -1.0, %v1800_v57  ;;  %vm561_vm5 = vcmp.gt.f32.partialorder %v2303_v25, 0.0  ;;  %v718_v0 = vmul.f32 1.442695, %v2344_v61 }
  0x33   :  { %1197 = vst [vmem:[%s3744_s3 + $0x88] sm:$0xff] %v1069_v47  ;;  %v1070_v5 = vsel %vm558_vm2, %v2249_v3, %v1332_v58  ;;  %v720_v6 = vmul.f32 1.442695, %v2347_v62  ;;  %v2374_v8 = vadd.f32 %v2061_v7, %v304_v49  ;;  %v2377_v3 = vadd.f32 %v2061_v7, %v305_v2 }
  0x34   :  { %1198 = vst [vmem:[%s3744_s3 + $0x90] sm:$0xff] %v1070_v5  ;;  %v1071_v52 = vsel %vm559_vm3, %v2252_v50, %v1333_v63  ;;  %1811 = vpow2.f32 %v718_v0  ;;  %v1501_v9 = vunpack.c.h.bf16 %v1711_v45  ;;  %v1504_v59 = vunpack.c.l.bf16 %v1712_v4  ;;  %v1713_v50 = vld [vmem:[%s3741_s0 + $0x80] sm:$0xff]  }
  0x35   :  { %1199 = vst [vmem:[%s3744_s3 + $0x98] sm:$0xff] %v1071_v52  ;;  %v1505_v10 = vunpack.c.h.bf16 %v1712_v4  ;;  %vm562_vm6 = vcmp.gt.f32.partialorder %v2306_v34, 0.0  ;;  %vm563_vm7 = vcmp.gt.f32.partialorder %v2309_v35, 0.0  ;;  %1813 = vpow2.f32 %v720_v6 }
  0x36   :  { %v722_v11 = vmul.f32 1.442695, %v2374_v8  ;;  %v1802_v13 = vpop.eup %1801  ;;  %v724_v14 = vmul.f32 1.442695, %v2377_v3  ;;  %v306_v60 = vmul.f32 %v1501_v9, %v2047_v1  ;;  %v307_v15 = vmul.f32 %v1504_v59, %v2047_v1 }
  0x37   :  { %v308_v16 = vmul.f32 %v1505_v10, %v2047_v1  ;;  %v1804_v17 = vpop.eup %1803  ;;  %v1334_v18 = vadd.f32 -1.0, %v1802_v13  ;;  %v1508_v19 = vunpack.c.l.bf16 %v1713_v50  ;;  %v1509_v20 = vunpack.c.h.bf16 %v1713_v50  ;;  %v1717_v50 = vld [vmem:[%s3741_s0 + $0xa0] sm:$0xff]  }
  0x38   :  { %1815 = vpow2.f32 %v722_v11  ;;  %v1806_v21 = vpop.eup %1805  ;;  %v1335_v22 = vadd.f32 -1.0, %v1804_v17  ;;  %v2393_v23 = vadd.f32 %v2061_v7, %v306_v60  ;;  %v2396_v28 = vadd.f32 %v2061_v7, %v307_v15 }
  0x39   :  { %1817 = vpow2.f32 %v724_v14  ;;  %v1808_v24 = vpop.eup %1807  ;;  %v1072_v30 = vsel %vm560_vm4, %v2296_v12, %v1334_v18  ;;  %v1336_v31 = vadd.f32 -1.0, %v1806_v21  ;;  %v2402_v32 = vadd.f32 %v2061_v7, %v308_v16 }
  0x3a   :  { %v309_v33 = vmul.f32 %v1508_v19, %v2047_v1  ;;  %v1810_v26 = vpop.eup %1809  ;;  %1200 = vst [vmem:[%s3744_s3 + $0xa0] sm:$0xff] %v1072_v30  ;;  %v1073_v38 = vsel %vm561_vm5, %v2303_v25, %v1335_v22  ;;  %v1337_v29 = vadd.f32 -1.0, %v1808_v24  ;;  %vm564_vm8 = vcmp.gt.f32.partialorder %v2316_v40, 0.0  ;;  %v1714_v25 = vld [vmem:[%s3741_s0 + $0x88] sm:$0xff]  }
  0x3b   :  { %v726_v12 = vmul.f32 1.442695, %v2393_v23  ;;  %1201 = vst [vmem:[%s3744_s3 + $0xa8] sm:$0xff] %v1073_v38  ;;  %v1074_v41 = vsel %vm562_vm6, %v2306_v34, %v1336_v31  ;;  %v1338_v27 = vadd.f32 -1.0, %v1810_v26  ;;  %vm565_vm9 = vcmp.gt.f32.partialorder %v2344_v61, 0.0 }
  0x3c   :  { %v728_v42 = vmul.f32 1.442695, %v2396_v28  ;;  %1202 = vst [vmem:[%s3744_s3 + $0xb0] sm:$0xff] %v1074_v41  ;;  %v1075_v34 = vsel %vm563_vm7, %v2309_v35, %v1337_v29  ;;  %vm566_vm10 = vcmp.gt.f32.partialorder %v2347_v62, 0.0  ;;  %v730_v44 = vmul.f32 1.442695, %v2402_v32 }
  0x3d   :  { %1819 = vpow2.f32 %v726_v12  ;;  %1203 = vst [vmem:[%s3744_s3 + $0xb8] sm:$0xff] %v1075_v34  ;;  %v1076_v45 = vsel %vm564_vm8, %v2316_v40, %v1338_v27  ;;  %v2440_v36 = vadd.f32 %v2061_v7, %v309_v33  ;;  %v310_v46 = vmul.f32 %v1509_v20, %v2047_v1  ;;  %v1719_v34 = vld [vmem:[%s3741_s0 + $0xb0] sm:$0xff]  }
  0x3e   :  { %1821 = vpow2.f32 %v728_v42  ;;  %v1812_v39 = vpop.eup %1811  ;;  %1204 = vst [vmem:[%s3744_s3 + $0xc0] sm:$0xff] %v1076_v45  ;;  %v1512_v35 = vunpack.c.l.bf16 %v1714_v25  ;;  %v1513_v48 = vunpack.c.h.bf16 %v1714_v25  ;;  %v1516_v51 = vunpack.c.l.bf16 %v1715_v43 }
  0x3f   :  { %1823 = vpow2.f32 %v730_v44  ;;  %v1814_v37 = vpop.eup %1813  ;;  %v1339_v53 = vadd.f32 -1.0, %v1812_v39  ;;  %vm567_vm11 = vcmp.gt.f32.partialorder %v2374_v8, 0.0  ;;  %v732_v40 = vmul.f32 1.442695, %v2440_v36 }
  0x40   :  { %v2449_v54 = vadd.f32 %v2061_v7, %v310_v46  ;;  %v1340_v55 = vadd.f32 -1.0, %v1814_v37  ;;  %v311_v56 = vmul.f32 %v1512_v35, %v2047_v1  ;;  %v312_v57 = vmul.f32 %v1513_v48, %v2047_v1 }
  0x41   :  { %v313_v58 = vmul.f32 %v1516_v51, %v2047_v1  ;;  %v1077_v63 = vsel %vm565_vm9, %v2344_v61, %v1339_v53  ;;  %vm568_vm12 = vcmp.gt.f32.partialorder %v2377_v3, 0.0  ;;  %1825 = vpow2.f32 %v732_v40  ;;  %v1720_v40 = vld [vmem:[%s3741_s0 + $0xb8] sm:$0xff]  }
  0x42   :  { %v1816_v47 = vpop.eup %1815  ;;  %v734_v49 = vmul.f32 1.442695, %v2449_v54  ;;  %1205 = vst [vmem:[%s3744_s3 + $0xc8] sm:$0xff] %v1077_v63  ;;  %v1078_v4 = vsel %vm566_vm10, %v2347_v62, %v1340_v55  ;;  %v2466_v0 = vadd.f32 %v2061_v7, %v311_v56  ;;  %v2469_v61 = vadd.f32 %v2061_v7, %v312_v57  ;;  %v1716_v62 = vld [vmem:[%s3741_s0 + $0x98] sm:$0xff]  }
  0x43   :  { %v1818_v2 = vpop.eup %1817  ;;  %v1341_v5 = vadd.f32 -1.0, %v1816_v47  ;;  %1206 = vst [vmem:[%s3744_s3 + $0xd0] sm:$0xff] %v1078_v4  ;;  %v2475_v6 = vadd.f32 %v2061_v7, %v313_v58  ;;  %v1517_v9 = vunpack.c.h.bf16 %v1715_v43  ;;  %vm569_vm13 = vcmp.gt.f32.partialorder %v2393_v23, 0.0 }
  0x44   :  { %v1342_v52 = vadd.f32 -1.0, %v1818_v2  ;;  %1827 = vpow2.f32 %v734_v49  ;;  %vm570_vm14 = vcmp.gt.f32.partialorder %v2396_v28, 0.0  ;;  %v736_v10 = vmul.f32 1.442695, %v2466_v0 }
  0x45   :  { %v1079_v59 = vsel %vm567_vm11, %v2374_v8, %v1341_v5  ;;  %vm571_vm15 = vcmp.gt.f32.partialorder %v2402_v32, 0.0  ;;  %v738_v8 = vmul.f32 1.442695, %v2469_v61  ;;  %v740_v13 = vmul.f32 1.442695, %v2475_v6 }
  0x46   :  { %1207 = vst [vmem:[%s3744_s3 + $0xd8] sm:$0xff] %v1079_v59  ;;  %v1080_v11 = vsel %vm568_vm12, %v2377_v3, %v1342_v52  ;;  %1829 = vpow2.f32 %v736_v10  ;;  %v314_v60 = vmul.f32 %v1517_v9, %v2047_v1  ;;  %v1520_v15 = vunpack.c.l.bf16 %v1716_v62 }
  0x47   :  { %v1820_v14 = vpop.eup %1819  ;;  %1208 = vst [vmem:[%s3744_s3 + $0xe0] sm:$0xff] %v1080_v11  ;;  %v1521_v16 = vunpack.c.h.bf16 %v1716_v62  ;;  %1831 = vpow2.f32 %v738_v8  ;;  %v1524_v3 = vunpack.c.l.bf16 %v1717_v50  ;;  %v1525_v19 = vunpack.c.h.bf16 %v1717_v50 }
  0x48   :  { %v1822_v17 = vpop.eup %1821  ;;  %v1343_v18 = vadd.f32 -1.0, %v1820_v14  ;;  %1833 = vpow2.f32 %v740_v13  ;;  %v2503_v22 = vadd.f32 %v2061_v7, %v314_v60  ;;  %v315_v24 = vmul.f32 %v1520_v15, %v2047_v1  ;;  %v1721_v13 = vld [vmem:[%s3741_s0 + $0xc0] sm:$0xff]  }
  0x49   :  { %v1824_v20 = vpop.eup %1823  ;;  %v1344_v21 = vadd.f32 -1.0, %v1822_v17  ;;  %v316_v33 = vmul.f32 %v1521_v16, %v2047_v1  ;;  %v317_v26 = vmul.f32 %v1524_v3, %v2047_v1  ;;  %vm572_vm0 = vcmp.gt.f32.partialorder %v2440_v36, 0.0 }
  0x4a   :  { %v1081_v30 = vsel %vm569_vm13, %v2393_v23, %v1343_v18  ;;  %v1345_v31 = vadd.f32 -1.0, %v1824_v20  ;;  %v742_v29 = vmul.f32 1.442695, %v2503_v22  ;;  %v2520_v12 = vadd.f32 %v2061_v7, %v315_v24 }
  0x4b   :  { %1209 = vst [vmem:[%s3744_s3 + $0xe8] sm:$0xff] %v1081_v30  ;;  %v1082_v38 = vsel %vm570_vm14, %v2396_v28, %v1344_v21  ;;  %v1826_v23 = vpop.eup %1825  ;;  %v2529_v27 = vadd.f32 %v2061_v7, %v316_v33  ;;  %v2532_v28 = vadd.f32 %v2061_v7, %v317_v26  ;;  %v318_v42 = vmul.f32 %v1525_v19, %v2047_v1 }
  0x4c   :  { %1210 = vst [vmem:[%s3744_s3 + $0xf0] sm:$0xff] %v1082_v38  ;;  %v1083_v41 = vsel %vm571_vm15, %v2402_v32, %v1345_v31  ;;  %v1346_v25 = vadd.f32 -1.0, %v1826_v23  ;;  %vm573_vm1 = vcmp.gt.f32.partialorder %v2449_v54, 0.0  ;;  %1835 = vpow2.f32 %v742_v29  ;;  %v1718_v32 = vld [vmem:[%s3741_s0 + $0xa8] sm:$0xff]  }
  0x4d   :  { %1211 = vst [vmem:[%s3744_s3 + $0xf8] sm:$0xff] %v1083_v41  ;;  %v744_v43 = vmul.f32 1.442695, %v2520_v12  ;;  %vm574_vm2 = vcmp.gt.f32.partialorder %v2466_v0, 0.0  ;;  %vm575_vm3 = vcmp.gt.f32.partialorder %v2469_v61, 0.0  ;;  %v2554_v48 = vadd.f32 %v2061_v7, %v318_v42  ;;  %v1722_v31 = vld [vmem:[%s3741_s0 + $0xc8] sm:$0xff]  }
  0x4e   :  { %v1828_v44 = vpop.eup %1827  ;;  %v746_v45 = vmul.f32 1.442695, %v2529_v27  ;;  %v748_v46 = vmul.f32 1.442695, %v2532_v28  ;;  %v1084_v39 = vsel %vm572_vm0, %v2440_v36, %v1346_v25  ;;  %v1528_v51 = vunpack.c.l.bf16 %v1718_v32 }
  0x4f   :  { %v1347_v35 = vadd.f32 -1.0, %v1828_v44  ;;  %1837 = vpow2.f32 %v744_v43  ;;  %1212 = vst [vmem:[%s3744_s3 + $0x100] sm:$0xff] %v1084_v39  ;;  %v1529_v37 = vunpack.c.h.bf16 %v1718_v32  ;;  %v1532_v53 = vunpack.c.l.bf16 %v1719_v34 }
  0x50   :  { %1839 = vpow2.f32 %v746_v45  ;;  %v1830_v55 = vpop.eup %1829  ;;  %vm576_vm4 = vcmp.gt.f32.partialorder %v2475_v6, 0.0  ;;  %v750_v56 = vmul.f32 1.442695, %v2554_v48  ;;  %v319_v47 = vmul.f32 %v1528_v51, %v2047_v1 }
  0x51   :  { %v1085_v36 = vsel %vm573_vm1, %v2449_v54, %v1347_v35  ;;  %1841 = vpow2.f32 %v748_v46  ;;  %v1832_v57 = vpop.eup %1831  ;;  %v1348_v58 = vadd.f32 -1.0, %v1830_v55  ;;  %v320_v63 = vmul.f32 %v1529_v37, %v2047_v1 }
  0x52   :  { %1213 = vst [vmem:[%s3744_s3 + $0x108] sm:$0xff] %v1085_v36  ;;  %v321_v49 = vmul.f32 %v1532_v53, %v2047_v1  ;;  %v1834_v2 = vpop.eup %1833  ;;  %v1349_v4 = vadd.f32 -1.0, %v1832_v57  ;;  %1843 = vpow2.f32 %v750_v56  ;;  %v1533_v54 = vunpack.c.h.bf16 %v1719_v34 }
  0x53   :  { %v1536_v5 = vunpack.c.l.bf16 %v1720_v40  ;;  %v1086_v52 = vsel %vm574_vm2, %v2466_v0, %v1348_v58  ;;  %v1350_v9 = vadd.f32 -1.0, %v1834_v2  ;;  %v2577_v62 = vadd.f32 %v2061_v7, %v319_v47 }
  0x54   :  { %v2580_v59 = vadd.f32 %v2061_v7, %v320_v63  ;;  %1214 = vst [vmem:[%s3744_s3 + $0x110] sm:$0xff] %v1086_v52  ;;  %v1087_v10 = vsel %vm575_vm3, %v2469_v61, %v1349_v4  ;;  %v2589_v50 = vadd.f32 %v2061_v7, %v321_v49  ;;  %v322_v0 = vmul.f32 %v1533_v54, %v2047_v1  ;;  %v1724_v52 = vld [vmem:[%s3741_s0 + $0xd8] sm:$0xff]  }
  0x55   :  { %v323_v11 = vmul.f32 %v1536_v5, %v2047_v1  ;;  %1215 = vst [vmem:[%s3744_s3 + $0x118] sm:$0xff] %v1087_v10  ;;  %v1088_v8 = vsel %vm576_vm4, %v2475_v6, %v1350_v9  ;;  %vm577_vm5 = vcmp.gt.f32.partialorder %v2503_v22, 0.0  ;;  %vm578_vm6 = vcmp.gt.f32.partialorder %v2520_v12, 0.0 }
  0x56   :  { %v752_v61 = vmul.f32 1.442695, %v2577_v62  ;;  %v1836_v14 = vpop.eup %1835  ;;  %1216 = vst [vmem:[%s3744_s3 + $0x120] sm:$0xff] %v1088_v8  ;;  %vm579_vm7 = vcmp.gt.f32.partialorder %v2529_v27, 0.0  ;;  %v754_v60 = vmul.f32 1.442695, %v2580_v59  ;;  %v2612_v15 = vadd.f32 %v2061_v7, %v322_v0 }
  0x57   :  { %v756_v6 = vmul.f32 1.442695, %v2589_v50  ;;  %v1351_v16 = vadd.f32 -1.0, %v1836_v14  ;;  %v2615_v17 = vadd.f32 %v2061_v7, %v323_v11  ;;  %v1537_v18 = vunpack.c.h.bf16 %v1720_v40  ;;  %v2704_v8 = vld [vmem:[%s3743_s2] ss:$0 sm:$0xff] }
  0x58   :  { %1845 = vpow2.f32 %v752_v61  ;;  %vm580_vm8 = vcmp.gt.f32.partialorder %v2532_v28, 0.0  ;;  %v758_v19 = vmul.f32 1.442695, %v2612_v15  ;;  %v1540_v20 = vunpack.c.l.bf16 %v1721_v13 }
  0x59   :  { %v1838_v3 = vpop.eup %1837  ;;  %1847 = vpow2.f32 %v754_v60  ;;  %v1089_v24 = vsel %vm577_vm5, %v2503_v22, %v1351_v16  ;;  %vm581_vm9 = vcmp.gt.f32.partialorder %v2554_v48, 0.0  ;;  %v760_v38 = vmul.f32 1.442695, %v2615_v17 }
  0x5a   :  { %v1840_v21 = vpop.eup %1839  ;;  %v1352_v30 = vadd.f32 -1.0, %v1838_v3  ;;  %1849 = vpow2.f32 %v756_v6  ;;  %1217 = vst [vmem:[%s3744_s3 + $0x128] sm:$0xff] %v1089_v24  ;;  %v324_v29 = vmul.f32 %v1537_v18, %v2047_v1  ;;  %v325_v41 = vmul.f32 %v1540_v20, %v2047_v1  ;;  %v1725_v6 = vld [vmem:[%s3741_s0 + $0xe0] sm:$0xff]  }
  0x5b   :  { %v1842_v33 = vpop.eup %1841  ;;  %v1353_v26 = vadd.f32 -1.0, %v1840_v21  ;;  %1851 = vpow2.f32 %v758_v19  ;;  %v1541_v42 = vunpack.c.h.bf16 %v1721_v13  ;;  %v1544_v34 = vunpack.c.l.bf16 %v1722_v31  ;;  %v2737_v19 = vld [vmem:[%s3742_s1] ss:$0 sm:$0xff] }
  0x5c   :  { %v1090_v22 = vsel %vm578_vm6, %v2520_v12, %v1352_v30  ;;  %v1354_v23 = vadd.f32 -1.0, %v1842_v33  ;;  %v1844_v25 = vpop.eup %1843  ;;  %1853 = vpow2.f32 %v760_v38  ;;  %v2642_v32 = vadd.f32 %v2061_v7, %v324_v29 }
  0x5d   :  { %1218 = vst [vmem:[%s3744_s3 + $0x130] sm:$0xff] %v1090_v22  ;;  %v1091_v43 = vsel %vm579_vm7, %v2529_v27, %v1353_v26  ;;  %v1355_v44 = vadd.f32 -1.0, %v1844_v25  ;;  %v2651_v45 = vadd.f32 %v2061_v7, %v325_v41  ;;  %v326_v46 = vmul.f32 %v1541_v42, %v2047_v1  ;;  %v1723_v27 = vld [vmem:[%s3741_s0 + $0xd0] sm:$0xff]  }
  0x5e   :  { %1219 = vst [vmem:[%s3744_s3 + $0x138] sm:$0xff] %v1091_v43  ;;  %v1092_v12 = vsel %vm580_vm8, %v2532_v28, %v1354_v23  ;;  %vm582_vm10 = vcmp.gt.f32.partialorder %v2577_v62, 0.0  ;;  %v762_v39 = vmul.f32 1.442695, %v2642_v32  ;;  %v327_v28 = vmul.f32 %v1544_v34, %v2047_v1 }
  0x5f   :  { %1220 = vst [vmem:[%s3744_s3 + $0x140] sm:$0xff] %v1092_v12  ;;  %v1545_v35 = vunpack.c.h.bf16 %v1722_v31  ;;  %v1093_v51 = vsel %vm581_vm9, %v2554_v48, %v1355_v44  ;;  %vm583_vm11 = vcmp.gt.f32.partialorder %v2580_v59, 0.0  ;;  %v764_v37 = vmul.f32 1.442695, %v2651_v45  ;;  %v1726_v31 = vld [vmem:[%s3741_s0 + $0xe8] sm:$0xff]  }
  0x60   :  { %v2669_v53 = vadd.f32 %v2061_v7, %v326_v46  ;;  %1221 = vst [vmem:[%s3744_s3 + $0x148] sm:$0xff] %v1093_v51  ;;  %1855 = vpow2.f32 %v762_v39  ;;  %v2675_v40 = vadd.f32 %v2061_v7, %v327_v28  ;;  %v1548_v36 = vunpack.c.l.bf16 %v1723_v27 }
  0x61   :  { %v328_v55 = vmul.f32 %v1545_v35, %v2047_v1  ;;  %vm584_vm12 = vcmp.gt.f32.partialorder %v2589_v50, 0.0  ;;  %1857 = vpow2.f32 %v764_v37  ;;  %v1549_v57 = vunpack.c.h.bf16 %v1723_v27 }
  0x62   :  { %v1846_v56 = vpop.eup %1845  ;;  %v766_v48 = vmul.f32 1.442695, %v2669_v53  ;;  %vm585_vm13 = vcmp.gt.f32.partialorder %v2612_v15, 0.0  ;;  %v768_v63 = vmul.f32 1.442695, %v2675_v40  ;;  %v329_v54 = vmul.f32 %v1548_v36, %v2047_v1 }
  0x63   :  { %v1848_v58 = vpop.eup %1847  ;;  %v1356_v47 = vadd.f32 -1.0, %v1846_v56  ;;  %v2683_v49 = vadd.f32 %v2061_v7, %v328_v55  ;;  %v330_v5 = vmul.f32 %v1549_v57, %v2047_v1  ;;  %vm586_vm14 = vcmp.gt.f32.partialorder %v2615_v17, 0.0  ;;  %v1728_v56 = vld [vmem:[%s3741_s0 + $0xf8] sm:$0xff]  }
  0x64   :  { %v1850_v2 = vpop.eup %1849  ;;  %v1357_v4 = vadd.f32 -1.0, %v1848_v58  ;;  %1859 = vpow2.f32 %v766_v48  ;;  %v1552_v14 = vunpack.c.l.bf16 %v1724_v52  ;;  %v1553_v60 = vunpack.c.h.bf16 %v1724_v52 }
  0x65   :  { %v1852_v9 = vpop.eup %1851  ;;  %v1094_v10 = vsel %vm582_vm10, %v2577_v62, %v1356_v47  ;;  %v1358_v0 = vadd.f32 -1.0, %v1850_v2  ;;  %1861 = vpow2.f32 %v768_v63  ;;  %v770_v11 = vmul.f32 1.442695, %v2683_v49 }
  0x66   :  { %1222 = vst [vmem:[%s3744_s3 + $0x150] sm:$0xff] %v1094_v10  ;;  %v1095_v1 = vsel %vm583_vm11, %v2580_v59, %v1357_v4  ;;  %v1359_v7 = vadd.f32 -1.0, %v1852_v9  ;;  %v2707_v62 = vadd.f32 %v2704_v8, %v329_v54  ;;  %v1854_v61 = vpop.eup %1853  ;;  %v2716_v13 = vadd.f32 %v2704_v8, %v330_v5 }
  0x67   :  { %1223 = vst [vmem:[%s3744_s3 + $0x158] sm:$0xff] %v1095_v1  ;;  %v1096_v59 = vsel %vm584_vm12, %v2589_v50, %v1358_v0  ;;  %v1360_v18 = vadd.f32 -1.0, %v1854_v61  ;;  %vm587_vm15 = vcmp.gt.f32.partialorder %v2642_v32, 0.0  ;;  %1863 = vpow2.f32 %v770_v11 }
  0x68   :  { %1224 = vst [vmem:[%s3744_s3 + $0x160] sm:$0xff] %v1096_v59  ;;  %v1097_v16 = vsel %vm585_vm13, %v2612_v15, %v1359_v7  ;;  %vm588_vm0 = vcmp.gt.f32.partialorder %v2651_v45, 0.0  ;;  %v772_v50 = vmul.f32 1.442695, %v2707_v62  ;;  %v774_v3 = vmul.f32 1.442695, %v2716_v13 }
  0x69   :  { %1225 = vst [vmem:[%s3744_s3 + $0x168] sm:$0xff] %v1097_v16  ;;  %v331_v15 = vmul.f32 %v2737_v19, %v1552_v14  ;;  %v1098_v20 = vsel %vm586_vm14, %v2615_v17, %v1360_v18  ;;  %v332_v21 = vmul.f32 %v2737_v19, %v1553_v60  ;;  %v1556_v24 = vunpack.c.l.bf16 %v1725_v6  ;;  %v1729_v60 = vld [vmem:[%s3741_s0 + $0x100] sm:$0xff]  }
  0x6a   :  { %v1557_v30 = vunpack.c.h.bf16 %v1725_v6  ;;  %v1856_v33 = vpop.eup %1855  ;;  %1226 = vst [vmem:[%s3744_s3 + $0x170] sm:$0xff] %v1098_v20  ;;  %vm589_vm1 = vcmp.gt.f32.partialorder %v2669_v53, 0.0  ;;  %vm590_vm2 = vcmp.gt.f32.partialorder %v2675_v40, 0.0  ;;  %1865 = vpow2.f32 %v772_v50 }
  0x6b   :  { %v2753_v17 = vadd.f32 %v2704_v8, %v331_v15  ;;  %v1858_v26 = vpop.eup %1857  ;;  %v1361_v38 = vadd.f32 -1.0, %v1856_v33  ;;  %1867 = vpow2.f32 %v774_v3  ;;  %v2756_v29 = vadd.f32 %v2704_v8, %v332_v21 }
  0x6c   :  { %v333_v22 = vmul.f32 %v2737_v19, %v1556_v24  ;;  %v1362_v23 = vadd.f32 -1.0, %v1858_v26  ;;  %v334_v42 = vmul.f32 %v2737_v19, %v1557_v30  ;;  %v1560_v25 = vunpack.c.l.bf16 %v1726_v31 }
  0x6d   :  { %v776_v41 = vmul.f32 1.442695, %v2753_v17  ;;  %v1099_v34 = vsel %vm587_vm15, %v2642_v32, %v1361_v38  ;;  %v778_v12 = vmul.f32 1.442695, %v2756_v29  ;;  %v1561_v46 = vunpack.c.h.bf16 %v1726_v31  ;;  %v1727_v32 = vld [vmem:[%s3741_s0 + $0xf0] sm:$0xff]  }
  0x6e   :  { %v1860_v43 = vpop.eup %1859  ;;  %v2766_v44 = vadd.f32 %v2704_v8, %v333_v22  ;;  %1227 = vst [vmem:[%s3744_s3 + $0x178] sm:$0xff] %v1099_v34  ;;  %v1100_v39 = vsel %vm588_vm0, %v2651_v45, %v1362_v23  ;;  %v2775_v35 = vadd.f32 %v2704_v8, %v334_v42  ;;  %vm591_vm3 = vcmp.gt.f32.partialorder %v2683_v49, 0.0 }
  0x6f   :  { %v1862_v27 = vpop.eup %1861  ;;  %v1363_v28 = vadd.f32 -1.0, %v1860_v43  ;;  %1869 = vpow2.f32 %v776_v41  ;;  %1228 = vst [vmem:[%s3744_s3 + $0x180] sm:$0xff] %v1100_v39  ;;  %vm592_vm4 = vcmp.gt.f32.partialorder %v2707_v62, 0.0  ;;  %v335_v36 = vmul.f32 %v2737_v19, %v1560_v25 }
  0x70   :  { %v1364_v51 = vadd.f32 -1.0, %v1862_v27  ;;  %1871 = vpow2.f32 %v778_v12  ;;  %v780_v37 = vmul.f32 1.442695, %v2766_v44  ;;  %v782_v55 = vmul.f32 1.442695, %v2775_v35 }
  0x71   :  { %v1101_v45 = vsel %vm589_vm1, %v2669_v53, %v1363_v28  ;;  %v1864_v48 = vpop.eup %1863  ;;  %v336_v53 = vmul.f32 %v2737_v19, %v1561_v46  ;;  %v1564_v58 = vunpack.c.l.bf16 %v1727_v32  ;;  %v2805_v63 = vadd.f32 %v2704_v8, %v335_v36  ;;  %v1731_v46 = vld [vmem:[%s3741_s0 + $0x110] sm:$0xff]  }
  0x72   :  { %1229 = vst [vmem:[%s3744_s3 + $0x188] sm:$0xff] %v1101_v45  ;;  %v1102_v57 = vsel %vm590_vm2, %v2675_v40, %v1364_v51  ;;  %1873 = vpow2.f32 %v780_v37  ;;  %v1365_v47 = vadd.f32 -1.0, %v1864_v48  ;;  %v1565_v2 = vunpack.c.h.bf16 %v1727_v32 }
  0x73   :  { %1230 = vst [vmem:[%s3744_s3 + $0x190] sm:$0xff] %v1102_v57  ;;  %1875 = vpow2.f32 %v782_v55  ;;  %vm593_vm5 = vcmp.gt.f32.partialorder %v2716_v13, 0.0  ;;  %v2809_v4 = vadd.f32 %v2704_v8, %v336_v53  ;;  %v337_v40 = vmul.f32 %v2737_v19, %v1564_v58 }
  0x74   :  { %v1568_v54 = vunpack.c.l.bf16 %v1728_v56  ;;  %v1866_v5 = vpop.eup %1865  ;;  %v1103_v52 = vsel %vm591_vm3, %v2683_v49, %v1365_v47  ;;  %vm594_vm6 = vcmp.gt.f32.partialorder %v2753_v17, 0.0  ;;  %v784_v9 = vmul.f32 1.442695, %v2805_v63 }
  0x75   :  { %v338_v10 = vmul.f32 %v2737_v19, %v1565_v2  ;;  %v1868_v0 = vpop.eup %1867  ;;  %1231 = vst [vmem:[%s3744_s3 + $0x198] sm:$0xff] %v1103_v52  ;;  %v1366_v1 = vadd.f32 -1.0, %v1866_v5  ;;  %v786_v7 = vmul.f32 1.442695, %v2809_v4  ;;  %v2823_v11 = vadd.f32 %v2704_v8, %v337_v40 }
  0x76   :  { %v1569_v61 = vunpack.c.h.bf16 %v1728_v56  ;;  %v1367_v59 = vadd.f32 -1.0, %v1868_v0  ;;  %1877 = vpow2.f32 %v784_v9  ;;  %v339_v14 = vmul.f32 %v2737_v19, %v1568_v54 }
  0x77   :  { %v2826_v49 = vadd.f32 %v2704_v8, %v338_v10  ;;  %v1104_v6 = vsel %vm592_vm4, %v2707_v62, %v1366_v1  ;;  %vm595_vm7 = vcmp.gt.f32.partialorder %v2756_v29, 0.0  ;;  %1879 = vpow2.f32 %v786_v7 }
  0x78   :  { %v788_v16 = vmul.f32 1.442695, %v2823_v11  ;;  %1232 = vst [vmem:[%s3744_s3 + $0x1a0] sm:$0xff] %v1104_v6  ;;  %v1105_v50 = vsel %vm593_vm5, %v2716_v13, %v1367_v59  ;;  %vm596_vm8 = vcmp.gt.f32.partialorder %v2766_v44, 0.0  ;;  %v2846_v62 = vadd.f32 %v2704_v8, %v339_v14  ;;  %v1730_v13 = vld [vmem:[%s3741_s0 + $0x108] sm:$0xff]   ;;  %v1733_v6 = vld [vmem:[%s3741_s0 + $0x120] sm:$0xff]  }
  0x79   :  { %v1870_v18 = vpop.eup %1869  ;;  %v790_v3 = vmul.f32 1.442695, %v2826_v49  ;;  %1233 = vst [vmem:[%s3744_s3 + $0x1a8] sm:$0xff] %v1105_v50  ;;  %v340_v21 = vmul.f32 %v2737_v19, %v1569_v61  ;;  %v1572_v24 = vunpack.c.l.bf16 %v1729_v60  ;;  %vm597_vm9 = vcmp.gt.f32.partialorder %v2775_v35, 0.0  ;;  %v1734_v50 = vld [vmem:[%s3741_s0 + $0x128] sm:$0xff]  }
  0x7a   :  { %v1872_v15 = vpop.eup %1871  ;;  %v1368_v20 = vadd.f32 -1.0, %v1870_v18  ;;  %1881 = vpow2.f32 %v788_v16  ;;  %v792_v31 = vmul.f32 1.442695, %v2846_v62  ;;  %v1573_v23 = vunpack.c.h.bf16 %v1729_v60 }
  0x7b   :  { %v1369_v30 = vadd.f32 -1.0, %v1872_v15  ;;  %1883 = vpow2.f32 %v790_v3  ;;  %v2861_v38 = vadd.f32 %v2704_v8, %v340_v21  ;;  %v341_v22 = vmul.f32 %v2737_v19, %v1572_v24 }
  0x7c   :  { %v1874_v33 = vpop.eup %1873  ;;  %v1106_v26 = vsel %vm594_vm6, %v2753_v17, %v1368_v20  ;;  %1885 = vpow2.f32 %v792_v31  ;;  %v1576_v43 = vunpack.c.l.bf16 %v1730_v13  ;;  %vm598_vm10 = vcmp.gt.f32.partialorder %v2805_v63, 0.0 }
  0x7d   :  { %v1876_v41 = vpop.eup %1875  ;;  %1234 = vst [vmem:[%s3744_s3 + $0x1b0] sm:$0xff] %v1106_v26  ;;  %v1107_v42 = vsel %vm595_vm7, %v2756_v29, %v1369_v30  ;;  %v1370_v25 = vadd.f32 -1.0, %v1874_v33  ;;  %v794_v34 = vmul.f32 1.442695, %v2861_v38  ;;  %v2876_v12 = vadd.f32 %v2704_v8, %v341_v22 }
  0x7e   :  { %1235 = vst [vmem:[%s3744_s3 + $0x1b8] sm:$0xff] %v1107_v42  ;;  %v1371_v17 = vadd.f32 -1.0, %v1876_v41  ;;  %v342_v27 = vmul.f32 %v2737_v19, %v1573_v23  ;;  %v343_v39 = vmul.f32 %v2737_v19, %v1576_v43  ;;  %v1577_v28 = vunpack.c.h.bf16 %v1730_v13  ;;  %v1735_v43 = vld [vmem:[%s3741_s0 + $0x130] sm:$0xff]  }
  0x7f   :  { %v1108_v29 = vsel %vm596_vm8, %v2766_v44, %v1370_v25  ;;  %vm599_vm11 = vcmp.gt.f32.partialorder %v2809_v4, 0.0  ;;  %1887 = vpow2.f32 %v794_v34  ;;  %v796_v51 = vmul.f32 1.442695, %v2876_v12  ;;  %v1732_v44 = vld [vmem:[%s3741_s0 + $0x118] sm:$0xff]  }
  0x80   :  { %1236 = vst [vmem:[%s3744_s3 + $0x1c0] sm:$0xff] %v1108_v29  ;;  %v1109_v32 = vsel %vm597_vm9, %v2775_v35, %v1371_v17  ;;  %v1878_v37 = vpop.eup %1877  ;;  %v2901_v45 = vadd.f32 %v2704_v8, %v342_v27  ;;  %v2904_v55 = vadd.f32 %v2704_v8, %v343_v39  ;;  %v344_v35 = vmul.f32 %v2737_v19, %v1577_v28 }
  0x81   :  { %1237 = vst [vmem:[%s3744_s3 + $0x1c8] sm:$0xff] %v1109_v32  ;;  %v1580_v36 = vunpack.c.l.bf16 %v1731_v46  ;;  %v1880_v56 = vpop.eup %1879  ;;  %v1372_v48 = vadd.f32 -1.0, %v1878_v37  ;;  %vm600_vm12 = vcmp.gt.f32.partialorder %v2823_v11, 0.0  ;;  %1889 = vpow2.f32 %v796_v51 }
  0x82   :  { %v1581_v57 = vunpack.c.h.bf16 %v1731_v46  ;;  %v1373_v53 = vadd.f32 -1.0, %v1880_v56  ;;  %vm601_vm13 = vcmp.gt.f32.partialorder %v2826_v49, 0.0  ;;  %v798_v58 = vmul.f32 1.442695, %v2901_v45 }
  0x83   :  { %v1584_v47 = vunpack.c.l.bf16 %v1732_v44  ;;  %v1110_v40 = vsel %vm598_vm10, %v2805_v63, %v1372_v48  ;;  %v800_v54 = vmul.f32 1.442695, %v2904_v55  ;;  %v2915_v5 = vadd.f32 %v2704_v8, %v344_v35  ;;  %v1736_v35 = vld [vmem:[%s3741_s0 + $0x138] sm:$0xff]  }
  0x84   :  { %v1882_v2 = vpop.eup %1881  ;;  %v345_v52 = vmul.f32 %v2737_v19, %v1580_v36  ;;  %1238 = vst [vmem:[%s3744_s3 + $0x1d0] sm:$0xff] %v1110_v40  ;;  %v1111_v10 = vsel %vm599_vm11, %v2809_v4, %v1373_v53  ;;  %1891 = vpow2.f32 %v798_v58  ;;  %v346_v63 = vmul.f32 %v2737_v19, %v1581_v57 }
  0x85   :  { %v1884_v9 = vpop.eup %1883  ;;  %v1374_v0 = vadd.f32 -1.0, %v1882_v2  ;;  %1239 = vst [vmem:[%s3744_s3 + $0x1d8] sm:$0xff] %v1111_v10  ;;  %vm602_vm14 = vcmp.gt.f32.partialorder %v2846_v62, 0.0  ;;  %1893 = vpow2.f32 %v800_v54  ;;  %v802_v7 = vmul.f32 1.442695, %v2915_v5 }
  0x86   :  { %v1375_v1 = vadd.f32 -1.0, %v1884_v9  ;;  %v1886_v61 = vpop.eup %1885  ;;  %v2934_v4 = vadd.f32 %v2704_v8, %v345_v52  ;;  %v2937_v14 = vadd.f32 %v2704_v8, %v346_v63  ;;  %v347_v60 = vmul.f32 %v2737_v19, %v1584_v47 }
  0x87   :  { %v1112_v59 = vsel %vm600_vm12, %v2823_v11, %v1374_v0  ;;  %v1376_v16 = vadd.f32 -1.0, %v1886_v61  ;;  %1895 = vpow2.f32 %v802_v7  ;;  %v1585_v18 = vunpack.c.h.bf16 %v1732_v44 }
  0x88   :  { %1240 = vst [vmem:[%s3744_s3 + $0x1e0] sm:$0xff] %v1112_v59  ;;  %v1113_v11 = vsel %vm601_vm13, %v2826_v49, %v1375_v1  ;;  %vm603_vm15 = vcmp.gt.f32.partialorder %v2861_v38, 0.0  ;;  %vm604_vm0 = vcmp.gt.f32.partialorder %v2876_v12, 0.0  ;;  %v804_v3 = vmul.f32 1.442695, %v2934_v4 }
  0x89   :  { %1241 = vst [vmem:[%s3744_s3 + $0x1e8] sm:$0xff] %v1113_v11  ;;  %v806_v15 = vmul.f32 1.442695, %v2937_v14  ;;  %v1888_v49 = vpop.eup %1887  ;;  %v1114_v20 = vsel %vm602_vm14, %v2846_v62, %v1376_v16  ;;  %v2963_v21 = vadd.f32 %v2704_v8, %v347_v60  ;;  %v348_v24 = vmul.f32 %v2737_v19, %v1585_v18 }
  0x8a   :  { %v1588_v13 = vunpack.c.l.bf16 %v1733_v6  ;;  %1242 = vst [vmem:[%s3744_s3 + $0x1f0] sm:$0xff] %v1114_v20  ;;  %v1377_v30 = vadd.f32 -1.0, %v1888_v49  ;;  %1897 = vpow2.f32 %v804_v3  ;;  %v1589_v31 = vunpack.c.h.bf16 %v1733_v6  ;;  %v1738_v20 = vld [vmem:[%s3741_s0 + $0x148] sm:$0xff]  }
  0x8b   :  { %v1592_v33 = vunpack.c.l.bf16 %v1734_v50  ;;  %v1890_v26 = vpop.eup %1889  ;;  %vm605_vm1 = vcmp.gt.f32.partialorder %v2901_v45, 0.0  ;;  %1899 = vpow2.f32 %v806_v15  ;;  %v808_v62 = vmul.f32 1.442695, %v2963_v21 }
  0x8c   :  { %v2972_v22 = vadd.f32 %v2704_v8, %v348_v24  ;;  %v1115_v23 = vsel %vm603_vm15, %v2861_v38, %v1377_v30  ;;  %v1378_v41 = vadd.f32 -1.0, %v1890_v26  ;;  %v349_v42 = vmul.f32 %v2737_v19, %v1588_v13  ;;  %v3087_v26 = vld [vmem:[%s3741_s0 + $0x150] sm:$0xff]  }
  0x8d   :  { %v350_v25 = vmul.f32 %v2737_v19, %v1589_v31  ;;  %1243 = vst [vmem:[%s3744_s3 + $0x1f8] sm:$0xff] %v1115_v23  ;;  %vm606_vm2 = vcmp.gt.f32.partialorder %v2904_v55, 0.0  ;;  %1901 = vpow2.f32 %v808_v62  ;;  %v351_v38 = vmul.f32 %v2737_v19, %v1592_v33 }
  0x8e   :  { %v810_v17 = vmul.f32 1.442695, %v2972_v22  ;;  %v1892_v34 = vpop.eup %1891  ;;  %v1116_v46 = vsel %vm604_vm0, %v2876_v12, %v1378_v41  ;;  %v2992_v29 = vadd.f32 %v2704_v8, %v349_v42  ;;  %v1593_v39 = vunpack.c.h.bf16 %v1734_v50 }
  0x8f   :  { %v2995_v27 = vadd.f32 %v2704_v8, %v350_v25  ;;  %v1894_v28 = vpop.eup %1893  ;;  %1244 = vst [vmem:[%s3744_s3 + $0x200] sm:$0xff] %v1116_v46  ;;  %v1379_v32 = vadd.f32 -1.0, %v1892_v34  ;;  %v3001_v51 = vadd.f32 %v2704_v8, %v351_v38  ;;  %v1596_v44 = vunpack.c.l.bf16 %v1735_v43 }
  0x90   :  { %1903 = vpow2.f32 %v810_v17  ;;  %v1380_v37 = vadd.f32 -1.0, %v1894_v28  ;;  %vm607_vm3 = vcmp.gt.f32.partialorder %v2915_v5, 0.0  ;;  %vm608_vm4 = vcmp.gt.f32.partialorder %v2934_v4, 0.0 }
  0x91   :  { %v812_v12 = vmul.f32 1.442695, %v2992_v29  ;;  %v1896_v36 = vpop.eup %1895  ;;  %v1117_v56 = vsel %vm605_vm1, %v2901_v45, %v1379_v32  ;;  %vm609_vm5 = vcmp.gt.f32.partialorder %v2937_v14, 0.0  ;;  %v814_v48 = vmul.f32 1.442695, %v2995_v27 }
  0x92   :  { %v816_v57 = vmul.f32 1.442695, %v3001_v51  ;;  %1245 = vst [vmem:[%s3744_s3 + $0x208] sm:$0xff] %v1117_v56  ;;  %v1118_v53 = vsel %vm606_vm2, %v2904_v55, %v1380_v37  ;;  %v1381_v58 = vadd.f32 -1.0, %v1896_v36  ;;  %v352_v47 = vmul.f32 %v2737_v19, %v1593_v39 }
  0x93   :  { %1905 = vpow2.f32 %v812_v12  ;;  %1246 = vst [vmem:[%s3744_s3 + $0x210] sm:$0xff] %v1118_v53  ;;  %v353_v45 = vmul.f32 %v2737_v19, %v1596_v44  ;;  %v1597_v2 = vunpack.c.h.bf16 %v1735_v43  ;;  %v1600_v40 = vunpack.c.l.bf16 %v1736_v35 }
  0x94   :  { %1907 = vpow2.f32 %v814_v48  ;;  %v1898_v54 = vpop.eup %1897  ;;  %v1119_v52 = vsel %vm607_vm3, %v2915_v5, %v1381_v58  ;;  %v3030_v55 = vadd.f32 %v2704_v8, %v352_v47  ;;  %v1601_v9 = vunpack.c.h.bf16 %v1736_v35 }
  0x95   :  { %1909 = vpow2.f32 %v816_v57  ;;  %v1900_v10 = vpop.eup %1899  ;;  %1247 = vst [vmem:[%s3744_s3 + $0x218] sm:$0xff] %v1119_v52  ;;  %v1382_v0 = vadd.f32 -1.0, %v1898_v54  ;;  %v3036_v63 = vadd.f32 %v2704_v8, %v353_v45  ;;  %v354_v1 = vmul.f32 %v2737_v19, %v1597_v2  ;;  %v1740_v57 = vld [vmem:[%s3741_s0 + $0x158] sm:$0xff]  }
  0x96   :  { %v355_v7 = vmul.f32 %v2737_v19, %v1600_v40  ;;  %v1383_v61 = vadd.f32 -1.0, %v1900_v10  ;;  %vm610_vm6 = vcmp.gt.f32.partialorder %v2963_v21, 0.0  ;;  %v818_v5 = vmul.f32 1.442695, %v3030_v55 }
  0x97   :  { %v356_v59 = vmul.f32 %v2737_v19, %v1601_v9  ;;  %v1902_v60 = vpop.eup %1901  ;;  %v1120_v6 = vsel %vm608_vm4, %v2934_v4, %v1382_v0  ;;  %vm611_vm7 = vcmp.gt.f32.partialorder %v2972_v22, 0.0  ;;  %v820_v11 = vmul.f32 1.442695, %v3036_v63  ;;  %v1737_v4 = vld [vmem:[%s3741_s0 + $0x140] sm:$0xff]  }
  0x98   :  { %v3049_v16 = vadd.f32 %v2704_v8, %v354_v1  ;;  %1248 = vst [vmem:[%s3744_s3 + $0x220] sm:$0xff] %v1120_v6  ;;  %v1121_v18 = vsel %vm609_vm5, %v2937_v14, %v1383_v61  ;;  %v1384_v50 = vadd.f32 -1.0, %v1902_v60  ;;  %1911 = vpow2.f32 %v818_v5 }
  0x99   :  { %v3058_v3 = vadd.f32 %v2704_v8, %v355_v7  ;;  %1249 = vst [vmem:[%s3744_s3 + $0x228] sm:$0xff] %v1121_v18  ;;  %vm612_vm8 = vcmp.gt.f32.partialorder %v2992_v29, 0.0  ;;  %1913 = vpow2.f32 %v820_v11  ;;  %v3069_v14 = vadd.f32 %v2704_v8, %v356_v59  ;;  %v1741_v7 = vld [vmem:[%s3741_s0 + $0x160] sm:$0xff]  }
  0x9a   :  { %v1904_v15 = vpop.eup %1903  ;;  %v822_v49 = vmul.f32 1.442695, %v3049_v16  ;;  %v1122_v24 = vsel %vm610_vm6, %v2963_v21, %v1384_v50  ;;  %vm613_vm9 = vcmp.gt.f32.partialorder %v2995_v27, 0.0  ;;  %vm614_vm10 = vcmp.gt.f32.partialorder %v3001_v51, 0.0 }
  0x9b   :  { %v1385_v13 = vadd.f32 -1.0, %v1904_v15  ;;  %v824_v30 = vmul.f32 1.442695, %v3058_v3  ;;  %1250 = vst [vmem:[%s3744_s3 + $0x230] sm:$0xff] %v1122_v24  ;;  %v826_v31 = vmul.f32 1.442695, %v3069_v14  ;;  %v1604_v33 = vunpack.c.l.bf16 %v1737_v4 }
  0x9c   :  { %1915 = vpow2.f32 %v822_v49  ;;  %v1605_v23 = vunpack.c.h.bf16 %v1737_v4  ;;  %v1608_v41 = vunpack.c.l.bf16 %v1738_v20  ;;  %v1609_v17 = vunpack.c.h.bf16 %v1738_v20 }
  0x9d   :  { %v1906_v21 = vpop.eup %1905  ;;  %v1123_v62 = vsel %vm611_vm7, %v2972_v22, %v1385_v13  ;;  %1917 = vpow2.f32 %v824_v30  ;;  %v357_v43 = vmul.f32 %v2737_v19, %v1604_v33  ;;  %v1612_v22 = vunpack.c.l.bf16 %v3087_v26  ;;  %v1743_v33 = vld [vmem:[%s3741_s0 + $0x170] sm:$0xff]  }
  0x9e   :  { %v1908_v42 = vpop.eup %1907  ;;  %1251 = vst [vmem:[%s3744_s3 + $0x238] sm:$0xff] %v1123_v62  ;;  %v1386_v25 = vadd.f32 -1.0, %v1906_v21  ;;  %1919 = vpow2.f32 %v826_v31  ;;  %v358_v46 = vmul.f32 %v2737_v19, %v1605_v23  ;;  %v359_v39 = vmul.f32 %v2737_v19, %v1608_v41  ;;  %v1742_v31 = vld [vmem:[%s3741_s0 + $0x168] sm:$0xff]  }
  0x9f   :  { %v1910_v38 = vpop.eup %1909  ;;  %v1387_v34 = vadd.f32 -1.0, %v1908_v42  ;;  %v3103_v44 = vadd.f32 %v2704_v8, %v357_v43  ;;  %v360_v37 = vmul.f32 %v2737_v19, %v1609_v17  ;;  %vm615_vm11 = vcmp.gt.f32.partialorder %v3030_v55, 0.0 }
  0xa0   :  { %v1124_v28 = vsel %vm612_vm8, %v2992_v29, %v1386_v25  ;;  %v1388_v32 = vadd.f32 -1.0, %v1910_v38  ;;  %v3113_v35 = vadd.f32 %v2704_v8, %v358_v46  ;;  %v3116_v36 = vadd.f32 %v2704_v8, %v359_v39 }
  0xa1   :  { %1252 = vst [vmem:[%s3744_s3 + $0x240] sm:$0xff] %v1124_v28  ;;  %v1125_v12 = vsel %vm613_vm9, %v2995_v27, %v1387_v34  ;;  %v361_v29 = vmul.f32 %v2737_v19, %v1612_v22  ;;  %v828_v27 = vmul.f32 1.442695, %v3103_v44  ;;  %v3128_v48 = vadd.f32 %v2704_v8, %v360_v37 }
  0xa2   :  { %1253 = vst [vmem:[%s3744_s3 + $0x248] sm:$0xff] %v1125_v12  ;;  %v1126_v56 = vsel %vm614_vm10, %v3001_v51, %v1388_v32  ;;  %v1912_v53 = vpop.eup %1911  ;;  %vm616_vm12 = vcmp.gt.f32.partialorder %v3036_v63, 0.0  ;;  %vm617_vm13 = vcmp.gt.f32.partialorder %v3049_v16, 0.0  ;;  %v830_v51 = vmul.f32 1.442695, %v3113_v35 }
  0xa3   :  { %1254 = vst [vmem:[%s3744_s3 + $0x250] sm:$0xff] %v1126_v56  ;;  %v832_v58 = vmul.f32 1.442695, %v3116_v36  ;;  %v1914_v47 = vpop.eup %1913  ;;  %v1389_v45 = vadd.f32 -1.0, %v1912_v53  ;;  %vm618_vm14 = vcmp.gt.f32.partialorder %v3058_v3, 0.0  ;;  %1921 = vpow2.f32 %v828_v27  ;;  %v1744_v56 = vld [vmem:[%s3741_s0 + $0x178] sm:$0xff]  }
  0xa4   :  { %v834_v2 = vmul.f32 1.442695, %v3128_v48  ;;  %v1390_v40 = vadd.f32 -1.0, %v1914_v47  ;;  %1923 = vpow2.f32 %v830_v51  ;;  %v3143_v54 = vadd.f32 %v2704_v8, %v361_v29 }
  0xa5   :  { %v1613_v52 = vunpack.c.h.bf16 %v3087_v26  ;;  %v1127_v10 = vsel %vm615_vm11, %v3030_v55, %v1389_v45  ;;  %1925 = vpow2.f32 %v832_v58  ;;  %v1616_v0 = vunpack.c.l.bf16 %v1740_v57 }
  0xa6   :  { %v1916_v9 = vpop.eup %1915  ;;  %v1617_v1 = vunpack.c.h.bf16 %v1740_v57  ;;  %1255 = vst [vmem:[%s3744_s3 + $0x258] sm:$0xff] %v1127_v10  ;;  %v1128_v5 = vsel %vm616_vm12, %v3036_v63, %v1390_v40  ;;  %vm619_vm15 = vcmp.gt.f32.partialorder %v3069_v14, 0.0  ;;  %1927 = vpow2.f32 %v834_v2  ;;  %v1745_v40 = vld [vmem:[%s3741_s0 + $0x180] sm:$0xff]  }
  0xa7   :  { %v1918_v61 = vpop.eup %1917  ;;  %v1391_v59 = vadd.f32 -1.0, %v1916_v9  ;;  %1256 = vst [vmem:[%s3744_s3 + $0x260] sm:$0xff] %v1128_v5  ;;  %v836_v6 = vmul.f32 1.442695, %v3143_v54  ;;  %v362_v11 = vmul.f32 %v2737_v19, %v1613_v52  ;;  %v363_v18 = vmul.f32 %v2737_v19, %v1616_v0 }
  0xa8   :  { %v1920_v55 = vpop.eup %1919  ;;  %v1392_v60 = vadd.f32 -1.0, %v1918_v61  ;;  %v364_v4 = vmul.f32 %v2737_v19, %v1617_v1  ;;  %v1620_v15 = vunpack.c.l.bf16 %v1741_v7  ;;  %v1621_v30 = vunpack.c.h.bf16 %v1741_v7 }
  0xa9   :  { %v1129_v63 = vsel %vm617_vm13, %v3049_v16, %v1391_v59  ;;  %v1393_v50 = vadd.f32 -1.0, %v1920_v55  ;;  %1929 = vpow2.f32 %v836_v6  ;;  %v3176_v20 = vadd.f32 %v2704_v8, %v362_v11 }
  0xaa   :  { %1257 = vst [vmem:[%s3744_s3 + $0x268] sm:$0xff] %v1129_v63  ;;  %v1130_v49 = vsel %vm618_vm14, %v3058_v3, %v1392_v60  ;;  %v3179_v24 = vadd.f32 %v2704_v8, %v363_v18  ;;  %v3188_v13 = vadd.f32 %v2704_v8, %v364_v4  ;;  %v365_v3 = vmul.f32 %v2737_v19, %v1620_v15 }
  0xab   :  { %1258 = vst [vmem:[%s3744_s3 + $0x270] sm:$0xff] %v1130_v49  ;;  %v1131_v16 = vsel %vm619_vm15, %v3069_v14, %v1393_v50  ;;  %vm620_vm0 = vcmp.gt.f32.partialorder %v3103_v44, 0.0  ;;  %vm621_vm1 = vcmp.gt.f32.partialorder %v3113_v35, 0.0  ;;  %v838_v14 = vmul.f32 1.442695, %v3176_v20 }
  0xac   :  { %1259 = vst [vmem:[%s3744_s3 + $0x278] sm:$0xff] %v1131_v16  ;;  %v840_v26 = vmul.f32 1.442695, %v3179_v24  ;;  %vm622_vm2 = vcmp.gt.f32.partialorder %v3116_v36, 0.0  ;;  %v842_v21 = vmul.f32 1.442695, %v3188_v13  ;;  %v3207_v62 = vadd.f32 %v2704_v8, %v365_v3 }
  0xad   :  { %v366_v23 = vmul.f32 %v2737_v19, %v1621_v30  ;;  %v1922_v41 = vpop.eup %1921  ;;  %vm623_vm3 = vcmp.gt.f32.partialorder %v3128_v48, 0.0  ;;  %1931 = vpow2.f32 %v838_v14  ;;  %v1624_v42 = vunpack.c.l.bf16 %v1742_v31 }
  0xae   :  { %v1625_v25 = vunpack.c.h.bf16 %v1742_v31  ;;  %v1924_v43 = vpop.eup %1923  ;;  %v1394_v17 = vadd.f32 -1.0, %v1922_v41  ;;  %1933 = vpow2.f32 %v840_v26  ;;  %v844_v38 = vmul.f32 1.442695, %v3207_v62  ;;  %v1746_v31 = vld [vmem:[%s3741_s0 + $0x188] sm:$0xff]  }
  0xaf   :  { %v1628_v34 = vunpack.c.l.bf16 %v1743_v33  ;;  %v1926_v46 = vpop.eup %1925  ;;  %v1395_v39 = vadd.f32 -1.0, %v1924_v43  ;;  %1935 = vpow2.f32 %v842_v21  ;;  %v3213_v22 = vadd.f32 %v2704_v8, %v366_v23 }
  0xb0   :  { %v367_v28 = vmul.f32 %v2737_v19, %v1624_v42  ;;  %v1928_v32 = vpop.eup %1927  ;;  %v1132_v37 = vsel %vm620_vm0, %v3103_v44, %v1394_v17  ;;  %v1396_v12 = vadd.f32 -1.0, %v1926_v46  ;;  %1937 = vpow2.f32 %v844_v38 }
  0xb1   :  { %v368_v29 = vmul.f32 %v2737_v19, %v1625_v25  ;;  %1260 = vst [vmem:[%s3744_s3 + $0x280] sm:$0xff] %v1132_v37  ;;  %v1133_v27 = vsel %vm621_vm1, %v3113_v35, %v1395_v39  ;;  %v1397_v57 = vadd.f32 -1.0, %v1928_v32  ;;  %vm624_vm4 = vcmp.gt.f32.partialorder %v3143_v54, 0.0 }
  0xb2   :  { %v846_v44 = vmul.f32 1.442695, %v3213_v22  ;;  %1261 = vst [vmem:[%s3744_s3 + $0x288] sm:$0xff] %v1133_v27  ;;  %v1134_v53 = vsel %vm622_vm2, %v3116_v36, %v1396_v12  ;;  %v3238_v51 = vadd.f32 %v2704_v8, %v367_v28  ;;  %v369_v35 = vmul.f32 %v2737_v19, %v1628_v34 }
  0xb3   :  { %v3241_v58 = vadd.f32 %v2704_v8, %v368_v29  ;;  %v1930_v47 = vpop.eup %1929  ;;  %1262 = vst [vmem:[%s3744_s3 + $0x290] sm:$0xff] %v1134_v53  ;;  %v1135_v45 = vsel %vm623_vm3, %v3128_v48, %v1397_v57  ;;  %v1629_v2 = vunpack.c.h.bf16 %v1743_v33  ;;  %v1632_v36 = vunpack.c.l.bf16 %v1744_v56 }
  0xb4   :  { %1939 = vpow2.f32 %v846_v44  ;;  %1263 = vst [vmem:[%s3744_s3 + $0x298] sm:$0xff] %v1135_v45  ;;  %v1398_v52 = vadd.f32 -1.0, %v1930_v47  ;;  %vm625_vm5 = vcmp.gt.f32.partialorder %v3176_v20, 0.0  ;;  %vm626_vm6 = vcmp.gt.f32.partialorder %v3179_v24, 0.0 }
  0xb5   :  { %v848_v9 = vmul.f32 1.442695, %v3238_v51  ;;  %v850_v48 = vmul.f32 1.442695, %v3241_v58  ;;  %v3261_v10 = vadd.f32 %v2704_v8, %v369_v35  ;;  %v370_v0 = vmul.f32 %v2737_v19, %v1629_v2 }
  0xb6   :  { %v371_v1 = vmul.f32 %v2737_v19, %v1632_v36  ;;  %v1136_v7 = vsel %vm624_vm4, %v3143_v54, %v1398_v52  ;;  %v1633_v61 = vunpack.c.h.bf16 %v1744_v56  ;;  %v1636_v5 = vunpack.c.l.bf16 %v1745_v40 }
  0xb7   :  { %1941 = vpow2.f32 %v848_v9  ;;  %v1932_v59 = vpop.eup %1931  ;;  %1264 = vst [vmem:[%s3744_s3 + $0x2a0] sm:$0xff] %v1136_v7  ;;  %vm627_vm7 = vcmp.gt.f32.partialorder %v3188_v13, 0.0  ;;  %v852_v55 = vmul.f32 1.442695, %v3261_v10  ;;  %v3274_v60 = vadd.f32 %v2704_v8, %v370_v0 }
  0xb8   :  { %1943 = vpow2.f32 %v850_v48  ;;  %v1934_v6 = vpop.eup %1933  ;;  %v1399_v11 = vadd.f32 -1.0, %v1932_v59  ;;  %v3277_v54 = vadd.f32 %v2704_v8, %v371_v1  ;;  %v372_v18 = vmul.f32 %v2737_v19, %v1633_v61  ;;  %v1749_v61 = vld [vmem:[%s3741_s0 + $0x1a0] sm:$0xff]  }
  0xb9   :  { %v373_v63 = vmul.f32 %v2737_v19, %v1636_v5  ;;  %v1936_v50 = vpop.eup %1935  ;;  %v1400_v4 = vadd.f32 -1.0, %v1934_v6  ;;  %vm628_vm8 = vcmp.gt.f32.partialorder %v3207_v62, 0.0  ;;  %1945 = vpow2.f32 %v852_v55 }
  0xba   :  { %v854_v15 = vmul.f32 1.442695, %v3274_v60  ;;  %v1938_v49 = vpop.eup %1937  ;;  %v1137_v16 = vsel %vm625_vm5, %v3176_v20, %v1399_v11  ;;  %v1401_v3 = vadd.f32 -1.0, %v1936_v50  ;;  %vm629_vm9 = vcmp.gt.f32.partialorder %v3213_v22, 0.0 }
  0xbb   :  { %v856_v30 = vmul.f32 1.442695, %v3277_v54  ;;  %1265 = vst [vmem:[%s3744_s3 + $0x2a8] sm:$0xff] %v1137_v16  ;;  %v1138_v33 = vsel %vm626_vm6, %v3179_v24, %v1400_v4  ;;  %v1402_v14 = vadd.f32 -1.0, %v1938_v49  ;;  %v3298_v20 = vadd.f32 %v2704_v8, %v372_v18  ;;  %v1747_v24 = vld [vmem:[%s3741_s0 + $0x190] sm:$0xff]  }
  0xbc   :  { %1947 = vpow2.f32 %v854_v15  ;;  %1266 = vst [vmem:[%s3744_s3 + $0x2b0] sm:$0xff] %v1138_v33  ;;  %v1139_v26 = vsel %vm627_vm7, %v3188_v13, %v1401_v3  ;;  %v3307_v21 = vadd.f32 %v2704_v8, %v373_v63  ;;  %v1637_v23 = vunpack.c.h.bf16 %v1745_v40  ;;  %v3403_v15 = vld [vmem:[%s3742_s1] ss:$0 sm:$0xff] }
  0xbd   :  { %1949 = vpow2.f32 %v856_v30  ;;  %1267 = vst [vmem:[%s3744_s3 + $0x2b8] sm:$0xff] %v1139_v26  ;;  %v1140_v42 = vsel %vm628_vm8, %v3207_v62, %v1402_v14  ;;  %vm630_vm10 = vcmp.gt.f32.partialorder %v3238_v51, 0.0  ;;  %v858_v13 = vmul.f32 1.442695, %v3298_v20  ;;  %v3415_v26 = vld [vmem:[%s3743_s2] ss:$0 sm:$0xff] }
  0xbe   :  { %v1940_v41 = vpop.eup %1939  ;;  %v1640_v25 = vunpack.c.l.bf16 %v1746_v31  ;;  %1268 = vst [vmem:[%s3744_s3 + $0x2c0] sm:$0xff] %v1140_v42  ;;  %vm631_vm11 = vcmp.gt.f32.partialorder %v3241_v58, 0.0  ;;  %v860_v17 = vmul.f32 1.442695, %v3307_v21  ;;  %v374_v38 = vmul.f32 %v2737_v19, %v1637_v23 }
  0xbf   :  { %v1403_v43 = vadd.f32 -1.0, %v1940_v41  ;;  %1951 = vpow2.f32 %v858_v13  ;;  %v1641_v62 = vunpack.c.h.bf16 %v1746_v31  ;;  %v1644_v46 = vunpack.c.l.bf16 %v1747_v24 }
  0xc0   :  { %v375_v34 = vmul.f32 %v2737_v19, %v1640_v25  ;;  %1953 = vpow2.f32 %v860_v17  ;;  %v3331_v32 = vadd.f32 %v2704_v8, %v374_v38  ;;  %v1645_v37 = vunpack.c.h.bf16 %v1747_v24 }
  0xc1   :  { %v1942_v39 = vpop.eup %1941  ;;  %v1141_v28 = vsel %vm629_vm9, %v3213_v22, %v1403_v43  ;;  %v376_v27 = vmul.f32 %v2737_v19, %v1641_v62  ;;  %v377_v57 = vmul.f32 %v2737_v19, %v1644_v46  ;;  %vm632_vm12 = vcmp.gt.f32.partialorder %v3261_v10, 0.0 }
  0xc2   :  { %v1944_v12 = vpop.eup %1943  ;;  %1269 = vst [vmem:[%s3744_s3 + $0x2c8] sm:$0xff] %v1141_v28  ;;  %v1404_v29 = vadd.f32 -1.0, %v1942_v39  ;;  %v3337_v56 = vadd.f32 %v2704_v8, %v375_v34  ;;  %v862_v22 = vmul.f32 1.442695, %v3331_v32  ;;  %v378_v53 = vmul.f32 %v2737_v19, %v1645_v37 }
  0xc3   :  { %v1405_v44 = vadd.f32 -1.0, %v1944_v12  ;;  %v1946_v35 = vpop.eup %1945  ;;  %vm633_vm13 = vcmp.gt.f32.partialorder %v3274_v60, 0.0  ;;  %v3350_v2 = vadd.f32 %v2704_v8, %v376_v27  ;;  %v3359_v40 = vadd.f32 %v2704_v8, %v377_v57 }
  0xc4   :  { %v1142_v47 = vsel %vm630_vm10, %v3238_v51, %v1404_v29  ;;  %v864_v45 = vmul.f32 1.442695, %v3337_v56  ;;  %v1406_v36 = vadd.f32 -1.0, %v1946_v35  ;;  %1955 = vpow2.f32 %v862_v22 }
  0xc5   :  { %1270 = vst [vmem:[%s3744_s3 + $0x2d0] sm:$0xff] %v1142_v47  ;;  %v1143_v19 = vsel %vm631_vm11, %v3241_v58, %v1405_v44  ;;  %vm634_vm14 = vcmp.gt.f32.partialorder %v3277_v54, 0.0  ;;  %v866_v52 = vmul.f32 1.442695, %v3350_v2  ;;  %v3367_v9 = vadd.f32 %v2704_v8, %v378_v53  ;;  %v1748_v58 = vld [vmem:[%s3741_s0 + $0x198] sm:$0xff]  }
  0xc6   :  { %v1948_v51 = vpop.eup %1947  ;;  %1271 = vst [vmem:[%s3744_s3 + $0x2d8] sm:$0xff] %v1143_v19  ;;  %1957 = vpow2.f32 %v864_v45  ;;  %v1144_v0 = vsel %vm632_vm12, %v3261_v10, %v1406_v36  ;;  %vm635_vm15 = vcmp.gt.f32.partialorder %v3298_v20, 0.0  ;;  %v868_v7 = vmul.f32 1.442695, %v3359_v40  ;;  %v1750_v10 = vld [vmem:[%s3741_s0 + $0x1a8] sm:$0xff]  }
  0xc7   :  { %v1950_v48 = vpop.eup %1949  ;;  %v1407_v1 = vadd.f32 -1.0, %v1948_v51  ;;  %1272 = vst [vmem:[%s3744_s3 + $0x2e0] sm:$0xff] %v1144_v0  ;;  %vm636_vm0 = vcmp.gt.f32.partialorder %v3307_v21, 0.0  ;;  %1959 = vpow2.f32 %v866_v52  ;;  %v870_v5 = vmul.f32 1.442695, %v3367_v9  ;;  %v1753_v52 = vld [vmem:[%s3741_s0 + $0x1c0] sm:$0xff]  }
  0xc8   :  { %v1408_v8 = vadd.f32 -1.0, %v1950_v48  ;;  %1961 = vpow2.f32 %v868_v7  ;;  %v1648_v55 = vunpack.c.l.bf16 %v1748_v58  ;;  %v1649_v6 = vunpack.c.h.bf16 %v1748_v58 }
  0xc9   :  { %v1145_v59 = vsel %vm633_vm13, %v3274_v60, %v1407_v1  ;;  %v1952_v11 = vpop.eup %1951  ;;  %1963 = vpow2.f32 %v870_v5  ;;  %v1652_v63 = vunpack.c.l.bf16 %v1749_v61  ;;  %v1653_v50 = vunpack.c.h.bf16 %v1749_v61 }
  0xca   :  { %1273 = vst [vmem:[%s3744_s3 + $0x2e8] sm:$0xff] %v1145_v59  ;;  %v1146_v18 = vsel %vm634_vm14, %v3277_v54, %v1408_v8  ;;  %v1954_v4 = vpop.eup %1953  ;;  %v1409_v60 = vadd.f32 -1.0, %v1952_v11  ;;  %v379_v49 = vmul.f32 %v3403_v15, %v1648_v55  ;;  %v380_v16 = vmul.f32 %v3403_v15, %v1649_v6 }
  0xcb   :  { %1274 = vst [vmem:[%s3744_s3 + $0x2f0] sm:$0xff] %v1146_v18  ;;  %v1656_v3 = vunpack.c.l.bf16 %v1750_v10  ;;  %v1410_v54 = vadd.f32 -1.0, %v1954_v4  ;;  %v381_v30 = vmul.f32 %v3403_v15, %v1652_v63  ;;  %v382_v31 = vmul.f32 %v3403_v15, %v1653_v50 }
  0xcc   :  { %v1657_v33 = vunpack.c.h.bf16 %v1750_v10  ;;  %v1147_v14 = vsel %vm635_vm15, %v3298_v20, %v1409_v60  ;;  %v3418_v23 = vadd.f32 %v3415_v26, %v379_v49  ;;  %v3421_v24 = vadd.f32 %v3415_v26, %v380_v16 }
  0xcd   :  { %v383_v41 = vmul.f32 %v3403_v15, %v1656_v3  ;;  %1275 = vst [vmem:[%s3744_s3 + $0x2f8] sm:$0xff] %v1147_v14  ;;  %v1148_v20 = vsel %vm636_vm0, %v3307_v21, %v1410_v54  ;;  %v3431_v42 = vadd.f32 %v3415_v26, %v381_v30  ;;  %v3434_v13 = vadd.f32 %v3415_v26, %v382_v31  ;;  %v1751_v21 = vld [vmem:[%s3741_s0 + $0x1b0] sm:$0xff]  }
  0xce   :  { %v384_v25 = vmul.f32 %v3403_v15, %v1657_v33  ;;  %v1956_v43 = vpop.eup %1955  ;;  %1276 = vst [vmem:[%s3744_s3 + $0x300] sm:$0xff] %v1148_v20  ;;  %vm637_vm1 = vcmp.gt.f32.partialorder %v3331_v32, 0.0  ;;  %v872_v17 = vmul.f32 1.442695, %v3418_v23  ;;  %v874_v38 = vmul.f32 1.442695, %v3421_v24 }
  0xcf   :  { %v1411_v62 = vadd.f32 -1.0, %v1956_v43  ;;  %vm638_vm2 = vcmp.gt.f32.partialorder %v3337_v56, 0.0  ;;  %vm639_vm3 = vcmp.gt.f32.partialorder %v3350_v2, 0.0  ;;  %v876_v46 = vmul.f32 1.442695, %v3431_v42 }
  0xd0   :  { %v1958_v34 = vpop.eup %1957  ;;  %1965 = vpow2.f32 %v872_v17  ;;  %v878_v28 = vmul.f32 1.442695, %v3434_v13  ;;  %v3451_v37 = vadd.f32 %v3415_v26, %v383_v41  ;;  %v3455_v27 = vadd.f32 %v3415_v26, %v384_v25 }
  0xd1   :  { %v1412_v39 = vadd.f32 -1.0, %v1958_v34  ;;  %v1960_v12 = vpop.eup %1959  ;;  %v1149_v29 = vsel %vm637_vm1, %v3331_v32, %v1411_v62  ;;  %1967 = vpow2.f32 %v874_v38  ;;  %v1660_v57 = vunpack.c.l.bf16 %v1751_v21  ;;  %v1752_v32 = vld [vmem:[%s3741_s0 + $0x1b8] sm:$0xff]  }
  0xd2   :  { %v1962_v44 = vpop.eup %1961  ;;  %1277 = vst [vmem:[%s3744_s3 + $0x308] sm:$0xff] %v1149_v29  ;;  %v1413_v53 = vadd.f32 -1.0, %v1960_v12  ;;  %vm640_vm4 = vcmp.gt.f32.partialorder %v3359_v40, 0.0  ;;  %1969 = vpow2.f32 %v876_v46  ;;  %vm641_vm5 = vcmp.gt.f32.partialorder %v3367_v9, 0.0 }
  0xd3   :  { %v1150_v22 = vsel %vm638_vm2, %v3337_v56, %v1412_v39  ;;  %v1964_v35 = vpop.eup %1963  ;;  %v1414_v47 = vadd.f32 -1.0, %v1962_v44  ;;  %1971 = vpow2.f32 %v878_v28  ;;  %v880_v45 = vmul.f32 1.442695, %v3451_v37 }
  0xd4   :  { %1278 = vst [vmem:[%s3744_s3 + $0x310] sm:$0xff] %v1150_v22  ;;  %v1151_v56 = vsel %vm639_vm3, %v3350_v2, %v1413_v53  ;;  %v1415_v19 = vadd.f32 -1.0, %v1964_v35  ;;  %v882_v36 = vmul.f32 1.442695, %v3455_v27  ;;  %v385_v51 = vmul.f32 %v3403_v15, %v1660_v57  ;;  %v1754_v2 = vld [vmem:[%s3741_s0 + $0x1c8] sm:$0xff]  }
  0xd5   :  { %1279 = vst [vmem:[%s3744_s3 + $0x318] sm:$0xff] %v1151_v56  ;;  %v1152_v58 = vsel %vm640_vm4, %v3359_v40, %v1414_v47  ;;  %1973 = vpow2.f32 %v880_v45  ;;  %v1661_v48 = vunpack.c.h.bf16 %v1751_v21  ;;  %v1664_v0 = vunpack.c.l.bf16 %v1752_v32 }
  0xd6   :  { %1280 = vst [vmem:[%s3744_s3 + $0x320] sm:$0xff] %v1152_v58  ;;  %v1153_v1 = vsel %vm641_vm5, %v3367_v9, %v1415_v19  ;;  %1975 = vpow2.f32 %v882_v36  ;;  %v3490_v7 = vadd.f32 %v3415_v26, %v385_v51  ;;  %v1665_v61 = vunpack.c.h.bf16 %v1752_v32 }
  0xd7   :  { %1281 = vst [vmem:[%s3744_s3 + $0x328] sm:$0xff] %v1153_v1  ;;  %v386_v40 = vmul.f32 %v3403_v15, %v1661_v48  ;;  %v387_v8 = vmul.f32 %v3403_v15, %v1664_v0  ;;  %v1668_v5 = vunpack.c.l.bf16 %v1753_v52  ;;  %v1669_v10 = vunpack.c.h.bf16 %v1753_v52 }
  0xd8   :  { %vm642_vm6 = vcmp.gt.f32.partialorder %v3418_v23, 0.0  ;;  %v884_v59 = vmul.f32 1.442695, %v3490_v7  ;;  %v388_v9 = vmul.f32 %v3403_v15, %v1665_v61  ;;  %v1672_v55 = vunpack.c.l.bf16 %v1754_v2 }
  0xd9   :  { %vm643_vm7 = vcmp.gt.f32.partialorder %v3421_v24, 0.0  ;;  %v3502_v6 = vadd.f32 %v3415_v26, %v386_v40  ;;  %v3505_v11 = vadd.f32 %v3415_v26, %v387_v8  ;;  %v389_v18 = vmul.f32 %v3403_v15, %v1668_v5 }
  0xda   :  { %v1966_v63 = vpop.eup %1965  ;;  %vm644_vm8 = vcmp.gt.f32.partialorder %v3431_v42, 0.0  ;;  %1977 = vpow2.f32 %v884_v59  ;;  %v3510_v50 = vadd.f32 %v3415_v26, %v388_v9  ;;  %v390_v4 = vmul.f32 %v3403_v15, %v1669_v10 }
  0xdb   :  { %v1968_v60 = vpop.eup %1967  ;;  %v1416_v49 = vadd.f32 -1.0, %v1966_v63  ;;  %vm645_vm9 = vcmp.gt.f32.partialorder %v3434_v13, 0.0  ;;  %v886_v16 = vmul.f32 1.442695, %v3502_v6  ;;  %v391_v3 = vmul.f32 %v3403_v15, %v1672_v55 }
  0xdc   :  { %v1970_v54 = vpop.eup %1969  ;;  %v1417_v30 = vadd.f32 -1.0, %v1968_v60  ;;  %v888_v31 = vmul.f32 1.442695, %v3505_v11  ;;  %v890_v33 = vmul.f32 1.442695, %v3510_v50  ;;  %v1673_v14 = vunpack.c.h.bf16 %v1754_v2 }
  0xdd   :  { %v1972_v41 = vpop.eup %1971  ;;  %v1154_v20 = vsel %vm642_vm6, %v3418_v23, %v1416_v49  ;;  %v1418_v25 = vadd.f32 -1.0, %v1970_v54  ;;  %1979 = vpow2.f32 %v886_v16  ;;  %v3522_v43 = vadd.f32 %v3415_v26, %v389_v18 }
  0xde   :  { %1282 = vst [vmem:[%s3744_s3 + $0x330] sm:$0xff] %v1154_v20  ;;  %v1155_v17 = vsel %vm643_vm7, %v3421_v24, %v1417_v30  ;;  %v1419_v38 = vadd.f32 -1.0, %v1972_v41  ;;  %1981 = vpow2.f32 %v888_v31  ;;  %v3531_v21 = vadd.f32 %v3415_v26, %v390_v4  ;;  %v1755_v24 = vld [vmem:[%s3741_s0 + $0x1d0] sm:$0xff]  }
  0xdf   :  { %v1974_v34 = vpop.eup %1973  ;;  %1283 = vst [vmem:[%s3744_s3 + $0x338] sm:$0xff] %v1155_v17  ;;  %v1156_v23 = vsel %vm644_vm8, %v3431_v42, %v1418_v25  ;;  %vm646_vm10 = vcmp.gt.f32.partialorder %v3451_v37, 0.0  ;;  %1983 = vpow2.f32 %v890_v33  ;;  %v892_v62 = vmul.f32 1.442695, %v3522_v43 }
  0xe0   :  { %v1976_v46 = vpop.eup %1975  ;;  %1284 = vst [vmem:[%s3744_s3 + $0x340] sm:$0xff] %v1156_v23  ;;  %v1157_v39 = vsel %vm645_vm9, %v3434_v13, %v1419_v38  ;;  %v1420_v28 = vadd.f32 -1.0, %v1974_v34  ;;  %vm647_vm11 = vcmp.gt.f32.partialorder %v3455_v27, 0.0  ;;  %v894_v42 = vmul.f32 1.442695, %v3531_v21  ;;  %v1756_v13 = vld [vmem:[%s3741_s0 + $0x1d8] sm:$0xff]  }
  0xe1   :  { %1285 = vst [vmem:[%s3744_s3 + $0x348] sm:$0xff] %v1157_v39  ;;  %v1421_v12 = vadd.f32 -1.0, %v1976_v46  ;;  %1985 = vpow2.f32 %v892_v62  ;;  %v3556_v29 = vadd.f32 %v3415_v26, %v391_v3  ;;  %v392_v57 = vmul.f32 %v3403_v15, %v1673_v14 }
  0xe2   :  { %v1158_v44 = vsel %vm646_vm10, %v3451_v37, %v1420_v28  ;;  %1987 = vpow2.f32 %v894_v42  ;;  %v1676_v22 = vunpack.c.l.bf16 %v1755_v24  ;;  %v1677_v53 = vunpack.c.h.bf16 %v1755_v24 }
  0xe3   :  { %1286 = vst [vmem:[%s3744_s3 + $0x350] sm:$0xff] %v1158_v44  ;;  %v1159_v32 = vsel %vm647_vm11, %v3455_v27, %v1421_v12  ;;  %vm648_vm12 = vcmp.gt.f32.partialorder %v3490_v7, 0.0  ;;  %v896_v35 = vmul.f32 1.442695, %v3556_v29  ;;  %v3572_v47 = vadd.f32 %v3415_v26, %v392_v57  ;;  %v1757_v27 = vld [vmem:[%s3741_s0 + $0x1e0] sm:$0xff]  }
  0xe4   :  { %v1978_v45 = vpop.eup %1977  ;;  %1287 = vst [vmem:[%s3744_s3 + $0x358] sm:$0xff] %v1159_v32  ;;  %v393_v37 = vmul.f32 %v3403_v15, %v1676_v22  ;;  %v394_v56 = vmul.f32 %v3403_v15, %v1677_v53  ;;  %v1680_v19 = vunpack.c.l.bf16 %v1756_v13  ;;  %v1681_v36 = vunpack.c.h.bf16 %v1756_v13 }
  0xe5   :  { %v1422_v51 = vadd.f32 -1.0, %v1978_v45  ;;  %vm649_vm13 = vcmp.gt.f32.partialorder %v3502_v6, 0.0  ;;  %1989 = vpow2.f32 %v896_v35  ;;  %v898_v52 = vmul.f32 1.442695, %v3572_v47 }
  0xe6   :  { %v3585_v58 = vadd.f32 %v3415_v26, %v393_v37  ;;  %v3588_v48 = vadd.f32 %v3415_v26, %v394_v56  ;;  %v395_v0 = vmul.f32 %v3403_v15, %v1680_v19  ;;  %v396_v2 = vmul.f32 %v3403_v15, %v1681_v36 }
  0xe7   :  { %v1980_v1 = vpop.eup %1979  ;;  %v1160_v61 = vsel %vm648_vm12, %v3490_v7, %v1422_v51  ;;  %vm650_vm14 = vcmp.gt.f32.partialorder %v3505_v11, 0.0  ;;  %1991 = vpow2.f32 %v898_v52  ;;  %v1684_v40 = vunpack.c.l.bf16 %v1757_v27 }
  0xe8   :  { %v1982_v8 = vpop.eup %1981  ;;  %1288 = vst [vmem:[%s3744_s3 + $0x360] sm:$0xff] %v1160_v61  ;;  %v1423_v5 = vadd.f32 -1.0, %v1980_v1  ;;  %vm651_vm15 = vcmp.gt.f32.partialorder %v3510_v50, 0.0  ;;  %v900_v10 = vmul.f32 1.442695, %v3585_v58  ;;  %v1685_v59 = vunpack.c.h.bf16 %v1757_v27 }
  0xe9   :  { %v1984_v9 = vpop.eup %1983  ;;  %v1424_v55 = vadd.f32 -1.0, %v1982_v8  ;;  %v902_v18 = vmul.f32 1.442695, %v3588_v48  ;;  %v3603_v7 = vadd.f32 %v3415_v26, %v395_v0  ;;  %v3606_v63 = vadd.f32 %v3415_v26, %v396_v2 }
  0xea   :  { %v1161_v4 = vsel %vm649_vm13, %v3502_v6, %v1423_v5  ;;  %v1425_v60 = vadd.f32 -1.0, %v1984_v9  ;;  %1993 = vpow2.f32 %v900_v10  ;;  %v397_v49 = vmul.f32 %v3403_v15, %v1684_v40  ;;  %v1758_v6 = vld [vmem:[%s3741_s0 + $0x1e8] sm:$0xff]  }
  0xeb   :  { %v1986_v16 = vpop.eup %1985  ;;  %1289 = vst [vmem:[%s3744_s3 + $0x368] sm:$0xff] %v1161_v4  ;;  %v1162_v3 = vsel %vm650_vm14, %v3505_v11, %v1424_v55  ;;  %vm652_vm0 = vcmp.gt.f32.partialorder %v3522_v43, 0.0  ;;  %1995 = vpow2.f32 %v902_v18  ;;  %v904_v54 = vmul.f32 1.442695, %v3603_v7 }
  0xec   :  { %v1988_v30 = vpop.eup %1987  ;;  %1290 = vst [vmem:[%s3744_s3 + $0x370] sm:$0xff] %v1162_v3  ;;  %v1163_v31 = vsel %vm651_vm15, %v3510_v50, %v1425_v60  ;;  %v1426_v33 = vadd.f32 -1.0, %v1986_v16  ;;  %vm653_vm1 = vcmp.gt.f32.partialorder %v3531_v21, 0.0  ;;  %v906_v11 = vmul.f32 1.442695, %v3606_v63  ;;  %v1759_v50 = vld [vmem:[%s3741_s0 + $0x1f0] sm:$0xff]  }
  0xed   :  { %1291 = vst [vmem:[%s3744_s3 + $0x378] sm:$0xff] %v1163_v31  ;;  %v1427_v14 = vadd.f32 -1.0, %v1988_v30  ;;  %1997 = vpow2.f32 %v904_v54  ;;  %v3635_v41 = vadd.f32 %v3415_v26, %v397_v49  ;;  %v398_v20 = vmul.f32 %v3403_v15, %v1685_v59 }
  0xee   :  { %v1164_v25 = vsel %vm652_vm0, %v3522_v43, %v1426_v33  ;;  %1999 = vpow2.f32 %v906_v11  ;;  %v1688_v17 = vunpack.c.l.bf16 %v1758_v6  ;;  %v1689_v38 = vunpack.c.h.bf16 %v1758_v6 }
  0xef   :  { %v1990_v34 = vpop.eup %1989  ;;  %1292 = vst [vmem:[%s3744_s3 + $0x380] sm:$0xff] %v1164_v25  ;;  %v1165_v23 = vsel %vm653_vm1, %v3531_v21, %v1427_v14  ;;  %vm654_vm2 = vcmp.gt.f32.partialorder %v3556_v29, 0.0  ;;  %v908_v62 = vmul.f32 1.442695, %v3635_v41  ;;  %v3651_v24 = vadd.f32 %v3415_v26, %v398_v20  ;;  %v1760_v21 = vld [vmem:[%s3741_s0 + $0x1f8] sm:$0xff]  }
  0xf0   :  { %1293 = vst [vmem:[%s3744_s3 + $0x388] sm:$0xff] %v1165_v23  ;;  %v1428_v43 = vadd.f32 -1.0, %v1990_v34  ;;  %v399_v46 = vmul.f32 %v3403_v15, %v1688_v17  ;;  %v400_v39 = vmul.f32 %v3403_v15, %v1689_v38  ;;  %v1692_v28 = vunpack.c.l.bf16 %v1759_v50 }
  0xf1   :  { %v1992_v42 = vpop.eup %1991  ;;  %vm655_vm3 = vcmp.gt.f32.partialorder %v3572_v47, 0.0  ;;  %2001 = vpow2.f32 %v908_v62  ;;  %v910_v12 = vmul.f32 1.442695, %v3651_v24  ;;  %v1693_v57 = vunpack.c.h.bf16 %v1759_v50 }
  0xf2   :  { %v1166_v13 = vsel %vm654_vm2, %v3556_v29, %v1428_v43  ;;  %v1429_v44 = vadd.f32 -1.0, %v1992_v42  ;;  %v3665_v22 = vadd.f32 %v3415_v26, %v399_v46  ;;  %v3668_v53 = vadd.f32 %v3415_v26, %v400_v39 }
  0xf3   :  { %1294 = vst [vmem:[%s3744_s3 + $0x390] sm:$0xff] %v1166_v13  ;;  %2003 = vpow2.f32 %v910_v12  ;;  %v401_v32 = vmul.f32 %v3403_v15, %v1692_v28  ;;  %v402_v35 = vmul.f32 %v3403_v15, %v1693_v57  ;;  %v1696_v45 = vunpack.c.l.bf16 %v1760_v21 }
  0xf4   :  { %v1994_v37 = vpop.eup %1993  ;;  %v1167_v29 = vsel %vm655_vm3, %v3572_v47, %v1429_v44  ;;  %vm656_vm4 = vcmp.gt.f32.partialorder %v3585_v58, 0.0  ;;  %vm657_vm5 = vcmp.gt.f32.partialorder %v3588_v48, 0.0  ;;  %v912_v56 = vmul.f32 1.442695, %v3665_v22 }
  0xf5   :  { %v1996_v19 = vpop.eup %1995  ;;  %1295 = vst [vmem:[%s3744_s3 + $0x398] sm:$0xff] %v1167_v29  ;;  %v1430_v36 = vadd.f32 -1.0, %v1994_v37  ;;  %v914_v27 = vmul.f32 1.442695, %v3668_v53  ;;  %v536_v51 = vadd.f32 %v3415_v26, %v401_v32  ;;  %v537_v52 = vadd.f32 %v3415_v26, %v402_v35 }
  0xf6   :  { %v1431_v0 = vadd.f32 -1.0, %v1996_v19  ;;  %2005 = vpow2.f32 %v912_v56  ;;  %v403_v47 = vmul.f32 %v3403_v15, %v1696_v45  ;;  %v1697_v2 = vunpack.c.h.bf16 %v1760_v21 }
  0xf7   :  { %v1998_v1 = vpop.eup %1997  ;;  %v1168_v61 = vsel %vm656_vm4, %v3585_v58, %v1430_v36  ;;  %vm658_vm6 = vcmp.gt.f32.partialorder %v3603_v7, 0.0  ;;  %2007 = vpow2.f32 %v914_v27  ;;  %v916_v40 = vmul.f32 1.442695, %v536_v51 }
  0xf8   :  { %v2000_v8 = vpop.eup %1999  ;;  %1296 = vst [vmem:[%s3744_s3 + $0x3a0] sm:$0xff] %v1168_v61  ;;  %v1169_v5 = vsel %vm657_vm5, %v3588_v48, %v1431_v0  ;;  %v1432_v10 = vadd.f32 -1.0, %v1998_v1  ;;  %vm659_vm7 = vcmp.gt.f32.partialorder %v3606_v63, 0.0  ;;  %v918_v59 = vmul.f32 1.442695, %v537_v52 }
  0xf9   :  { %1297 = vst [vmem:[%s3744_s3 + $0x3a8] sm:$0xff] %v1169_v5  ;;  %v1433_v58 = vadd.f32 -1.0, %v2000_v8  ;;  %2009 = vpow2.f32 %v916_v40  ;;  %v538_v9 = vadd.f32 %v3415_v26, %v403_v47  ;;  %v404_v55 = vmul.f32 %v3403_v15, %v1697_v2 }
  0xfa   :  { %v1170_v18 = vsel %vm658_vm6, %v3603_v7, %v1432_v10  ;;  %2011 = vpow2.f32 %v918_v59  ;;  %vm660_vm8 = vcmp.gt.f32.partialorder %v3635_v41, 0.0  ;;  %vm661_vm9 = vcmp.gt.f32.partialorder %v3651_v24, 0.0 }
  0xfb   :  { %v2002_v4 = vpop.eup %2001  ;;  %1298 = vst [vmem:[%s3744_s3 + $0x3b0] sm:$0xff] %v1170_v18  ;;  %v1171_v48 = vsel %vm659_vm7, %v3606_v63, %v1433_v58  ;;  %v920_v60 = vmul.f32 1.442695, %v538_v9  ;;  %v539_v49 = vadd.f32 %v3415_v26, %v404_v55  ;;  %vm662_vm10 = vcmp.gt.f32.partialorder %v3665_v22, 0.0 }
  0xfc   :  { %1299 = vst [vmem:[%s3744_s3 + $0x3b8] sm:$0xff] %v1171_v48  ;;  %v1434_v15 = vadd.f32 -1.0, %v2002_v4  ;;  %vm663_vm11 = vcmp.gt.f32.partialorder %v3668_v53, 0.0  ;;  %vm664_vm12 = vcmp.gt.f32.partialorder %v536_v51, 0.0  ;;  %vm665_vm13 = vcmp.gt.f32.partialorder %v537_v52, 0.0 }
  0xfd   :  { %v2004_v16 = vpop.eup %2003  ;;  %2013 = vpow2.f32 %v920_v60  ;;  %v922_v7 = vmul.f32 1.442695, %v539_v49  ;;  %vm666_vm14 = vcmp.gt.f32.partialorder %v538_v9, 0.0  ;;  %vm667_vm15 = vcmp.gt.f32.partialorder %v539_v49, 0.0 }
  0xfe   :  { %v1172_v3 = vsel %vm660_vm8, %v3635_v41, %v1434_v15  ;;  %v1435_v54 = vadd.f32 -1.0, %v2004_v16 }
  0xff   :  { %1300 = vst [vmem:[%s3744_s3 + $0x3c0] sm:$0xff] %v1172_v3  ;;  %2015 = vpow2.f32 %v922_v7 }
 0x100   :  { %v2006_v63 = vpop.eup %2005  ;;  %v1173_v26 = vsel %vm661_vm9, %v3651_v24, %v1435_v54 }
 0x101   :  { %v2008_v6 = vpop.eup %2007  ;;  %1301 = vst [vmem:[%s3744_s3 + $0x3c8] sm:$0xff] %v1173_v26  ;;  %v1436_v30 = vadd.f32 -1.0, %v2006_v63 }
 0x102   :  { %v1437_v31 = vadd.f32 -1.0, %v2008_v6 }
 0x103   :  { %v2010_v33 = vpop.eup %2009  ;;  %v1174_v11 = vsel %vm662_vm10, %v3665_v22, %v1436_v30 }
 0x104   :  { %v2012_v14 = vpop.eup %2011  ;;  %1302 = vst [vmem:[%s3744_s3 + $0x3d0] sm:$0xff] %v1174_v11  ;;  %v1175_v41 = vsel %vm663_vm11, %v3668_v53, %v1437_v31  ;;  %v1438_v20 = vadd.f32 -1.0, %v2010_v33 }
 0x105   :  { %1303 = vst [vmem:[%s3744_s3 + $0x3d8] sm:$0xff] %v1175_v41  ;;  %v1439_v50 = vadd.f32 -1.0, %v2012_v14 }
 0x106   :  { %v1176_v25 = vsel %vm664_vm12, %v536_v51, %v1438_v20 }
 0x107   :  { %v2014_v17 = vpop.eup %2013  ;;  %1304 = vst [vmem:[%s3744_s3 + $0x3e0] sm:$0xff] %v1176_v25  ;;  %v1177_v38 = vsel %vm665_vm13, %v537_v52, %v1439_v50 }
 0x108   :  { %1305 = vst [vmem:[%s3744_s3 + $0x3e8] sm:$0xff] %v1177_v38  ;;  %v1440_v34 = vadd.f32 -1.0, %v2014_v17 }
 0x109   :  { %v2016_v23 = vpop.eup %2015 }
 0x10a   :  { %v1178_v62 = vsel %vm666_vm14, %v538_v9, %v1440_v34  ;;  %v1441_v24 = vadd.f32 -1.0, %v2016_v23 }
 0x10b   :  { %1306 = vst [vmem:[%s3744_s3 + $0x3f0] sm:$0xff] %v1178_v62 }
 0x10c   :  { %v1179_v43 = vsel %vm667_vm15, %v539_v49, %v1441_v24 }
 0x10d   :  { %1307 = vst [vmem:[%s3744_s3 + $0x3f8] sm:$0xff] %v1179_v43 }

// kernel: luconv_forward.2
= control target key start
LH: loop header
LB: loop body
LE: loop exit
PB: predicated region body
PF: predicated region fallthrough
CT: control target
= control target key end

     0   :  { %v6061_v0 = vmov 0   ;;  %s7180_s1 = inlined_call_operand.vmem [shape: bf16[512,128], index: 1, kind: input, shape index: {}]   ;;  %s7181_s0 = inlined_call_operand.vmem [shape: bf16[1024,512], index: 0, kind: input, shape index: {}]   ;;  %s7182_s2 = inlined_call_operand.vmem [shape: bf16[1024,128], index: 2, kind: output, shape index: {0}]   ;;  %s7183_s3 = inlined_call_operand.vmem [shape: f32[8,128], index: 3, kind: output, shape index: {1}]  }
   0x1   :  { %2066 = vmatprep.subr.bf16.mxu1 %v6061_v0  ;;  %2611 = vmatprep.subr.bf16.mxu0 %v6061_v0  ;;  %v5645_v1 = vld [vmem:[%s7180_s1] sm:$0xff]   ;;  %v5647_v3 = vld [vmem:[%s7180_s1 + $0x8] sm:$0xff]   ;;  %v5649_v5 = vld [vmem:[%s7180_s1 + $0x10] sm:$0xff]  }
   0x2   :  { %v5646_v2 = vld [vmem:[%s7180_s1 + $0x80] sm:$0xff]   ;;  %2067 = vmatpush1.bf16.msra.mxu1 %v5645_v1  ;;  %v5648_v4 = vld [vmem:[%s7180_s1 + $0x88] sm:$0xff]   ;;  %v5650_v6 = vld [vmem:[%s7180_s1 + $0x90] sm:$0xff]  }
   0x3   :  { %2612 = vmatpush1.bf16.msra.mxu0 %v5646_v2  ;;  %2068 = vmatprep.subr.bf16.mxu1 %v6061_v0  ;;  %v5651_v7 = vld [vmem:[%s7180_s1 + $0x18] sm:$0xff]   ;;  %v5653_v9 = vld [vmem:[%s7180_s1 + $0x20] sm:$0xff]   ;;  %v5655_v11 = vld [vmem:[%s7180_s1 + $0x28] sm:$0xff]  }
   0x4   :  { %2613 = vmatprep.subr.bf16.mxu0 %v6061_v0  ;;  %v5652_v8 = vld [vmem:[%s7180_s1 + $0x98] sm:$0xff]   ;;  %v5654_v10 = vld [vmem:[%s7180_s1 + $0xa0] sm:$0xff]   ;;  %v5656_v12 = vld [vmem:[%s7180_s1 + $0xa8] sm:$0xff]  }
   0x5   :  { %v5657_v13 = vld [vmem:[%s7180_s1 + $0x30] sm:$0xff]   ;;  %v5659_v15 = vld [vmem:[%s7180_s1 + $0x38] sm:$0xff]   ;;  %v5661_v17 = vld [vmem:[%s7180_s1 + $0x40] sm:$0xff]  }
   0x6   :  { %2069 = vmatpush1.bf16.msra.mxu1 %v5647_v3  ;;  %v5658_v14 = vld [vmem:[%s7180_s1 + $0xb0] sm:$0xff]   ;;  %v5660_v16 = vld [vmem:[%s7180_s1 + $0xb8] sm:$0xff]   ;;  %v5662_v18 = vld [vmem:[%s7180_s1 + $0xc0] sm:$0xff]  }
   0x7   :  { %2614 = vmatpush1.bf16.msra.mxu0 %v5648_v4  ;;  %2070 = vmatprep.subr.bf16.mxu1 %v6061_v0  ;;  %v5679_v19 = vld [vmem:[%s7181_s0 + $0x4] ss:$16 sps:$4 sm:$0xff]   ;;  %v5663_v20 = vld [vmem:[%s7180_s1 + $0x48] sm:$0xff]   ;;  %v5667_v25 = vld [vmem:[%s7180_s1 + $0x58] sm:$0xff]  }
   0x8   :  { %2615 = vmatprep.subr.bf16.mxu0 %v6061_v0  ;;  %v5682_v21 = vld [vmem:[%s7181_s0 + $0xc] ss:$16 sps:$4 sm:$0xff]   ;;  %2098 = vmatprep.mubr.bf16.mxu1 %v5679_v19  ;;  %v5665_v23 = vld [vmem:[%s7180_s1 + $0x50] sm:$0xff]   ;;  %v5669_v27 = vld [vmem:[%s7180_s1 + $0x60] sm:$0xff]  }
   0x9   :  { %v5664_v22 = vld [vmem:[%s7180_s1 + $0xc8] sm:$0xff]   ;;  %2643 = vmatprep.mubr.bf16.mxu0 %v5682_v21  ;;  %v5666_v24 = vld [vmem:[%s7180_s1 + $0xd0] sm:$0xff]   ;;  %v5668_v26 = vld [vmem:[%s7180_s1 + $0xd8] sm:$0xff]  }
   0xa   :  { %2071 = vmatpush1.bf16.msra.mxu1 %v5649_v5  ;;  %v5670_v28 = vld [vmem:[%s7180_s1 + $0xe0] sm:$0xff]   ;;  %v5671_v29 = vld [vmem:[%s7180_s1 + $0x68] sm:$0xff]   ;;  %v5673_v31 = vld [vmem:[%s7180_s1 + $0x70] sm:$0xff]  }
   0xb   :  { %2616 = vmatpush1.bf16.msra.mxu0 %v5650_v6  ;;  %2072 = vmatprep.subr.bf16.mxu1 %v6061_v0  ;;  %v5672_v30 = vld [vmem:[%s7180_s1 + $0xe8] sm:$0xff]   ;;  %v5674_v32 = vld [vmem:[%s7180_s1 + $0xf0] sm:$0xff]   ;;  %v5675_v33 = vld [vmem:[%s7180_s1 + $0x78] sm:$0xff]  }
   0xc   :  { %2617 = vmatprep.subr.bf16.mxu0 %v6061_v0  ;;  %v5676_v34 = vld [vmem:[%s7180_s1 + $0xf8] sm:$0xff]   ;;  %v5677_v35 = vld [vmem:[%s7181_s0] ss:$16 sps:$4 sm:$0xff]   ;;  %v5683_v37 = vld [vmem:[%s7181_s0 + $0x24] ss:$16 sps:$4 sm:$0xff]  }
   0xd   :  { %v5680_v36 = vld [vmem:[%s7181_s0 + $0x8] ss:$16 sps:$4 sm:$0xff]   ;;  %v5685_v38 = vld [vmem:[%s7181_s0 + $0x2c] ss:$16 sps:$4 sm:$0xff]   ;;  %v5687_v39 = vld [vmem:[%s7181_s0 + $0x20] ss:$16 sps:$4 sm:$0xff]  }
   0xe   :  { %2073 = vmatpush1.bf16.msra.mxu1 %v5651_v7  ;;  %v5688_v40 = vld [vmem:[%s7181_s0 + $0x28] ss:$16 sps:$4 sm:$0xff]   ;;  %v5689_v41 = vld [vmem:[%s7181_s0 + $0x44] ss:$16 sps:$4 sm:$0xff]   ;;  %v5691_v42 = vld [vmem:[%s7181_s0 + $0x4c] ss:$16 sps:$4 sm:$0xff]  }
   0xf   :  { %2618 = vmatpush1.bf16.msra.mxu0 %v5652_v8  ;;  %2074 = vmatprep.subr.bf16.mxu1 %v6061_v0  ;;  %v5693_v43 = vld [vmem:[%s7181_s0 + $0x40] ss:$16 sps:$4 sm:$0xff]   ;;  %v5694_v44 = vld [vmem:[%s7181_s0 + $0x48] ss:$16 sps:$4 sm:$0xff]   ;;  %v5695_v45 = vld [vmem:[%s7181_s0 + $0x64] ss:$16 sps:$4 sm:$0xff]  }
  0x10   :  { %2619 = vmatprep.subr.bf16.mxu0 %v6061_v0  ;;  %v5697_v46 = vld [vmem:[%s7181_s0 + $0x6c] ss:$16 sps:$4 sm:$0xff]   ;;  %v5699_v47 = vld [vmem:[%s7181_s0 + $0x60] ss:$16 sps:$4 sm:$0xff]   ;;  %v5700_v48 = vld [vmem:[%s7181_s0 + $0x68] ss:$16 sps:$4 sm:$0xff]  }
  0x11   :  { %v5701_v49 = vld [vmem:[%s7181_s0 + $0x84] ss:$16 sps:$4 sm:$0xff]   ;;  %v5703_v50 = vld [vmem:[%s7181_s0 + $0x8c] ss:$16 sps:$4 sm:$0xff]   ;;  %v5705_v51 = vld [vmem:[%s7181_s0 + $0x80] ss:$16 sps:$4 sm:$0xff]  }
  0x12   :  { %2075 = vmatpush1.bf16.msra.mxu1 %v5653_v9  ;;  %v5706_v52 = vld [vmem:[%s7181_s0 + $0x88] ss:$16 sps:$4 sm:$0xff]   ;;  %v5707_v53 = vld [vmem:[%s7181_s0 + $0xa4] ss:$16 sps:$4 sm:$0xff]   ;;  %v5709_v54 = vld [vmem:[%s7181_s0 + $0xac] ss:$16 sps:$4 sm:$0xff]  }
  0x13   :  { %2620 = vmatpush1.bf16.msra.mxu0 %v5654_v10  ;;  %2076 = vmatprep.subr.bf16.mxu1 %v6061_v0  ;;  %v5711_v55 = vld [vmem:[%s7181_s0 + $0xa0] ss:$16 sps:$4 sm:$0xff]   ;;  %v5712_v56 = vld [vmem:[%s7181_s0 + $0xa8] ss:$16 sps:$4 sm:$0xff]   ;;  %v5713_v57 = vld [vmem:[%s7181_s0 + $0xc4] ss:$16 sps:$4 sm:$0xff]  }
  0x14   :  { %2621 = vmatprep.subr.bf16.mxu0 %v6061_v0  ;;  %v5715_v58 = vld [vmem:[%s7181_s0 + $0xcc] ss:$16 sps:$4 sm:$0xff]   ;;  %v5717_v59 = vld [vmem:[%s7181_s0 + $0xc0] ss:$16 sps:$4 sm:$0xff]   ;;  %v5718_v60 = vld [vmem:[%s7181_s0 + $0xc8] ss:$16 sps:$4 sm:$0xff]  }
  0x15   :  { %v5719_v61 = vld [vmem:[%s7181_s0 + $0xe4] ss:$16 sps:$4 sm:$0xff]   ;;  %v5721_v62 = vld [vmem:[%s7181_s0 + $0xec] ss:$16 sps:$4 sm:$0xff]   ;;  %v5723_v63 = vld [vmem:[%s7181_s0 + $0xe0] ss:$16 sps:$4 sm:$0xff]  }
  0x16   :  { %2077 = vmatpush1.bf16.msra.mxu1 %v5655_v11  ;;  %v5725_v1 = vld [vmem:[%s7181_s0 + $0x104] ss:$16 sps:$4 sm:$0xff]   ;;  %v5727_v2 = vld [vmem:[%s7181_s0 + $0x10c] ss:$16 sps:$4 sm:$0xff]   ;;  %v5729_v3 = vld [vmem:[%s7181_s0 + $0x100] ss:$16 sps:$4 sm:$0xff]  }
  0x17   :  { %2622 = vmatpush1.bf16.msra.mxu0 %v5656_v12  ;;  %2078 = vmatprep.subr.bf16.mxu1 %v6061_v0  ;;  %v5730_v4 = vld [vmem:[%s7181_s0 + $0x108] ss:$16 sps:$4 sm:$0xff]   ;;  %v5731_v5 = vld [vmem:[%s7181_s0 + $0x124] ss:$16 sps:$4 sm:$0xff]   ;;  %v5733_v6 = vld [vmem:[%s7181_s0 + $0x12c] ss:$16 sps:$4 sm:$0xff]  }
  0x18   :  { %2623 = vmatprep.subr.bf16.mxu0 %v6061_v0  ;;  %v5735_v7 = vld [vmem:[%s7181_s0 + $0x120] ss:$16 sps:$4 sm:$0xff]   ;;  %v5736_v8 = vld [vmem:[%s7181_s0 + $0x128] ss:$16 sps:$4 sm:$0xff]   ;;  %v5737_v9 = vld [vmem:[%s7181_s0 + $0x144] ss:$16 sps:$4 sm:$0xff]  }
  0x19   :  { %v5739_v10 = vld [vmem:[%s7181_s0 + $0x14c] ss:$16 sps:$4 sm:$0xff]   ;;  %v5741_v11 = vld [vmem:[%s7181_s0 + $0x140] ss:$16 sps:$4 sm:$0xff]   ;;  %v5742_v12 = vld [vmem:[%s7181_s0 + $0x148] ss:$16 sps:$4 sm:$0xff]  }
  0x1a   :  { %2079 = vmatpush1.bf16.msra.mxu1 %v5657_v13  ;;  %v5743_v13 = vld [vmem:[%s7181_s0 + $0x164] ss:$16 sps:$4 sm:$0xff]   ;;  %v5753_v19 = vld [vmem:[%s7181_s0 + $0x180] ss:$16 sps:$4 sm:$0xff]  }
  0x1b   :  { %2624 = vmatpush1.bf16.msra.mxu0 %v5658_v14  ;;  %2080 = vmatprep.subr.bf16.mxu1 %v6061_v0  ;;  %v5745_v14 = vld [vmem:[%s7181_s0 + $0x16c] ss:$16 sps:$4 sm:$0xff]   ;;  %v5755_v21 = vld [vmem:[%s7181_s0 + $0x1a4] ss:$16 sps:$4 sm:$0xff]  }
  0x1c   :  { %2625 = vmatprep.subr.bf16.mxu0 %v6061_v0 }
  0x1e   :  { %2081 = vmatpush1.bf16.msra.mxu1 %v5659_v15  ;;  %v5747_v15 = vld [vmem:[%s7181_s0 + $0x160] ss:$16 sps:$4 sm:$0xff]  }
  0x1f   :  { %2626 = vmatpush1.bf16.msra.mxu0 %v5660_v16  ;;  %2082 = vmatprep.subr.bf16.mxu1 %v6061_v0  ;;  %v5748_v16 = vld [vmem:[%s7181_s0 + $0x168] ss:$16 sps:$4 sm:$0xff]  }
  0x20   :  { %2627 = vmatprep.subr.bf16.mxu0 %v6061_v0 }
  0x22   :  { %2083 = vmatpush1.bf16.msra.mxu1 %v5661_v17  ;;  %v5749_v17 = vld [vmem:[%s7181_s0 + $0x184] ss:$16 sps:$4 sm:$0xff]  }
  0x23   :  { %2628 = vmatpush1.bf16.msra.mxu0 %v5662_v18  ;;  %2084 = vmatprep.subr.bf16.mxu1 %v6061_v0  ;;  %v5751_v18 = vld [vmem:[%s7181_s0 + $0x18c] ss:$16 sps:$4 sm:$0xff]  }
  0x24   :  { %2629 = vmatprep.subr.bf16.mxu0 %v6061_v0 }
  0x26   :  { %2085 = vmatpush1.bf16.msra.mxu1 %v5663_v20  ;;  %v5754_v20 = vld [vmem:[%s7181_s0 + $0x188] ss:$16 sps:$4 sm:$0xff]  }
  0x27   :  { %2630 = vmatpush1.bf16.msra.mxu0 %v5664_v22  ;;  %2086 = vmatprep.subr.bf16.mxu1 %v6061_v0  ;;  %v5757_v22 = vld [vmem:[%s7181_s0 + $0x1ac] ss:$16 sps:$4 sm:$0xff]  }
  0x28   :  { %2631 = vmatprep.subr.bf16.mxu0 %v6061_v0 }
  0x2a   :  { %2087 = vmatpush1.bf16.msra.mxu1 %v5665_v23  ;;  %v5759_v23 = vld [vmem:[%s7181_s0 + $0x1a0] ss:$16 sps:$4 sm:$0xff]  }
  0x2b   :  { %2632 = vmatpush1.bf16.msra.mxu0 %v5666_v24  ;;  %2088 = vmatprep.subr.bf16.mxu1 %v6061_v0  ;;  %v5760_v24 = vld [vmem:[%s7181_s0 + $0x1a8] ss:$16 sps:$4 sm:$0xff]  }
  0x2c   :  { %2633 = vmatprep.subr.bf16.mxu0 %v6061_v0 }
  0x2e   :  { %2089 = vmatpush1.bf16.msra.mxu1 %v5667_v25  ;;  %v5761_v25 = vld [vmem:[%s7181_s0 + $0x1c4] ss:$16 sps:$4 sm:$0xff]  }
  0x2f   :  { %2634 = vmatpush1.bf16.msra.mxu0 %v5668_v26  ;;  %2090 = vmatprep.subr.bf16.mxu1 %v6061_v0  ;;  %v5763_v26 = vld [vmem:[%s7181_s0 + $0x1cc] ss:$16 sps:$4 sm:$0xff]  }
  0x30   :  { %2635 = vmatprep.subr.bf16.mxu0 %v6061_v0 }
  0x32   :  { %2091 = vmatpush1.bf16.msra.mxu1 %v5669_v27  ;;  %v5765_v27 = vld [vmem:[%s7181_s0 + $0x1c0] ss:$16 sps:$4 sm:$0xff]  }
  0x33   :  { %2636 = vmatpush1.bf16.msra.mxu0 %v5670_v28  ;;  %2092 = vmatprep.subr.bf16.mxu1 %v6061_v0  ;;  %v5766_v28 = vld [vmem:[%s7181_s0 + $0x1c8] ss:$16 sps:$4 sm:$0xff]  }
  0x34   :  { %2637 = vmatprep.subr.bf16.mxu0 %v6061_v0 }
  0x36   :  { %2093 = vmatpush1.bf16.msra.mxu1 %v5671_v29  ;;  %v5767_v29 = vld [vmem:[%s7181_s0 + $0x1e4] ss:$16 sps:$4 sm:$0xff]  }
  0x37   :  { %2638 = vmatpush1.bf16.msra.mxu0 %v5672_v30  ;;  %2094 = vmatprep.subr.bf16.mxu1 %v6061_v0  ;;  %v5769_v30 = vld [vmem:[%s7181_s0 + $0x1ec] ss:$16 sps:$4 sm:$0xff]  }
  0x38   :  { %2639 = vmatprep.subr.bf16.mxu0 %v6061_v0 }
  0x3a   :  { %2095 = vmatpush1.bf16.msra.mxu1 %v5673_v31  ;;  %v5771_v31 = vld [vmem:[%s7181_s0 + $0x1e0] ss:$16 sps:$4 sm:$0xff]  }
  0x3b   :  { %2640 = vmatpush1.bf16.msra.mxu0 %v5674_v32  ;;  %2096 = vmatprep.subr.bf16.mxu1 %v6061_v0  ;;  %v5772_v32 = vld [vmem:[%s7181_s0 + $0x1e8] ss:$16 sps:$4 sm:$0xff]  }
  0x3c   :  { %2641 = vmatprep.subr.bf16.mxu0 %v6061_v0  ;;  %v5724_v0 = vld [vmem:[%s7181_s0 + $0xe8] ss:$16 sps:$4 sm:$0xff]  }
  0x3e   :  { %2097 = vmatpush1.bf16.msra.mxu1 %v5675_v33  ;;  %v5773_v33 = vld [vmem:[%s7181_s0 + $0x204] ss:$16 sps:$4 sm:$0xff]  }
  0x3f   :  { %2642 = vmatpush1.bf16.msra.mxu0 %v5676_v34  ;;  %v5775_v34 = vld [vmem:[%s7181_s0 + $0x20c] ss:$16 sps:$4 sm:$0xff]  }
  0x41   :  { %2099 = vmatmul.mubr.bf16.vlgmr.msra.gmra.mrb[0].mxu1 %v5677_v35  ;;  %v5777_v35 = vld [vmem:[%s7181_s0 + $0x200] ss:$16 sps:$4 sm:$0xff]  }
  0x42   :  { %2644 = vmatmul.mubr.bf16.vlgmr.msra.gmra.mrb[0].mxu0 %v5680_v36  ;;  %2106 = vmatprep.mubr.bf16.mxu1 %v5683_v37  ;;  %v5778_v36 = vld [vmem:[%s7181_s0 + $0x208] ss:$16 sps:$4 sm:$0xff]   ;;  %v5779_v37 = vld [vmem:[%s7181_s0 + $0x224] ss:$16 sps:$4 sm:$0xff]  }
  0x43   :  { %2651 = vmatprep.mubr.bf16.mxu0 %v5685_v38  ;;  %v5781_v38 = vld [vmem:[%s7181_s0 + $0x22c] ss:$16 sps:$4 sm:$0xff]  }
  0x49   :  { %2107 = vmatmul.mubr.bf16.gmra.mrb[4].mxu1 %v5687_v39  ;;  %v5783_v39 = vld [vmem:[%s7181_s0 + $0x220] ss:$16 sps:$4 sm:$0xff]  }
  0x4a   :  { %2652 = vmatmul.mubr.bf16.gmra.mrb[4].mxu0 %v5688_v40  ;;  %2114 = vmatprep.mubr.bf16.mxu1 %v5689_v41  ;;  %v5784_v40 = vld [vmem:[%s7181_s0 + $0x228] ss:$16 sps:$4 sm:$0xff]   ;;  %v5785_v41 = vld [vmem:[%s7181_s0 + $0x244] ss:$16 sps:$4 sm:$0xff]  }
  0x4b   :  { %2659 = vmatprep.mubr.bf16.mxu0 %v5691_v42  ;;  %v5787_v42 = vld [vmem:[%s7181_s0 + $0x24c] ss:$16 sps:$4 sm:$0xff]  }
  0x51   :  { %2115 = vmatmul.mubr.bf16.gmra.mrb[8].mxu1 %v5693_v43  ;;  %v5789_v43 = vld [vmem:[%s7181_s0 + $0x240] ss:$16 sps:$4 sm:$0xff]  }
  0x52   :  { %2660 = vmatmul.mubr.bf16.gmra.mrb[8].mxu0 %v5694_v44  ;;  %2122 = vmatprep.mubr.bf16.mxu1 %v5695_v45  ;;  %v5790_v44 = vld [vmem:[%s7181_s0 + $0x248] ss:$16 sps:$4 sm:$0xff]   ;;  %v5791_v45 = vld [vmem:[%s7181_s0 + $0x264] ss:$16 sps:$4 sm:$0xff]  }
  0x53   :  { %2667 = vmatprep.mubr.bf16.mxu0 %v5697_v46  ;;  %v5793_v46 = vld [vmem:[%s7181_s0 + $0x26c] ss:$16 sps:$4 sm:$0xff]  }
  0x59   :  { %2123 = vmatmul.mubr.bf16.gmra.mrb[12].mxu1 %v5699_v47  ;;  %v5795_v47 = vld [vmem:[%s7181_s0 + $0x260] ss:$16 sps:$4 sm:$0xff]  }
  0x5a   :  { %2668 = vmatmul.mubr.bf16.gmra.mrb[12].mxu0 %v5700_v48  ;;  %2130 = vmatprep.mubr.bf16.mxu1 %v5701_v49  ;;  %v5796_v48 = vld [vmem:[%s7181_s0 + $0x268] ss:$16 sps:$4 sm:$0xff]   ;;  %v5797_v49 = vld [vmem:[%s7181_s0 + $0x284] ss:$16 sps:$4 sm:$0xff]  }
  0x5b   :  { %2675 = vmatprep.mubr.bf16.mxu0 %v5703_v50  ;;  %v5799_v50 = vld [vmem:[%s7181_s0 + $0x28c] ss:$16 sps:$4 sm:$0xff]  }
  0x61   :  { %2131 = vmatmul.mubr.bf16.gmra.mrb[16].mxu1 %v5705_v51  ;;  %v5801_v51 = vld [vmem:[%s7181_s0 + $0x280] ss:$16 sps:$4 sm:$0xff]  }
  0x62   :  { %2676 = vmatmul.mubr.bf16.gmra.mrb[16].mxu0 %v5706_v52  ;;  %2138 = vmatprep.mubr.bf16.mxu1 %v5707_v53  ;;  %v5802_v52 = vld [vmem:[%s7181_s0 + $0x288] ss:$16 sps:$4 sm:$0xff]   ;;  %v5803_v53 = vld [vmem:[%s7181_s0 + $0x2a4] ss:$16 sps:$4 sm:$0xff]  }
  0x63   :  { %2683 = vmatprep.mubr.bf16.mxu0 %v5709_v54  ;;  %v5805_v54 = vld [vmem:[%s7181_s0 + $0x2ac] ss:$16 sps:$4 sm:$0xff]  }
  0x69   :  { %2139 = vmatmul.mubr.bf16.gmra.mrb[20].mxu1 %v5711_v55  ;;  %v5807_v55 = vld [vmem:[%s7181_s0 + $0x2a0] ss:$16 sps:$4 sm:$0xff]  }
  0x6a   :  { %2684 = vmatmul.mubr.bf16.gmra.mrb[20].mxu0 %v5712_v56  ;;  %2146 = vmatprep.mubr.bf16.mxu1 %v5713_v57  ;;  %v5808_v56 = vld [vmem:[%s7181_s0 + $0x2a8] ss:$16 sps:$4 sm:$0xff]   ;;  %v5809_v57 = vld [vmem:[%s7181_s0 + $0x2c4] ss:$16 sps:$4 sm:$0xff]  }
  0x6b   :  { %2691 = vmatprep.mubr.bf16.mxu0 %v5715_v58  ;;  %v5811_v58 = vld [vmem:[%s7181_s0 + $0x2cc] ss:$16 sps:$4 sm:$0xff]  }
  0x71   :  { %2147 = vmatmul.mubr.bf16.gmra.mrb[24].mxu1 %v5717_v59  ;;  %v5813_v59 = vld [vmem:[%s7181_s0 + $0x2c0] ss:$16 sps:$4 sm:$0xff]  }
  0x72   :  { %2692 = vmatmul.mubr.bf16.gmra.mrb[24].mxu0 %v5718_v60  ;;  %2154 = vmatprep.mubr.bf16.mxu1 %v5719_v61  ;;  %v5814_v60 = vld [vmem:[%s7181_s0 + $0x2c8] ss:$16 sps:$4 sm:$0xff]   ;;  %v5815_v61 = vld [vmem:[%s7181_s0 + $0x2e4] ss:$16 sps:$4 sm:$0xff]  }
  0x73   :  { %2699 = vmatprep.mubr.bf16.mxu0 %v5721_v62  ;;  %v5817_v62 = vld [vmem:[%s7181_s0 + $0x2ec] ss:$16 sps:$4 sm:$0xff]  }
  0x79   :  { %2155 = vmatmul.mubr.bf16.gmra.mrb[28].mxu1 %v5723_v63  ;;  %v5819_v63 = vld [vmem:[%s7181_s0 + $0x2e0] ss:$16 sps:$4 sm:$0xff]  }
  0x7a   :  { %2700 = vmatmul.mubr.bf16.gmra.mrb[28].mxu0 %v5724_v0  ;;  %2162 = vmatprep.mubr.bf16.mxu1 %v5725_v1  ;;  %v5820_v0 = vld [vmem:[%s7181_s0 + $0x2e8] ss:$16 sps:$4 sm:$0xff]   ;;  %v5821_v1 = vld [vmem:[%s7181_s0 + $0x304] ss:$16 sps:$4 sm:$0xff]  }
  0x7b   :  { %2707 = vmatprep.mubr.bf16.mxu0 %v5727_v2  ;;  %v5823_v2 = vld [vmem:[%s7181_s0 + $0x30c] ss:$16 sps:$4 sm:$0xff]  }
  0x81   :  { %2163 = vmatmul.mubr.bf16.gmra.mrb[32].mxu1 %v5729_v3  ;;  %v5825_v3 = vld [vmem:[%s7181_s0 + $0x300] ss:$16 sps:$4 sm:$0xff]  }
  0x82   :  { %2708 = vmatmul.mubr.bf16.gmra.mrb[32].mxu0 %v5730_v4  ;;  %2170 = vmatprep.mubr.bf16.mxu1 %v5731_v5  ;;  %v5826_v4 = vld [vmem:[%s7181_s0 + $0x308] ss:$16 sps:$4 sm:$0xff]   ;;  %v5827_v5 = vld [vmem:[%s7181_s0 + $0x324] ss:$16 sps:$4 sm:$0xff]  }
  0x83   :  { %2715 = vmatprep.mubr.bf16.mxu0 %v5733_v6  ;;  %v5829_v6 = vld [vmem:[%s7181_s0 + $0x32c] ss:$16 sps:$4 sm:$0xff]  }
  0x89   :  { %2171 = vmatmul.mubr.bf16.gmra.mrb[36].mxu1 %v5735_v7  ;;  %v5831_v7 = vld [vmem:[%s7181_s0 + $0x320] ss:$16 sps:$4 sm:$0xff]  }
  0x8a   :  { %2716 = vmatmul.mubr.bf16.gmra.mrb[36].mxu0 %v5736_v8  ;;  %2178 = vmatprep.mubr.bf16.mxu1 %v5737_v9  ;;  %v5832_v8 = vld [vmem:[%s7181_s0 + $0x328] ss:$16 sps:$4 sm:$0xff]   ;;  %v5833_v9 = vld [vmem:[%s7181_s0 + $0x344] ss:$16 sps:$4 sm:$0xff]  }
  0x8b   :  { %2723 = vmatprep.mubr.bf16.mxu0 %v5739_v10  ;;  %v5835_v10 = vld [vmem:[%s7181_s0 + $0x34c] ss:$16 sps:$4 sm:$0xff]  }
  0x91   :  { %2179 = vmatmul.mubr.bf16.gmra.mrb[40].mxu1 %v5741_v11  ;;  %v5837_v11 = vld [vmem:[%s7181_s0 + $0x340] ss:$16 sps:$4 sm:$0xff]  }
  0x92   :  { %2724 = vmatmul.mubr.bf16.gmra.mrb[40].mxu0 %v5742_v12  ;;  %2186 = vmatprep.mubr.bf16.mxu1 %v5743_v13  ;;  %v5838_v12 = vld [vmem:[%s7181_s0 + $0x348] ss:$16 sps:$4 sm:$0xff]   ;;  %v5839_v13 = vld [vmem:[%s7181_s0 + $0x364] ss:$16 sps:$4 sm:$0xff]  }
  0x93   :  { %2731 = vmatprep.mubr.bf16.mxu0 %v5745_v14  ;;  %v5841_v14 = vld [vmem:[%s7181_s0 + $0x36c] ss:$16 sps:$4 sm:$0xff]  }
  0x99   :  { %2187 = vmatmul.mubr.bf16.gmra.mrb[44].mxu1 %v5747_v15 }
  0x9a   :  { %2732 = vmatmul.mubr.bf16.gmra.mrb[44].mxu0 %v5748_v16  ;;  %2194 = vmatprep.mubr.bf16.mxu1 %v5749_v17 }
  0x9b   :  { %2739 = vmatprep.mubr.bf16.mxu0 %v5751_v18  ;;  %v5843_v18 = vld [vmem:[%s7181_s0 + $0x360] ss:$16 sps:$4 sm:$0xff]  }
  0xa1   :  { %2195 = vmatmul.mubr.bf16.gmra.mrb[48].mxu1 %v5753_v19 }
  0xa2   :  { %2740 = vmatmul.mubr.bf16.gmra.mrb[48].mxu0 %v5754_v20  ;;  %2202 = vmatprep.mubr.bf16.mxu1 %v5755_v21 }
  0xa3   :  { %2747 = vmatprep.mubr.bf16.mxu0 %v5757_v22  ;;  %v5844_v22 = vld [vmem:[%s7181_s0 + $0x368] ss:$16 sps:$4 sm:$0xff]  }
  0xa9   :  { %2203 = vmatmul.mubr.bf16.gmra.mrb[52].mxu1 %v5759_v23  ;;  %v5845_v23 = vld [vmem:[%s7181_s0 + $0x384] ss:$16 sps:$4 sm:$0xff]  }
  0xaa   :  { %2748 = vmatmul.mubr.bf16.gmra.mrb[52].mxu0 %v5760_v24  ;;  %2210 = vmatprep.mubr.bf16.mxu1 %v5761_v25 }
  0xab   :  { %2755 = vmatprep.mubr.bf16.mxu0 %v5763_v26  ;;  %v5847_v26 = vld [vmem:[%s7181_s0 + $0x38c] ss:$16 sps:$4 sm:$0xff]  }
  0xb1   :  { %2211 = vmatmul.mubr.bf16.gmra.mrb[56].mxu1 %v5765_v27 }
  0xb2   :  { %2756 = vmatmul.mubr.bf16.gmra.mrb[56].mxu0 %v5766_v28  ;;  %2218 = vmatprep.mubr.bf16.mxu1 %v5767_v29 }
  0xb3   :  { %2763 = vmatprep.mubr.bf16.mxu0 %v5769_v30 }
  0xb9   :  { %2219 = vmatmul.mubr.bf16.gmra.mrb[60].mxu1 %v5771_v31 }
  0xba   :  { %2764 = vmatmul.mubr.bf16.gmra.mrb[60].mxu0 %v5772_v32  ;;  %2226 = vmatprep.mubr.bf16.mxu1 %v5773_v33 }
  0xbb   :  { %2771 = vmatprep.mubr.bf16.mxu0 %v5775_v34 }
  0xc1   :  { %2227 = vmatmul.mubr.bf16.gmra.mrb[64].mxu1 %v5777_v35 }
  0xc2   :  { %2772 = vmatmul.mubr.bf16.gmra.mrb[64].mxu0 %v5778_v36  ;;  %2234 = vmatprep.mubr.bf16.mxu1 %v5779_v37  ;;  %v5849_v37 = vld [vmem:[%s7181_s0 + $0x380] ss:$16 sps:$4 sm:$0xff]  }
  0xc3   :  { %2779 = vmatprep.mubr.bf16.mxu0 %v5781_v38 }
  0xc9   :  { %2235 = vmatmul.mubr.bf16.gmra.mrb[68].mxu1 %v5783_v39 }
  0xca   :  { %2780 = vmatmul.mubr.bf16.gmra.mrb[68].mxu0 %v5784_v40  ;;  %2242 = vmatprep.mubr.bf16.mxu1 %v5785_v41  ;;  %v5850_v41 = vld [vmem:[%s7181_s0 + $0x388] ss:$16 sps:$4 sm:$0xff]  }
  0xcb   :  { %2787 = vmatprep.mubr.bf16.mxu0 %v5787_v42 }
  0xd1   :  { %2243 = vmatmul.mubr.bf16.gmra.mrb[72].mxu1 %v5789_v43 }
  0xd2   :  { %2788 = vmatmul.mubr.bf16.gmra.mrb[72].mxu0 %v5790_v44  ;;  %2250 = vmatprep.mubr.bf16.mxu1 %v5791_v45  ;;  %v5851_v44 = vld [vmem:[%s7181_s0 + $0x3a4] ss:$16 sps:$4 sm:$0xff]   ;;  %v5853_v45 = vld [vmem:[%s7181_s0 + $0x3ac] ss:$16 sps:$4 sm:$0xff]  }
  0xd3   :  { %2795 = vmatprep.mubr.bf16.mxu0 %v5793_v46 }
  0xd9   :  { %2251 = vmatmul.mubr.bf16.gmra.mrb[76].mxu1 %v5795_v47 }
  0xda   :  { %2796 = vmatmul.mubr.bf16.gmra.mrb[76].mxu0 %v5796_v48  ;;  %2258 = vmatprep.mubr.bf16.mxu1 %v5797_v49 }
  0xdb   :  { %2803 = vmatprep.mubr.bf16.mxu0 %v5799_v50 }
  0xe1   :  { %2259 = vmatmul.mubr.bf16.gmra.mrb[80].mxu1 %v5801_v51 }
  0xe2   :  { %2804 = vmatmul.mubr.bf16.gmra.mrb[80].mxu0 %v5802_v52  ;;  %2266 = vmatprep.mubr.bf16.mxu1 %v5803_v53 }
  0xe3   :  { %2811 = vmatprep.mubr.bf16.mxu0 %v5805_v54 }
  0xe9   :  { %2267 = vmatmul.mubr.bf16.gmra.mrb[84].mxu1 %v5807_v55 }
  0xea   :  { %2812 = vmatmul.mubr.bf16.gmra.mrb[84].mxu0 %v5808_v56  ;;  %2274 = vmatprep.mubr.bf16.mxu1 %v5809_v57 }
  0xeb   :  { %2819 = vmatprep.mubr.bf16.mxu0 %v5811_v58  ;;  %v5855_v58 = vld [vmem:[%s7181_s0 + $0x3a0] ss:$16 sps:$4 sm:$0xff]  }
  0xf1   :  { %2275 = vmatmul.mubr.bf16.gmra.mrb[88].mxu1 %v5813_v59 }
  0xf2   :  { %2820 = vmatmul.mubr.bf16.gmra.mrb[88].mxu0 %v5814_v60  ;;  %2282 = vmatprep.mubr.bf16.mxu1 %v5815_v61 }
  0xf3   :  { %2827 = vmatprep.mubr.bf16.mxu0 %v5817_v62  ;;  %v5856_v62 = vld [vmem:[%s7181_s0 + $0x3a8] ss:$16 sps:$4 sm:$0xff]  }
  0xf9   :  { %2283 = vmatmul.mubr.bf16.gmra.mrb[92].mxu1 %v5819_v63 }
  0xfa   :  { %2828 = vmatmul.mubr.bf16.gmra.mrb[92].mxu0 %v5820_v0  ;;  %2290 = vmatprep.mubr.bf16.mxu1 %v5821_v1  ;;  %v5857_v1 = vld [vmem:[%s7181_s0 + $0x3c4] ss:$16 sps:$4 sm:$0xff]  }
  0xfb   :  { %2835 = vmatprep.mubr.bf16.mxu0 %v5823_v2  ;;  %v5859_v2 = vld [vmem:[%s7181_s0 + $0x3cc] ss:$16 sps:$4 sm:$0xff]  }
 0x101   :  { %2291 = vmatmul.mubr.bf16.gmra.mrb[96].mxu1 %v5825_v3 }
 0x102   :  { %2836 = vmatmul.mubr.bf16.gmra.mrb[96].mxu0 %v5826_v4  ;;  %2298 = vmatprep.mubr.bf16.mxu1 %v5827_v5 }
 0x103   :  { %2843 = vmatprep.mubr.bf16.mxu0 %v5829_v6 }
 0x109   :  { %2299 = vmatmul.mubr.bf16.gmra.mrb[100].mxu1 %v5831_v7 }
 0x10a   :  { %2844 = vmatmul.mubr.bf16.gmra.mrb[100].mxu0 %v5832_v8  ;;  %2306 = vmatprep.mubr.bf16.mxu1 %v5833_v9 }
 0x10b   :  { %2851 = vmatprep.mubr.bf16.mxu0 %v5835_v10 }
 0x111   :  { %2307 = vmatmul.mubr.bf16.gmra.mrb[104].mxu1 %v5837_v11 }
 0x112   :  { %2852 = vmatmul.mubr.bf16.gmra.mrb[104].mxu0 %v5838_v12  ;;  %2314 = vmatprep.mubr.bf16.mxu1 %v5839_v13 }
 0x113   :  { %2859 = vmatprep.mubr.bf16.mxu0 %v5841_v14 }
 0x114   :  { %v2100_v15 = vpop.f32.mrb[0].mxu1 }
 0x115   :  { %v2645_v16 = vpop.f32.mrb[0].mxu0  ;;  %v2102_v17 = vpop.f32.mrb[1].mxu1 }
 0x116   :  { %v2646_v19 = vadd.f32 %v2645_v16, %v2100_v15  ;;  %v2647_v20 = vpop.f32.mrb[1].mxu0  ;;  %v2103_v21 = vpop.f32.mrb[2].mxu1  ;;  %v5861_v15 = vld [vmem:[%s7181_s0 + $0x3c0] ss:$16 sps:$4 sm:$0xff]  }
 0x117   :  { %v2648_v24 = vpop.f32.mrb[2].mxu0  ;;  %v2105_v25 = vpop.f32.mrb[3].mxu1 }
 0x118   :  { %v2649_v27 = vadd.f32 %v2648_v24, %v2103_v21  ;;  %v2650_v28 = vpop.f32.mrb[3].mxu0  ;;  %v4318_v29 = vmul.f32 %v2646_v19, %v2646_v19 }
 0x119   :  { %2315 = vmatmul.mubr.bf16.gmra.mrb[108].mxu1 %v5843_v18 }
 0x11a   :  { %v5135_v30 = vpack.c.bf16 %v2649_v27, %v2646_v19  ;;  %v4184_v31 = vadd.f32 %v2649_v27, %v2646_v19  ;;  %v4319_v32 = vmul.f32 %v2649_v27, %v2649_v27  ;;  %2860 = vmatmul.mubr.bf16.gmra.mrb[108].mxu0 %v5844_v22  ;;  %2322 = vmatprep.mubr.bf16.mxu1 %v5845_v23  ;;  %v5862_v19 = vld [vmem:[%s7181_s0 + $0x3c8] ss:$16 sps:$4 sm:$0xff]   ;;  %v5863_v22 = vld [vmem:[%s7181_s0 + $0x3e4] ss:$16 sps:$4 sm:$0xff]   ;;  %v5865_v23 = vld [vmem:[%s7181_s0 + $0x3ec] ss:$16 sps:$4 sm:$0xff]  }
 0x11b   :  { %2867 = vmatprep.mubr.bf16.mxu0 %v5847_v26 }
 0x11c   :  { %5136 = vst [vmem:[%s7182_s2] sm:$0xff] %v5135_v30   ;;  %v4446_v33 = vadd.f32 %v4319_v32, %v4318_v29  ;;  %v2108_v34 = vpop.f32.mrb[4].mxu1 }
 0x11d   :  { %v2653_v35 = vpop.f32.mrb[4].mxu0  ;;  %v2110_v36 = vpop.f32.mrb[5].mxu1 }
 0x11e   :  { %v2654_v38 = vadd.f32 %v2653_v35, %v2108_v34  ;;  %v2655_v39 = vpop.f32.mrb[5].mxu0  ;;  %v2111_v40 = vpop.f32.mrb[6].mxu1  ;;  %v5867_v36 = vld [vmem:[%s7181_s0 + $0x3e0] ss:$16 sps:$4 sm:$0xff]  }
 0x11f   :  { %v2656_v42 = vpop.f32.mrb[6].mxu0  ;;  %v2113_v43 = vpop.f32.mrb[7].mxu1 }
 0x120   :  { %v4185_v46 = vadd.f32 %v4184_v31, %v2654_v38  ;;  %v4320_v47 = vmul.f32 %v2654_v38, %v2654_v38  ;;  %v2657_v48 = vadd.f32 %v2656_v42, %v2111_v40  ;;  %v2658_v49 = vpop.f32.mrb[7].mxu0  ;;  %v5868_v40 = vld [vmem:[%s7181_s0 + $0x3e8] ss:$16 sps:$4 sm:$0xff]   ;;  %v5869_v43 = vld [vmem:[%s7181_s0 + $0x404] ss:$16 sps:$4 sm:$0xff]  }
 0x121   :  { %2323 = vmatmul.mubr.bf16.gmra.mrb[112].mxu1 %v5849_v37 }
 0x122   :  { %v4447_v50 = vadd.f32 %v4446_v33, %v4320_v47  ;;  %v5140_v51 = vpack.c.bf16 %v2657_v48, %v2654_v38  ;;  %v4186_v52 = vadd.f32 %v4185_v46, %v2657_v48  ;;  %v4321_v53 = vmul.f32 %v2657_v48, %v2657_v48  ;;  %2868 = vmatmul.mubr.bf16.gmra.mrb[112].mxu0 %v5850_v41 }
 0x123   :  { %2330 = vmatprep.mubr.bf16.mxu1 %v5851_v44  ;;  %2875 = vmatprep.mubr.bf16.mxu0 %v5853_v45  ;;  %v5871_v44 = vld [vmem:[%s7181_s0 + $0x40c] ss:$16 sps:$4 sm:$0xff]  }
 0x124   :  { %5452 = vst [vmem:[%s7182_s2 + $0x8] sm:$0xff] %v5140_v51   ;;  %v4448_v54 = vadd.f32 %v4447_v50, %v4321_v53  ;;  %v2116_v55 = vpop.f32.mrb[8].mxu1 }
 0x125   :  { %v2661_v56 = vpop.f32.mrb[8].mxu0  ;;  %v2118_v57 = vpop.f32.mrb[9].mxu1 }
 0x126   :  { %v2662_v59 = vadd.f32 %v2661_v56, %v2116_v55  ;;  %v2663_v60 = vpop.f32.mrb[9].mxu0  ;;  %v2119_v61 = vpop.f32.mrb[10].mxu1  ;;  %v5873_v57 = vld [vmem:[%s7181_s0 + $0x400] ss:$16 sps:$4 sm:$0xff]  }
 0x127   :  { %v2664_v63 = vpop.f32.mrb[10].mxu0  ;;  %v2121_v0 = vpop.f32.mrb[11].mxu1 }
 0x128   :  { %v4187_v3 = vadd.f32 %v4186_v52, %v2662_v59  ;;  %v4322_v4 = vmul.f32 %v2662_v59, %v2662_v59  ;;  %v2665_v5 = vadd.f32 %v2664_v63, %v2119_v61  ;;  %v2666_v6 = vpop.f32.mrb[11].mxu0  ;;  %v5874_v61 = vld [vmem:[%s7181_s0 + $0x408] ss:$16 sps:$4 sm:$0xff]   ;;  %v5875_v0 = vld [vmem:[%s7181_s0 + $0x424] ss:$16 sps:$4 sm:$0xff]  }
 0x129   :  { %2331 = vmatmul.mubr.bf16.gmra.mrb[116].mxu1 %v5855_v58 }
 0x12a   :  { %v4449_v7 = vadd.f32 %v4448_v54, %v4322_v4  ;;  %v5145_v8 = vpack.c.bf16 %v2665_v5, %v2662_v59  ;;  %v4188_v9 = vadd.f32 %v4187_v3, %v2665_v5  ;;  %v4323_v10 = vmul.f32 %v2665_v5, %v2665_v5  ;;  %2876 = vmatmul.mubr.bf16.gmra.mrb[116].mxu0 %v5856_v62 }
 0x12b   :  { %2338 = vmatprep.mubr.bf16.mxu1 %v5857_v1  ;;  %2883 = vmatprep.mubr.bf16.mxu0 %v5859_v2  ;;  %v5877_v1 = vld [vmem:[%s7181_s0 + $0x42c] ss:$16 sps:$4 sm:$0xff]  }
 0x12c   :  { %5453 = vst [vmem:[%s7182_s2 + $0x10] sm:$0xff] %v5145_v8   ;;  %v4450_v11 = vadd.f32 %v4449_v7, %v4323_v10  ;;  %v2124_v12 = vpop.f32.mrb[12].mxu1 }
 0x12d   :  { %v2669_v13 = vpop.f32.mrb[12].mxu0  ;;  %v2126_v14 = vpop.f32.mrb[13].mxu1 }
 0x12e   :  { %v2670_v16 = vadd.f32 %v2669_v13, %v2124_v12  ;;  %v2671_v17 = vpop.f32.mrb[13].mxu0  ;;  %v2127_v18 = vpop.f32.mrb[14].mxu1  ;;  %v5879_v14 = vld [vmem:[%s7181_s0 + $0x420] ss:$16 sps:$4 sm:$0xff]  }
 0x12f   :  { %v2672_v20 = vpop.f32.mrb[14].mxu0  ;;  %v2129_v21 = vpop.f32.mrb[15].mxu1 }
 0x130   :  { %v4189_v24 = vadd.f32 %v4188_v9, %v2670_v16  ;;  %v4324_v25 = vmul.f32 %v2670_v16, %v2670_v16  ;;  %v2673_v26 = vadd.f32 %v2672_v20, %v2127_v18  ;;  %v2674_v27 = vpop.f32.mrb[15].mxu0  ;;  %v5880_v18 = vld [vmem:[%s7181_s0 + $0x428] ss:$16 sps:$4 sm:$0xff]   ;;  %v5881_v21 = vld [vmem:[%s7181_s0 + $0x444] ss:$16 sps:$4 sm:$0xff]  }
 0x131   :  { %2339 = vmatmul.mubr.bf16.gmra.mrb[120].mxu1 %v5861_v15 }
 0x132   :  { %v4451_v28 = vadd.f32 %v4450_v11, %v4324_v25  ;;  %v5150_v29 = vpack.c.bf16 %v2673_v26, %v2670_v16  ;;  %v4190_v30 = vadd.f32 %v4189_v24, %v2673_v26  ;;  %v4325_v31 = vmul.f32 %v2673_v26, %v2673_v26  ;;  %2884 = vmatmul.mubr.bf16.gmra.mrb[120].mxu0 %v5862_v19 }
 0x133   :  { %2346 = vmatprep.mubr.bf16.mxu1 %v5863_v22  ;;  %2891 = vmatprep.mubr.bf16.mxu0 %v5865_v23  ;;  %v5883_v22 = vld [vmem:[%s7181_s0 + $0x44c] ss:$16 sps:$4 sm:$0xff]  }
 0x134   :  { %5454 = vst [vmem:[%s7182_s2 + $0x18] sm:$0xff] %v5150_v29   ;;  %v4452_v32 = vadd.f32 %v4451_v28, %v4325_v31  ;;  %v2132_v33 = vpop.f32.mrb[16].mxu1 }
 0x135   :  { %v2677_v34 = vpop.f32.mrb[16].mxu0  ;;  %v2134_v35 = vpop.f32.mrb[17].mxu1 }
 0x136   :  { %v2678_v37 = vadd.f32 %v2677_v34, %v2132_v33  ;;  %v2679_v38 = vpop.f32.mrb[17].mxu0  ;;  %v2135_v39 = vpop.f32.mrb[18].mxu1  ;;  %v5885_v35 = vld [vmem:[%s7181_s0 + $0x440] ss:$16 sps:$4 sm:$0xff]  }
 0x137   :  { %v2680_v41 = vpop.f32.mrb[18].mxu0  ;;  %v2137_v42 = vpop.f32.mrb[19].mxu1 }
 0x138   :  { %v4191_v45 = vadd.f32 %v4190_v30, %v2678_v37  ;;  %v4326_v46 = vmul.f32 %v2678_v37, %v2678_v37  ;;  %v2681_v47 = vadd.f32 %v2680_v41, %v2135_v39  ;;  %v2682_v48 = vpop.f32.mrb[19].mxu0  ;;  %v5886_v39 = vld [vmem:[%s7181_s0 + $0x448] ss:$16 sps:$4 sm:$0xff]   ;;  %v5887_v42 = vld [vmem:[%s7181_s0 + $0x464] ss:$16 sps:$4 sm:$0xff]  }
 0x139   :  { %2347 = vmatmul.mubr.bf16.gmra.mrb[124].mxu1 %v5867_v36 }
 0x13a   :  { %v4453_v49 = vadd.f32 %v4452_v32, %v4326_v46  ;;  %v5155_v50 = vpack.c.bf16 %v2681_v47, %v2678_v37  ;;  %v4192_v51 = vadd.f32 %v4191_v45, %v2681_v47  ;;  %v4327_v52 = vmul.f32 %v2681_v47, %v2681_v47  ;;  %2892 = vmatmul.mubr.bf16.gmra.mrb[124].mxu0 %v5868_v40 }
 0x13b   :  { %2354 = vmatprep.mubr.bf16.mxu1 %v5869_v43  ;;  %2899 = vmatprep.mubr.bf16.mxu0 %v5871_v44  ;;  %v5889_v43 = vld [vmem:[%s7181_s0 + $0x46c] ss:$16 sps:$4 sm:$0xff]  }
 0x13c   :  { %5455 = vst [vmem:[%s7182_s2 + $0x20] sm:$0xff] %v5155_v50   ;;  %v4454_v53 = vadd.f32 %v4453_v49, %v4327_v52  ;;  %v2140_v54 = vpop.f32.mrb[20].mxu1 }
 0x13d   :  { %v2685_v55 = vpop.f32.mrb[20].mxu0  ;;  %v2142_v56 = vpop.f32.mrb[21].mxu1 }
 0x13e   :  { %v2686_v58 = vadd.f32 %v2685_v55, %v2140_v54  ;;  %v2687_v59 = vpop.f32.mrb[21].mxu0  ;;  %v2143_v60 = vpop.f32.mrb[22].mxu1  ;;  %v5891_v56 = vld [vmem:[%s7181_s0 + $0x460] ss:$16 sps:$4 sm:$0xff]  }
 0x13f   :  { %v2688_v62 = vpop.f32.mrb[22].mxu0  ;;  %v2145_v63 = vpop.f32.mrb[23].mxu1 }
 0x140   :  { %v4193_v2 = vadd.f32 %v4192_v51, %v2686_v58  ;;  %v4328_v3 = vmul.f32 %v2686_v58, %v2686_v58  ;;  %v2689_v4 = vadd.f32 %v2688_v62, %v2143_v60  ;;  %v2690_v5 = vpop.f32.mrb[23].mxu0  ;;  %v5892_v60 = vld [vmem:[%s7181_s0 + $0x468] ss:$16 sps:$4 sm:$0xff]   ;;  %v5893_v63 = vld [vmem:[%s7181_s0 + $0x484] ss:$16 sps:$4 sm:$0xff]  }
 0x141   :  { %2355 = vmatmul.mubr.bf16.gmra.mrb[128].mxu1 %v5873_v57 }
 0x142   :  { %v4455_v6 = vadd.f32 %v4454_v53, %v4328_v3  ;;  %v5160_v7 = vpack.c.bf16 %v2689_v4, %v2686_v58  ;;  %v4194_v8 = vadd.f32 %v4193_v2, %v2689_v4  ;;  %v4329_v9 = vmul.f32 %v2689_v4, %v2689_v4  ;;  %2900 = vmatmul.mubr.bf16.gmra.mrb[128].mxu0 %v5874_v61 }
 0x143   :  { %2362 = vmatprep.mubr.bf16.mxu1 %v5875_v0  ;;  %2907 = vmatprep.mubr.bf16.mxu0 %v5877_v1  ;;  %v5895_v0 = vld [vmem:[%s7181_s0 + $0x48c] ss:$16 sps:$4 sm:$0xff]  }
 0x144   :  { %5456 = vst [vmem:[%s7182_s2 + $0x28] sm:$0xff] %v5160_v7   ;;  %v4456_v10 = vadd.f32 %v4455_v6, %v4329_v9  ;;  %v2148_v11 = vpop.f32.mrb[24].mxu1 }
 0x145   :  { %v2693_v12 = vpop.f32.mrb[24].mxu0  ;;  %v2150_v13 = vpop.f32.mrb[25].mxu1 }
 0x146   :  { %v2694_v15 = vadd.f32 %v2693_v12, %v2148_v11  ;;  %v2695_v16 = vpop.f32.mrb[25].mxu0  ;;  %v2151_v17 = vpop.f32.mrb[26].mxu1  ;;  %v5897_v13 = vld [vmem:[%s7181_s0 + $0x480] ss:$16 sps:$4 sm:$0xff]  }
 0x147   :  { %v2696_v19 = vpop.f32.mrb[26].mxu0  ;;  %v2153_v20 = vpop.f32.mrb[27].mxu1 }
 0x148   :  { %v4195_v23 = vadd.f32 %v4194_v8, %v2694_v15  ;;  %v4330_v24 = vmul.f32 %v2694_v15, %v2694_v15  ;;  %v2697_v25 = vadd.f32 %v2696_v19, %v2151_v17  ;;  %v2698_v26 = vpop.f32.mrb[27].mxu0  ;;  %v5898_v17 = vld [vmem:[%s7181_s0 + $0x488] ss:$16 sps:$4 sm:$0xff]   ;;  %v5899_v20 = vld [vmem:[%s7181_s0 + $0x4a4] ss:$16 sps:$4 sm:$0xff]  }
 0x149   :  { %2363 = vmatmul.mubr.bf16.gmra.mrb[132].mxu1 %v5879_v14 }
 0x14a   :  { %v4457_v27 = vadd.f32 %v4456_v10, %v4330_v24  ;;  %v5165_v28 = vpack.c.bf16 %v2697_v25, %v2694_v15  ;;  %v4196_v29 = vadd.f32 %v4195_v23, %v2697_v25  ;;  %v4331_v30 = vmul.f32 %v2697_v25, %v2697_v25  ;;  %2908 = vmatmul.mubr.bf16.gmra.mrb[132].mxu0 %v5880_v18 }
 0x14b   :  { %2370 = vmatprep.mubr.bf16.mxu1 %v5881_v21  ;;  %2915 = vmatprep.mubr.bf16.mxu0 %v5883_v22  ;;  %v5901_v21 = vld [vmem:[%s7181_s0 + $0x4ac] ss:$16 sps:$4 sm:$0xff]  }
 0x14c   :  { %5457 = vst [vmem:[%s7182_s2 + $0x30] sm:$0xff] %v5165_v28   ;;  %v4458_v31 = vadd.f32 %v4457_v27, %v4331_v30  ;;  %v2156_v32 = vpop.f32.mrb[28].mxu1 }
 0x14d   :  { %v2701_v33 = vpop.f32.mrb[28].mxu0  ;;  %v2158_v34 = vpop.f32.mrb[29].mxu1 }
 0x14e   :  { %v2702_v36 = vadd.f32 %v2701_v33, %v2156_v32  ;;  %v2703_v37 = vpop.f32.mrb[29].mxu0  ;;  %v2159_v38 = vpop.f32.mrb[30].mxu1  ;;  %v5903_v34 = vld [vmem:[%s7181_s0 + $0x4a0] ss:$16 sps:$4 sm:$0xff]  }
 0x14f   :  { %v2704_v40 = vpop.f32.mrb[30].mxu0  ;;  %v2161_v41 = vpop.f32.mrb[31].mxu1 }
 0x150   :  { %v4197_v44 = vadd.f32 %v4196_v29, %v2702_v36  ;;  %v4332_v45 = vmul.f32 %v2702_v36, %v2702_v36  ;;  %v2705_v46 = vadd.f32 %v2704_v40, %v2159_v38  ;;  %v2706_v47 = vpop.f32.mrb[31].mxu0  ;;  %v5904_v38 = vld [vmem:[%s7181_s0 + $0x4a8] ss:$16 sps:$4 sm:$0xff]   ;;  %v5905_v41 = vld [vmem:[%s7181_s0 + $0x4c4] ss:$16 sps:$4 sm:$0xff]  }
 0x151   :  { %2371 = vmatmul.mubr.bf16.gmra.mrb[136].mxu1 %v5885_v35 }
 0x152   :  { %v4459_v48 = vadd.f32 %v4458_v31, %v4332_v45  ;;  %v5170_v49 = vpack.c.bf16 %v2705_v46, %v2702_v36  ;;  %v4198_v50 = vadd.f32 %v4197_v44, %v2705_v46  ;;  %v4333_v51 = vmul.f32 %v2705_v46, %v2705_v46  ;;  %2916 = vmatmul.mubr.bf16.gmra.mrb[136].mxu0 %v5886_v39 }
 0x153   :  { %2378 = vmatprep.mubr.bf16.mxu1 %v5887_v42  ;;  %2923 = vmatprep.mubr.bf16.mxu0 %v5889_v43  ;;  %v5907_v42 = vld [vmem:[%s7181_s0 + $0x4cc] ss:$16 sps:$4 sm:$0xff]  }
 0x154   :  { %5458 = vst [vmem:[%s7182_s2 + $0x38] sm:$0xff] %v5170_v49   ;;  %v4460_v52 = vadd.f32 %v4459_v48, %v4333_v51  ;;  %v2164_v53 = vpop.f32.mrb[32].mxu1 }
 0x155   :  { %v2709_v54 = vpop.f32.mrb[32].mxu0  ;;  %v2166_v55 = vpop.f32.mrb[33].mxu1 }
 0x156   :  { %v2710_v57 = vadd.f32 %v2709_v54, %v2164_v53  ;;  %v2711_v58 = vpop.f32.mrb[33].mxu0  ;;  %v2167_v59 = vpop.f32.mrb[34].mxu1  ;;  %v5909_v55 = vld [vmem:[%s7181_s0 + $0x4c0] ss:$16 sps:$4 sm:$0xff]  }
 0x157   :  { %v2712_v61 = vpop.f32.mrb[34].mxu0  ;;  %v2169_v62 = vpop.f32.mrb[35].mxu1 }
 0x158   :  { %v4199_v1 = vadd.f32 %v4198_v50, %v2710_v57  ;;  %v4334_v2 = vmul.f32 %v2710_v57, %v2710_v57  ;;  %v2713_v3 = vadd.f32 %v2712_v61, %v2167_v59  ;;  %v2714_v4 = vpop.f32.mrb[35].mxu0  ;;  %v5910_v59 = vld [vmem:[%s7181_s0 + $0x4c8] ss:$16 sps:$4 sm:$0xff]   ;;  %v5911_v62 = vld [vmem:[%s7181_s0 + $0x4e4] ss:$16 sps:$4 sm:$0xff]  }
 0x159   :  { %2379 = vmatmul.mubr.bf16.gmra.mrb[140].mxu1 %v5891_v56 }
 0x15a   :  { %v4461_v5 = vadd.f32 %v4460_v52, %v4334_v2  ;;  %v5175_v6 = vpack.c.bf16 %v2713_v3, %v2710_v57  ;;  %v4200_v7 = vadd.f32 %v4199_v1, %v2713_v3  ;;  %v4335_v8 = vmul.f32 %v2713_v3, %v2713_v3  ;;  %2924 = vmatmul.mubr.bf16.gmra.mrb[140].mxu0 %v5892_v60 }
 0x15b   :  { %2386 = vmatprep.mubr.bf16.mxu1 %v5893_v63  ;;  %2931 = vmatprep.mubr.bf16.mxu0 %v5895_v0  ;;  %v5913_v63 = vld [vmem:[%s7181_s0 + $0x4ec] ss:$16 sps:$4 sm:$0xff]  }
 0x15c   :  { %5459 = vst [vmem:[%s7182_s2 + $0x40] sm:$0xff] %v5175_v6   ;;  %v4462_v9 = vadd.f32 %v4461_v5, %v4335_v8  ;;  %v2172_v10 = vpop.f32.mrb[36].mxu1 }
 0x15d   :  { %v2717_v11 = vpop.f32.mrb[36].mxu0  ;;  %v2174_v12 = vpop.f32.mrb[37].mxu1 }
 0x15e   :  { %v2718_v14 = vadd.f32 %v2717_v11, %v2172_v10  ;;  %v2719_v15 = vpop.f32.mrb[37].mxu0  ;;  %v2175_v16 = vpop.f32.mrb[38].mxu1  ;;  %v5915_v12 = vld [vmem:[%s7181_s0 + $0x4e0] ss:$16 sps:$4 sm:$0xff]  }
 0x15f   :  { %v2720_v18 = vpop.f32.mrb[38].mxu0  ;;  %v2177_v19 = vpop.f32.mrb[39].mxu1 }
 0x160   :  { %v4201_v22 = vadd.f32 %v4200_v7, %v2718_v14  ;;  %v4336_v23 = vmul.f32 %v2718_v14, %v2718_v14  ;;  %v2721_v24 = vadd.f32 %v2720_v18, %v2175_v16  ;;  %v2722_v25 = vpop.f32.mrb[39].mxu0  ;;  %v5916_v16 = vld [vmem:[%s7181_s0 + $0x4e8] ss:$16 sps:$4 sm:$0xff]   ;;  %v5917_v19 = vld [vmem:[%s7181_s0 + $0x504] ss:$16 sps:$4 sm:$0xff]  }
 0x161   :  { %2387 = vmatmul.mubr.bf16.gmra.mrb[144].mxu1 %v5897_v13 }
 0x162   :  { %v4463_v26 = vadd.f32 %v4462_v9, %v4336_v23  ;;  %v5180_v27 = vpack.c.bf16 %v2721_v24, %v2718_v14  ;;  %v4202_v28 = vadd.f32 %v4201_v22, %v2721_v24  ;;  %v4337_v29 = vmul.f32 %v2721_v24, %v2721_v24  ;;  %2932 = vmatmul.mubr.bf16.gmra.mrb[144].mxu0 %v5898_v17 }
 0x163   :  { %2394 = vmatprep.mubr.bf16.mxu1 %v5899_v20  ;;  %2939 = vmatprep.mubr.bf16.mxu0 %v5901_v21  ;;  %v5919_v20 = vld [vmem:[%s7181_s0 + $0x50c] ss:$16 sps:$4 sm:$0xff]  }
 0x164   :  { %5460 = vst [vmem:[%s7182_s2 + $0x48] sm:$0xff] %v5180_v27   ;;  %v4464_v30 = vadd.f32 %v4463_v26, %v4337_v29  ;;  %v2180_v31 = vpop.f32.mrb[40].mxu1 }
 0x165   :  { %v2725_v32 = vpop.f32.mrb[40].mxu0  ;;  %v2182_v33 = vpop.f32.mrb[41].mxu1 }
 0x166   :  { %v2726_v35 = vadd.f32 %v2725_v32, %v2180_v31  ;;  %v2727_v36 = vpop.f32.mrb[41].mxu0  ;;  %v2183_v37 = vpop.f32.mrb[42].mxu1  ;;  %v5921_v33 = vld [vmem:[%s7181_s0 + $0x500] ss:$16 sps:$4 sm:$0xff]  }
 0x167   :  { %v2728_v39 = vpop.f32.mrb[42].mxu0  ;;  %v2185_v40 = vpop.f32.mrb[43].mxu1 }
 0x168   :  { %v4203_v43 = vadd.f32 %v4202_v28, %v2726_v35  ;;  %v4338_v44 = vmul.f32 %v2726_v35, %v2726_v35  ;;  %v2729_v45 = vadd.f32 %v2728_v39, %v2183_v37  ;;  %v2730_v46 = vpop.f32.mrb[43].mxu0  ;;  %v5922_v37 = vld [vmem:[%s7181_s0 + $0x508] ss:$16 sps:$4 sm:$0xff]   ;;  %v5923_v40 = vld [vmem:[%s7181_s0 + $0x524] ss:$16 sps:$4 sm:$0xff]  }
 0x169   :  { %2395 = vmatmul.mubr.bf16.gmra.mrb[148].mxu1 %v5903_v34 }
 0x16a   :  { %v4465_v47 = vadd.f32 %v4464_v30, %v4338_v44  ;;  %v5185_v48 = vpack.c.bf16 %v2729_v45, %v2726_v35  ;;  %v4204_v49 = vadd.f32 %v4203_v43, %v2729_v45  ;;  %v4339_v50 = vmul.f32 %v2729_v45, %v2729_v45  ;;  %2940 = vmatmul.mubr.bf16.gmra.mrb[148].mxu0 %v5904_v38 }
 0x16b   :  { %2402 = vmatprep.mubr.bf16.mxu1 %v5905_v41  ;;  %2947 = vmatprep.mubr.bf16.mxu0 %v5907_v42  ;;  %v5925_v41 = vld [vmem:[%s7181_s0 + $0x52c] ss:$16 sps:$4 sm:$0xff]  }
 0x16c   :  { %5461 = vst [vmem:[%s7182_s2 + $0x50] sm:$0xff] %v5185_v48   ;;  %v4466_v51 = vadd.f32 %v4465_v47, %v4339_v50  ;;  %v2188_v52 = vpop.f32.mrb[44].mxu1 }
 0x16d   :  { %v2733_v53 = vpop.f32.mrb[44].mxu0  ;;  %v2190_v54 = vpop.f32.mrb[45].mxu1 }
 0x16e   :  { %v2734_v56 = vadd.f32 %v2733_v53, %v2188_v52  ;;  %v2735_v57 = vpop.f32.mrb[45].mxu0  ;;  %v2191_v58 = vpop.f32.mrb[46].mxu1  ;;  %v5927_v54 = vld [vmem:[%s7181_s0 + $0x520] ss:$16 sps:$4 sm:$0xff]  }
 0x16f   :  { %v2736_v60 = vpop.f32.mrb[46].mxu0  ;;  %v2193_v61 = vpop.f32.mrb[47].mxu1 }
 0x170   :  { %v4205_v0 = vadd.f32 %v4204_v49, %v2734_v56  ;;  %v4340_v1 = vmul.f32 %v2734_v56, %v2734_v56  ;;  %v2737_v2 = vadd.f32 %v2736_v60, %v2191_v58  ;;  %v2738_v3 = vpop.f32.mrb[47].mxu0  ;;  %v5928_v58 = vld [vmem:[%s7181_s0 + $0x528] ss:$16 sps:$4 sm:$0xff]   ;;  %v5929_v61 = vld [vmem:[%s7181_s0 + $0x544] ss:$16 sps:$4 sm:$0xff]  }
 0x171   :  { %2403 = vmatmul.mubr.bf16.gmra.mrb[152].mxu1 %v5909_v55 }
 0x172   :  { %v4467_v4 = vadd.f32 %v4466_v51, %v4340_v1  ;;  %v5190_v5 = vpack.c.bf16 %v2737_v2, %v2734_v56  ;;  %v4206_v6 = vadd.f32 %v4205_v0, %v2737_v2  ;;  %v4341_v7 = vmul.f32 %v2737_v2, %v2737_v2  ;;  %2948 = vmatmul.mubr.bf16.gmra.mrb[152].mxu0 %v5910_v59 }
 0x173   :  { %2410 = vmatprep.mubr.bf16.mxu1 %v5911_v62  ;;  %2955 = vmatprep.mubr.bf16.mxu0 %v5913_v63  ;;  %v5931_v62 = vld [vmem:[%s7181_s0 + $0x54c] ss:$16 sps:$4 sm:$0xff]  }
 0x174   :  { %5462 = vst [vmem:[%s7182_s2 + $0x58] sm:$0xff] %v5190_v5   ;;  %v4468_v8 = vadd.f32 %v4467_v4, %v4341_v7  ;;  %v2196_v9 = vpop.f32.mrb[48].mxu1 }
 0x175   :  { %v2741_v10 = vpop.f32.mrb[48].mxu0  ;;  %v2198_v11 = vpop.f32.mrb[49].mxu1 }
 0x176   :  { %v2742_v13 = vadd.f32 %v2741_v10, %v2196_v9  ;;  %v2743_v14 = vpop.f32.mrb[49].mxu0  ;;  %v2199_v15 = vpop.f32.mrb[50].mxu1  ;;  %v5933_v11 = vld [vmem:[%s7181_s0 + $0x540] ss:$16 sps:$4 sm:$0xff]  }
 0x177   :  { %v2744_v17 = vpop.f32.mrb[50].mxu0  ;;  %v2201_v18 = vpop.f32.mrb[51].mxu1 }
 0x178   :  { %v4207_v21 = vadd.f32 %v4206_v6, %v2742_v13  ;;  %v4342_v22 = vmul.f32 %v2742_v13, %v2742_v13  ;;  %v2745_v23 = vadd.f32 %v2744_v17, %v2199_v15  ;;  %v2746_v24 = vpop.f32.mrb[51].mxu0  ;;  %v5934_v15 = vld [vmem:[%s7181_s0 + $0x548] ss:$16 sps:$4 sm:$0xff]   ;;  %v5935_v18 = vld [vmem:[%s7181_s0 + $0x564] ss:$16 sps:$4 sm:$0xff]  }
 0x179   :  { %2411 = vmatmul.mubr.bf16.gmra.mrb[156].mxu1 %v5915_v12 }
 0x17a   :  { %v4469_v25 = vadd.f32 %v4468_v8, %v4342_v22  ;;  %v5195_v26 = vpack.c.bf16 %v2745_v23, %v2742_v13  ;;  %v4208_v27 = vadd.f32 %v4207_v21, %v2745_v23  ;;  %v4343_v28 = vmul.f32 %v2745_v23, %v2745_v23  ;;  %2956 = vmatmul.mubr.bf16.gmra.mrb[156].mxu0 %v5916_v16 }
 0x17b   :  { %2418 = vmatprep.mubr.bf16.mxu1 %v5917_v19  ;;  %2963 = vmatprep.mubr.bf16.mxu0 %v5919_v20  ;;  %v5937_v19 = vld [vmem:[%s7181_s0 + $0x56c] ss:$16 sps:$4 sm:$0xff]  }
 0x17c   :  { %5463 = vst [vmem:[%s7182_s2 + $0x60] sm:$0xff] %v5195_v26   ;;  %v4470_v29 = vadd.f32 %v4469_v25, %v4343_v28  ;;  %v2204_v30 = vpop.f32.mrb[52].mxu1 }
 0x17d   :  { %v2749_v31 = vpop.f32.mrb[52].mxu0  ;;  %v2206_v32 = vpop.f32.mrb[53].mxu1 }
 0x17e   :  { %v2750_v34 = vadd.f32 %v2749_v31, %v2204_v30  ;;  %v2751_v35 = vpop.f32.mrb[53].mxu0  ;;  %v2207_v36 = vpop.f32.mrb[54].mxu1  ;;  %v5939_v32 = vld [vmem:[%s7181_s0 + $0x560] ss:$16 sps:$4 sm:$0xff]  }
 0x17f   :  { %v2752_v38 = vpop.f32.mrb[54].mxu0  ;;  %v2209_v39 = vpop.f32.mrb[55].mxu1 }
 0x180   :  { %v4209_v42 = vadd.f32 %v4208_v27, %v2750_v34  ;;  %v4344_v43 = vmul.f32 %v2750_v34, %v2750_v34  ;;  %v2753_v44 = vadd.f32 %v2752_v38, %v2207_v36  ;;  %v2754_v45 = vpop.f32.mrb[55].mxu0  ;;  %v5940_v36 = vld [vmem:[%s7181_s0 + $0x568] ss:$16 sps:$4 sm:$0xff]   ;;  %v5941_v39 = vld [vmem:[%s7181_s0 + $0x584] ss:$16 sps:$4 sm:$0xff]  }
 0x181   :  { %2419 = vmatmul.mubr.bf16.gmra.mrb[160].mxu1 %v5921_v33 }
 0x182   :  { %v4471_v46 = vadd.f32 %v4470_v29, %v4344_v43  ;;  %v5200_v47 = vpack.c.bf16 %v2753_v44, %v2750_v34  ;;  %v4210_v48 = vadd.f32 %v4209_v42, %v2753_v44  ;;  %v4345_v49 = vmul.f32 %v2753_v44, %v2753_v44  ;;  %2964 = vmatmul.mubr.bf16.gmra.mrb[160].mxu0 %v5922_v37 }
 0x183   :  { %2426 = vmatprep.mubr.bf16.mxu1 %v5923_v40  ;;  %2971 = vmatprep.mubr.bf16.mxu0 %v5925_v41  ;;  %v5943_v40 = vld [vmem:[%s7181_s0 + $0x58c] ss:$16 sps:$4 sm:$0xff]  }
 0x184   :  { %5464 = vst [vmem:[%s7182_s2 + $0x68] sm:$0xff] %v5200_v47   ;;  %v4472_v50 = vadd.f32 %v4471_v46, %v4345_v49  ;;  %v2212_v51 = vpop.f32.mrb[56].mxu1 }
 0x185   :  { %v2757_v52 = vpop.f32.mrb[56].mxu0  ;;  %v2214_v53 = vpop.f32.mrb[57].mxu1 }
 0x186   :  { %v2758_v55 = vadd.f32 %v2757_v52, %v2212_v51  ;;  %v2759_v56 = vpop.f32.mrb[57].mxu0  ;;  %v2215_v57 = vpop.f32.mrb[58].mxu1  ;;  %v5945_v53 = vld [vmem:[%s7181_s0 + $0x580] ss:$16 sps:$4 sm:$0xff]  }
 0x187   :  { %v2760_v59 = vpop.f32.mrb[58].mxu0  ;;  %v2217_v60 = vpop.f32.mrb[59].mxu1 }
 0x188   :  { %v4211_v63 = vadd.f32 %v4210_v48, %v2758_v55  ;;  %v4346_v0 = vmul.f32 %v2758_v55, %v2758_v55  ;;  %v2761_v1 = vadd.f32 %v2760_v59, %v2215_v57  ;;  %v2762_v2 = vpop.f32.mrb[59].mxu0  ;;  %v5946_v57 = vld [vmem:[%s7181_s0 + $0x588] ss:$16 sps:$4 sm:$0xff]   ;;  %v5947_v60 = vld [vmem:[%s7181_s0 + $0x5a4] ss:$16 sps:$4 sm:$0xff]  }
 0x189   :  { %2427 = vmatmul.mubr.bf16.gmra.mrb[164].mxu1 %v5927_v54 }
 0x18a   :  { %v4473_v3 = vadd.f32 %v4472_v50, %v4346_v0  ;;  %v5205_v4 = vpack.c.bf16 %v2761_v1, %v2758_v55  ;;  %v4212_v5 = vadd.f32 %v4211_v63, %v2761_v1  ;;  %v4347_v6 = vmul.f32 %v2761_v1, %v2761_v1  ;;  %2972 = vmatmul.mubr.bf16.gmra.mrb[164].mxu0 %v5928_v58 }
 0x18b   :  { %2434 = vmatprep.mubr.bf16.mxu1 %v5929_v61  ;;  %2979 = vmatprep.mubr.bf16.mxu0 %v5931_v62  ;;  %v5949_v61 = vld [vmem:[%s7181_s0 + $0x5ac] ss:$16 sps:$4 sm:$0xff]  }
 0x18c   :  { %5465 = vst [vmem:[%s7182_s2 + $0x70] sm:$0xff] %v5205_v4   ;;  %v4474_v7 = vadd.f32 %v4473_v3, %v4347_v6  ;;  %v2220_v8 = vpop.f32.mrb[60].mxu1 }
 0x18d   :  { %v2765_v9 = vpop.f32.mrb[60].mxu0  ;;  %v2222_v10 = vpop.f32.mrb[61].mxu1 }
 0x18e   :  { %v2766_v12 = vadd.f32 %v2765_v9, %v2220_v8  ;;  %v2767_v13 = vpop.f32.mrb[61].mxu0  ;;  %v2223_v14 = vpop.f32.mrb[62].mxu1  ;;  %v5951_v10 = vld [vmem:[%s7181_s0 + $0x5a0] ss:$16 sps:$4 sm:$0xff]  }
 0x18f   :  { %v2768_v16 = vpop.f32.mrb[62].mxu0  ;;  %v2225_v17 = vpop.f32.mrb[63].mxu1 }
 0x190   :  { %v4213_v20 = vadd.f32 %v4212_v5, %v2766_v12  ;;  %v4348_v21 = vmul.f32 %v2766_v12, %v2766_v12  ;;  %v2769_v22 = vadd.f32 %v2768_v16, %v2223_v14  ;;  %v2770_v23 = vpop.f32.mrb[63].mxu0  ;;  %v5952_v14 = vld [vmem:[%s7181_s0 + $0x5a8] ss:$16 sps:$4 sm:$0xff]   ;;  %v5953_v17 = vld [vmem:[%s7181_s0 + $0x5c4] ss:$16 sps:$4 sm:$0xff]  }
 0x191   :  { %2435 = vmatmul.mubr.bf16.gmra.mrb[168].mxu1 %v5933_v11 }
 0x192   :  { %v4475_v24 = vadd.f32 %v4474_v7, %v4348_v21  ;;  %v5210_v25 = vpack.c.bf16 %v2769_v22, %v2766_v12  ;;  %v4214_v26 = vadd.f32 %v4213_v20, %v2769_v22  ;;  %v4349_v27 = vmul.f32 %v2769_v22, %v2769_v22  ;;  %2980 = vmatmul.mubr.bf16.gmra.mrb[168].mxu0 %v5934_v15 }
 0x193   :  { %2442 = vmatprep.mubr.bf16.mxu1 %v5935_v18  ;;  %2987 = vmatprep.mubr.bf16.mxu0 %v5937_v19  ;;  %v5955_v18 = vld [vmem:[%s7181_s0 + $0x5cc] ss:$16 sps:$4 sm:$0xff]  }
 0x194   :  { %5466 = vst [vmem:[%s7182_s2 + $0x78] sm:$0xff] %v5210_v25   ;;  %v4476_v28 = vadd.f32 %v4475_v24, %v4349_v27  ;;  %v2228_v29 = vpop.f32.mrb[64].mxu1 }
 0x195   :  { %v2773_v30 = vpop.f32.mrb[64].mxu0  ;;  %v2230_v31 = vpop.f32.mrb[65].mxu1 }
 0x196   :  { %v2774_v33 = vadd.f32 %v2773_v30, %v2228_v29  ;;  %v2775_v34 = vpop.f32.mrb[65].mxu0  ;;  %v2231_v35 = vpop.f32.mrb[66].mxu1  ;;  %v5957_v31 = vld [vmem:[%s7181_s0 + $0x5c0] ss:$16 sps:$4 sm:$0xff]  }
 0x197   :  { %v2776_v37 = vpop.f32.mrb[66].mxu0  ;;  %v2233_v38 = vpop.f32.mrb[67].mxu1 }
 0x198   :  { %v4215_v41 = vadd.f32 %v4214_v26, %v2774_v33  ;;  %v4350_v42 = vmul.f32 %v2774_v33, %v2774_v33  ;;  %v2777_v43 = vadd.f32 %v2776_v37, %v2231_v35  ;;  %v2778_v44 = vpop.f32.mrb[67].mxu0  ;;  %v5958_v35 = vld [vmem:[%s7181_s0 + $0x5c8] ss:$16 sps:$4 sm:$0xff]   ;;  %v5959_v38 = vld [vmem:[%s7181_s0 + $0x5e4] ss:$16 sps:$4 sm:$0xff]  }
 0x199   :  { %2443 = vmatmul.mubr.bf16.gmra.mrb[172].mxu1 %v5939_v32 }
 0x19a   :  { %v4477_v45 = vadd.f32 %v4476_v28, %v4350_v42  ;;  %v5215_v46 = vpack.c.bf16 %v2777_v43, %v2774_v33  ;;  %v4216_v47 = vadd.f32 %v4215_v41, %v2777_v43  ;;  %v4351_v48 = vmul.f32 %v2777_v43, %v2777_v43  ;;  %2988 = vmatmul.mubr.bf16.gmra.mrb[172].mxu0 %v5940_v36 }
 0x19b   :  { %2450 = vmatprep.mubr.bf16.mxu1 %v5941_v39  ;;  %2995 = vmatprep.mubr.bf16.mxu0 %v5943_v40  ;;  %v5961_v39 = vld [vmem:[%s7181_s0 + $0x5ec] ss:$16 sps:$4 sm:$0xff]  }
 0x19c   :  { %5467 = vst [vmem:[%s7182_s2 + $0x80] sm:$0xff] %v5215_v46   ;;  %v4478_v49 = vadd.f32 %v4477_v45, %v4351_v48  ;;  %v2236_v50 = vpop.f32.mrb[68].mxu1 }
 0x19d   :  { %v2781_v51 = vpop.f32.mrb[68].mxu0  ;;  %v2238_v52 = vpop.f32.mrb[69].mxu1 }
 0x19e   :  { %v2782_v54 = vadd.f32 %v2781_v51, %v2236_v50  ;;  %v2783_v55 = vpop.f32.mrb[69].mxu0  ;;  %v2239_v56 = vpop.f32.mrb[70].mxu1  ;;  %v5963_v52 = vld [vmem:[%s7181_s0 + $0x5e0] ss:$16 sps:$4 sm:$0xff]  }
 0x19f   :  { %v2784_v58 = vpop.f32.mrb[70].mxu0  ;;  %v2241_v59 = vpop.f32.mrb[71].mxu1 }
 0x1a0   :  { %v4217_v62 = vadd.f32 %v4216_v47, %v2782_v54  ;;  %v4352_v63 = vmul.f32 %v2782_v54, %v2782_v54  ;;  %v2785_v0 = vadd.f32 %v2784_v58, %v2239_v56  ;;  %v2786_v1 = vpop.f32.mrb[71].mxu0  ;;  %v5964_v56 = vld [vmem:[%s7181_s0 + $0x5e8] ss:$16 sps:$4 sm:$0xff]   ;;  %v5965_v59 = vld [vmem:[%s7181_s0 + $0x604] ss:$16 sps:$4 sm:$0xff]  }
 0x1a1   :  { %2451 = vmatmul.mubr.bf16.gmra.mrb[176].mxu1 %v5945_v53 }
 0x1a2   :  { %v4479_v2 = vadd.f32 %v4478_v49, %v4352_v63  ;;  %v5220_v3 = vpack.c.bf16 %v2785_v0, %v2782_v54  ;;  %v4218_v4 = vadd.f32 %v4217_v62, %v2785_v0  ;;  %v4353_v5 = vmul.f32 %v2785_v0, %v2785_v0  ;;  %2996 = vmatmul.mubr.bf16.gmra.mrb[176].mxu0 %v5946_v57 }
 0x1a3   :  { %2458 = vmatprep.mubr.bf16.mxu1 %v5947_v60  ;;  %3003 = vmatprep.mubr.bf16.mxu0 %v5949_v61  ;;  %v5967_v60 = vld [vmem:[%s7181_s0 + $0x60c] ss:$16 sps:$4 sm:$0xff]  }
 0x1a4   :  { %5468 = vst [vmem:[%s7182_s2 + $0x88] sm:$0xff] %v5220_v3   ;;  %v4480_v6 = vadd.f32 %v4479_v2, %v4353_v5  ;;  %v2244_v7 = vpop.f32.mrb[72].mxu1 }
 0x1a5   :  { %v2789_v8 = vpop.f32.mrb[72].mxu0  ;;  %v2246_v9 = vpop.f32.mrb[73].mxu1 }
 0x1a6   :  { %v2790_v11 = vadd.f32 %v2789_v8, %v2244_v7  ;;  %v2791_v12 = vpop.f32.mrb[73].mxu0  ;;  %v2247_v13 = vpop.f32.mrb[74].mxu1  ;;  %v5969_v9 = vld [vmem:[%s7181_s0 + $0x600] ss:$16 sps:$4 sm:$0xff]  }
 0x1a7   :  { %v2792_v15 = vpop.f32.mrb[74].mxu0  ;;  %v2249_v16 = vpop.f32.mrb[75].mxu1 }
 0x1a8   :  { %v4219_v19 = vadd.f32 %v4218_v4, %v2790_v11  ;;  %v4354_v20 = vmul.f32 %v2790_v11, %v2790_v11  ;;  %v2793_v21 = vadd.f32 %v2792_v15, %v2247_v13  ;;  %v2794_v22 = vpop.f32.mrb[75].mxu0  ;;  %v5970_v13 = vld [vmem:[%s7181_s0 + $0x608] ss:$16 sps:$4 sm:$0xff]   ;;  %v5971_v16 = vld [vmem:[%s7181_s0 + $0x624] ss:$16 sps:$4 sm:$0xff]  }
 0x1a9   :  { %2459 = vmatmul.mubr.bf16.gmra.mrb[180].mxu1 %v5951_v10 }
 0x1aa   :  { %v4481_v23 = vadd.f32 %v4480_v6, %v4354_v20  ;;  %v5225_v24 = vpack.c.bf16 %v2793_v21, %v2790_v11  ;;  %v4220_v25 = vadd.f32 %v4219_v19, %v2793_v21  ;;  %v4355_v26 = vmul.f32 %v2793_v21, %v2793_v21  ;;  %3004 = vmatmul.mubr.bf16.gmra.mrb[180].mxu0 %v5952_v14 }
 0x1ab   :  { %2466 = vmatprep.mubr.bf16.mxu1 %v5953_v17  ;;  %3011 = vmatprep.mubr.bf16.mxu0 %v5955_v18  ;;  %v5973_v17 = vld [vmem:[%s7181_s0 + $0x62c] ss:$16 sps:$4 sm:$0xff]  }
 0x1ac   :  { %5469 = vst [vmem:[%s7182_s2 + $0x90] sm:$0xff] %v5225_v24   ;;  %v4482_v27 = vadd.f32 %v4481_v23, %v4355_v26  ;;  %v2252_v28 = vpop.f32.mrb[76].mxu1 }
 0x1ad   :  { %v2797_v29 = vpop.f32.mrb[76].mxu0  ;;  %v2254_v30 = vpop.f32.mrb[77].mxu1 }
 0x1ae   :  { %v2798_v32 = vadd.f32 %v2797_v29, %v2252_v28  ;;  %v2799_v33 = vpop.f32.mrb[77].mxu0  ;;  %v2255_v34 = vpop.f32.mrb[78].mxu1  ;;  %v5975_v30 = vld [vmem:[%s7181_s0 + $0x620] ss:$16 sps:$4 sm:$0xff]  }
 0x1af   :  { %v2800_v36 = vpop.f32.mrb[78].mxu0  ;;  %v2257_v37 = vpop.f32.mrb[79].mxu1 }
 0x1b0   :  { %v4221_v40 = vadd.f32 %v4220_v25, %v2798_v32  ;;  %v4356_v41 = vmul.f32 %v2798_v32, %v2798_v32  ;;  %v2801_v42 = vadd.f32 %v2800_v36, %v2255_v34  ;;  %v2802_v43 = vpop.f32.mrb[79].mxu0  ;;  %v5976_v34 = vld [vmem:[%s7181_s0 + $0x628] ss:$16 sps:$4 sm:$0xff]   ;;  %v5977_v37 = vld [vmem:[%s7181_s0 + $0x644] ss:$16 sps:$4 sm:$0xff]  }
 0x1b1   :  { %2467 = vmatmul.mubr.bf16.gmra.mrb[184].mxu1 %v5957_v31 }
 0x1b2   :  { %v4483_v44 = vadd.f32 %v4482_v27, %v4356_v41  ;;  %v5230_v45 = vpack.c.bf16 %v2801_v42, %v2798_v32  ;;  %v4222_v46 = vadd.f32 %v4221_v40, %v2801_v42  ;;  %v4357_v47 = vmul.f32 %v2801_v42, %v2801_v42  ;;  %3012 = vmatmul.mubr.bf16.gmra.mrb[184].mxu0 %v5958_v35 }
 0x1b3   :  { %2474 = vmatprep.mubr.bf16.mxu1 %v5959_v38  ;;  %3019 = vmatprep.mubr.bf16.mxu0 %v5961_v39  ;;  %v5979_v38 = vld [vmem:[%s7181_s0 + $0x64c] ss:$16 sps:$4 sm:$0xff]  }
 0x1b4   :  { %5470 = vst [vmem:[%s7182_s2 + $0x98] sm:$0xff] %v5230_v45   ;;  %v4484_v48 = vadd.f32 %v4483_v44, %v4357_v47  ;;  %v2260_v49 = vpop.f32.mrb[80].mxu1 }
 0x1b5   :  { %v2805_v50 = vpop.f32.mrb[80].mxu0  ;;  %v2262_v51 = vpop.f32.mrb[81].mxu1 }
 0x1b6   :  { %v2806_v53 = vadd.f32 %v2805_v50, %v2260_v49  ;;  %v2807_v54 = vpop.f32.mrb[81].mxu0  ;;  %v2263_v55 = vpop.f32.mrb[82].mxu1  ;;  %v5981_v51 = vld [vmem:[%s7181_s0 + $0x640] ss:$16 sps:$4 sm:$0xff]  }
 0x1b7   :  { %v2808_v57 = vpop.f32.mrb[82].mxu0  ;;  %v2265_v58 = vpop.f32.mrb[83].mxu1 }
 0x1b8   :  { %v4223_v61 = vadd.f32 %v4222_v46, %v2806_v53  ;;  %v4358_v62 = vmul.f32 %v2806_v53, %v2806_v53  ;;  %v2809_v63 = vadd.f32 %v2808_v57, %v2263_v55  ;;  %v2810_v0 = vpop.f32.mrb[83].mxu0  ;;  %v5982_v55 = vld [vmem:[%s7181_s0 + $0x648] ss:$16 sps:$4 sm:$0xff]   ;;  %v5983_v58 = vld [vmem:[%s7181_s0 + $0x664] ss:$16 sps:$4 sm:$0xff]  }
 0x1b9   :  { %2475 = vmatmul.mubr.bf16.gmra.mrb[188].mxu1 %v5963_v52 }
 0x1ba   :  { %v4485_v1 = vadd.f32 %v4484_v48, %v4358_v62  ;;  %v5235_v2 = vpack.c.bf16 %v2809_v63, %v2806_v53  ;;  %v4224_v3 = vadd.f32 %v4223_v61, %v2809_v63  ;;  %v4359_v4 = vmul.f32 %v2809_v63, %v2809_v63  ;;  %3020 = vmatmul.mubr.bf16.gmra.mrb[188].mxu0 %v5964_v56 }
 0x1bb   :  { %2482 = vmatprep.mubr.bf16.mxu1 %v5965_v59  ;;  %3027 = vmatprep.mubr.bf16.mxu0 %v5967_v60  ;;  %v5985_v59 = vld [vmem:[%s7181_s0 + $0x66c] ss:$16 sps:$4 sm:$0xff]  }
 0x1bc   :  { %5471 = vst [vmem:[%s7182_s2 + $0xa0] sm:$0xff] %v5235_v2   ;;  %v4486_v5 = vadd.f32 %v4485_v1, %v4359_v4  ;;  %v2268_v6 = vpop.f32.mrb[84].mxu1 }
 0x1bd   :  { %v2813_v7 = vpop.f32.mrb[84].mxu0  ;;  %v2270_v8 = vpop.f32.mrb[85].mxu1 }
 0x1be   :  { %v2814_v10 = vadd.f32 %v2813_v7, %v2268_v6  ;;  %v2815_v11 = vpop.f32.mrb[85].mxu0  ;;  %v2271_v12 = vpop.f32.mrb[86].mxu1  ;;  %v5987_v8 = vld [vmem:[%s7181_s0 + $0x660] ss:$16 sps:$4 sm:$0xff]  }
 0x1bf   :  { %v2816_v14 = vpop.f32.mrb[86].mxu0  ;;  %v2273_v15 = vpop.f32.mrb[87].mxu1 }
 0x1c0   :  { %v4225_v18 = vadd.f32 %v4224_v3, %v2814_v10  ;;  %v4360_v19 = vmul.f32 %v2814_v10, %v2814_v10  ;;  %v2817_v20 = vadd.f32 %v2816_v14, %v2271_v12  ;;  %v2818_v21 = vpop.f32.mrb[87].mxu0  ;;  %v5988_v12 = vld [vmem:[%s7181_s0 + $0x668] ss:$16 sps:$4 sm:$0xff]   ;;  %v5989_v15 = vld [vmem:[%s7181_s0 + $0x684] ss:$16 sps:$4 sm:$0xff]  }
 0x1c1   :  { %2483 = vmatmul.mubr.bf16.gmra.mrb[192].mxu1 %v5969_v9 }
 0x1c2   :  { %v4487_v22 = vadd.f32 %v4486_v5, %v4360_v19  ;;  %v5240_v23 = vpack.c.bf16 %v2817_v20, %v2814_v10  ;;  %v4226_v24 = vadd.f32 %v4225_v18, %v2817_v20  ;;  %v4361_v25 = vmul.f32 %v2817_v20, %v2817_v20  ;;  %3028 = vmatmul.mubr.bf16.gmra.mrb[192].mxu0 %v5970_v13 }
 0x1c3   :  { %2490 = vmatprep.mubr.bf16.mxu1 %v5971_v16  ;;  %3035 = vmatprep.mubr.bf16.mxu0 %v5973_v17  ;;  %v5991_v16 = vld [vmem:[%s7181_s0 + $0x68c] ss:$16 sps:$4 sm:$0xff]  }
 0x1c4   :  { %5472 = vst [vmem:[%s7182_s2 + $0xa8] sm:$0xff] %v5240_v23   ;;  %v4488_v26 = vadd.f32 %v4487_v22, %v4361_v25  ;;  %v2276_v27 = vpop.f32.mrb[88].mxu1 }
 0x1c5   :  { %v2821_v28 = vpop.f32.mrb[88].mxu0  ;;  %v2278_v29 = vpop.f32.mrb[89].mxu1 }
 0x1c6   :  { %v2822_v31 = vadd.f32 %v2821_v28, %v2276_v27  ;;  %v2823_v32 = vpop.f32.mrb[89].mxu0  ;;  %v2279_v33 = vpop.f32.mrb[90].mxu1  ;;  %v5993_v29 = vld [vmem:[%s7181_s0 + $0x680] ss:$16 sps:$4 sm:$0xff]  }
 0x1c7   :  { %v2824_v35 = vpop.f32.mrb[90].mxu0  ;;  %v2281_v36 = vpop.f32.mrb[91].mxu1 }
 0x1c8   :  { %v4227_v39 = vadd.f32 %v4226_v24, %v2822_v31  ;;  %v4362_v40 = vmul.f32 %v2822_v31, %v2822_v31  ;;  %v2825_v41 = vadd.f32 %v2824_v35, %v2279_v33  ;;  %v2826_v42 = vpop.f32.mrb[91].mxu0  ;;  %v5994_v33 = vld [vmem:[%s7181_s0 + $0x688] ss:$16 sps:$4 sm:$0xff]   ;;  %v5995_v36 = vld [vmem:[%s7181_s0 + $0x6a4] ss:$16 sps:$4 sm:$0xff]  }
 0x1c9   :  { %2491 = vmatmul.mubr.bf16.gmra.mrb[196].mxu1 %v5975_v30 }
 0x1ca   :  { %v4489_v43 = vadd.f32 %v4488_v26, %v4362_v40  ;;  %v5245_v44 = vpack.c.bf16 %v2825_v41, %v2822_v31  ;;  %v4228_v45 = vadd.f32 %v4227_v39, %v2825_v41  ;;  %v4363_v46 = vmul.f32 %v2825_v41, %v2825_v41  ;;  %3036 = vmatmul.mubr.bf16.gmra.mrb[196].mxu0 %v5976_v34 }
 0x1cb   :  { %2498 = vmatprep.mubr.bf16.mxu1 %v5977_v37  ;;  %3043 = vmatprep.mubr.bf16.mxu0 %v5979_v38  ;;  %v5997_v37 = vld [vmem:[%s7181_s0 + $0x6ac] ss:$16 sps:$4 sm:$0xff]  }
 0x1cc   :  { %5473 = vst [vmem:[%s7182_s2 + $0xb0] sm:$0xff] %v5245_v44   ;;  %v4490_v47 = vadd.f32 %v4489_v43, %v4363_v46  ;;  %v2284_v48 = vpop.f32.mrb[92].mxu1 }
 0x1cd   :  { %v2829_v49 = vpop.f32.mrb[92].mxu0  ;;  %v2286_v50 = vpop.f32.mrb[93].mxu1 }
 0x1ce   :  { %v2830_v52 = vadd.f32 %v2829_v49, %v2284_v48  ;;  %v2831_v53 = vpop.f32.mrb[93].mxu0  ;;  %v2287_v54 = vpop.f32.mrb[94].mxu1  ;;  %v5999_v50 = vld [vmem:[%s7181_s0 + $0x6a0] ss:$16 sps:$4 sm:$0xff]  }
 0x1cf   :  { %v2832_v56 = vpop.f32.mrb[94].mxu0  ;;  %v2289_v57 = vpop.f32.mrb[95].mxu1 }
 0x1d0   :  { %v4229_v60 = vadd.f32 %v4228_v45, %v2830_v52  ;;  %v4364_v61 = vmul.f32 %v2830_v52, %v2830_v52  ;;  %v2833_v62 = vadd.f32 %v2832_v56, %v2287_v54  ;;  %v2834_v63 = vpop.f32.mrb[95].mxu0  ;;  %v6000_v54 = vld [vmem:[%s7181_s0 + $0x6a8] ss:$16 sps:$4 sm:$0xff]   ;;  %v6001_v57 = vld [vmem:[%s7181_s0 + $0x6c4] ss:$16 sps:$4 sm:$0xff]  }
 0x1d1   :  { %2499 = vmatmul.mubr.bf16.gmra.mrb[200].mxu1 %v5981_v51 }
 0x1d2   :  { %v4491_v0 = vadd.f32 %v4490_v47, %v4364_v61  ;;  %v5250_v1 = vpack.c.bf16 %v2833_v62, %v2830_v52  ;;  %v4230_v2 = vadd.f32 %v4229_v60, %v2833_v62  ;;  %v4365_v3 = vmul.f32 %v2833_v62, %v2833_v62  ;;  %3044 = vmatmul.mubr.bf16.gmra.mrb[200].mxu0 %v5982_v55 }
 0x1d3   :  { %2506 = vmatprep.mubr.bf16.mxu1 %v5983_v58  ;;  %3051 = vmatprep.mubr.bf16.mxu0 %v5985_v59  ;;  %v6003_v58 = vld [vmem:[%s7181_s0 + $0x6cc] ss:$16 sps:$4 sm:$0xff]  }
 0x1d4   :  { %5474 = vst [vmem:[%s7182_s2 + $0xb8] sm:$0xff] %v5250_v1   ;;  %v4492_v4 = vadd.f32 %v4491_v0, %v4365_v3  ;;  %v2292_v5 = vpop.f32.mrb[96].mxu1 }
 0x1d5   :  { %v2837_v6 = vpop.f32.mrb[96].mxu0  ;;  %v2294_v7 = vpop.f32.mrb[97].mxu1 }
 0x1d6   :  { %v2838_v9 = vadd.f32 %v2837_v6, %v2292_v5  ;;  %v2839_v10 = vpop.f32.mrb[97].mxu0  ;;  %v2295_v11 = vpop.f32.mrb[98].mxu1  ;;  %v6005_v7 = vld [vmem:[%s7181_s0 + $0x6c0] ss:$16 sps:$4 sm:$0xff]  }
 0x1d7   :  { %v2840_v13 = vpop.f32.mrb[98].mxu0  ;;  %v2297_v14 = vpop.f32.mrb[99].mxu1 }
 0x1d8   :  { %v4231_v17 = vadd.f32 %v4230_v2, %v2838_v9  ;;  %v4366_v18 = vmul.f32 %v2838_v9, %v2838_v9  ;;  %v2841_v19 = vadd.f32 %v2840_v13, %v2295_v11  ;;  %v2842_v20 = vpop.f32.mrb[99].mxu0  ;;  %v6006_v11 = vld [vmem:[%s7181_s0 + $0x6c8] ss:$16 sps:$4 sm:$0xff]   ;;  %v6007_v14 = vld [vmem:[%s7181_s0 + $0x6e4] ss:$16 sps:$4 sm:$0xff]  }
 0x1d9   :  { %2507 = vmatmul.mubr.bf16.gmra.mrb[204].mxu1 %v5987_v8 }
 0x1da   :  { %v4493_v21 = vadd.f32 %v4492_v4, %v4366_v18  ;;  %v5255_v22 = vpack.c.bf16 %v2841_v19, %v2838_v9  ;;  %v4232_v23 = vadd.f32 %v4231_v17, %v2841_v19  ;;  %v4367_v24 = vmul.f32 %v2841_v19, %v2841_v19  ;;  %3052 = vmatmul.mubr.bf16.gmra.mrb[204].mxu0 %v5988_v12 }
 0x1db   :  { %2514 = vmatprep.mubr.bf16.mxu1 %v5989_v15  ;;  %3059 = vmatprep.mubr.bf16.mxu0 %v5991_v16  ;;  %v6009_v15 = vld [vmem:[%s7181_s0 + $0x6ec] ss:$16 sps:$4 sm:$0xff]  }
 0x1dc   :  { %5475 = vst [vmem:[%s7182_s2 + $0xc0] sm:$0xff] %v5255_v22   ;;  %v4494_v25 = vadd.f32 %v4493_v21, %v4367_v24  ;;  %v2300_v26 = vpop.f32.mrb[100].mxu1 }
 0x1dd   :  { %v2845_v27 = vpop.f32.mrb[100].mxu0  ;;  %v2302_v28 = vpop.f32.mrb[101].mxu1 }
 0x1de   :  { %v2846_v30 = vadd.f32 %v2845_v27, %v2300_v26  ;;  %v2847_v31 = vpop.f32.mrb[101].mxu0  ;;  %v2303_v32 = vpop.f32.mrb[102].mxu1  ;;  %v6011_v28 = vld [vmem:[%s7181_s0 + $0x6e0] ss:$16 sps:$4 sm:$0xff]  }
 0x1df   :  { %v2848_v34 = vpop.f32.mrb[102].mxu0  ;;  %v2305_v35 = vpop.f32.mrb[103].mxu1 }
 0x1e0   :  { %v4233_v38 = vadd.f32 %v4232_v23, %v2846_v30  ;;  %v4368_v39 = vmul.f32 %v2846_v30, %v2846_v30  ;;  %v2849_v40 = vadd.f32 %v2848_v34, %v2303_v32  ;;  %v2850_v41 = vpop.f32.mrb[103].mxu0  ;;  %v6012_v32 = vld [vmem:[%s7181_s0 + $0x6e8] ss:$16 sps:$4 sm:$0xff]   ;;  %v6013_v35 = vld [vmem:[%s7181_s0 + $0x704] ss:$16 sps:$4 sm:$0xff]  }
 0x1e1   :  { %2515 = vmatmul.mubr.bf16.gmra.mrb[208].mxu1 %v5993_v29 }
 0x1e2   :  { %v4495_v42 = vadd.f32 %v4494_v25, %v4368_v39  ;;  %v5260_v43 = vpack.c.bf16 %v2849_v40, %v2846_v30  ;;  %v4234_v44 = vadd.f32 %v4233_v38, %v2849_v40  ;;  %v4369_v45 = vmul.f32 %v2849_v40, %v2849_v40  ;;  %3060 = vmatmul.mubr.bf16.gmra.mrb[208].mxu0 %v5994_v33 }
 0x1e3   :  { %2522 = vmatprep.mubr.bf16.mxu1 %v5995_v36  ;;  %3067 = vmatprep.mubr.bf16.mxu0 %v5997_v37  ;;  %v6015_v36 = vld [vmem:[%s7181_s0 + $0x70c] ss:$16 sps:$4 sm:$0xff]  }
 0x1e4   :  { %5476 = vst [vmem:[%s7182_s2 + $0xc8] sm:$0xff] %v5260_v43   ;;  %v4496_v46 = vadd.f32 %v4495_v42, %v4369_v45  ;;  %v2308_v47 = vpop.f32.mrb[104].mxu1 }
 0x1e5   :  { %v2853_v48 = vpop.f32.mrb[104].mxu0  ;;  %v2310_v49 = vpop.f32.mrb[105].mxu1 }
 0x1e6   :  { %v2854_v51 = vadd.f32 %v2853_v48, %v2308_v47  ;;  %v2855_v52 = vpop.f32.mrb[105].mxu0  ;;  %v2311_v53 = vpop.f32.mrb[106].mxu1  ;;  %v6017_v49 = vld [vmem:[%s7181_s0 + $0x700] ss:$16 sps:$4 sm:$0xff]  }
 0x1e7   :  { %v2856_v55 = vpop.f32.mrb[106].mxu0  ;;  %v2313_v56 = vpop.f32.mrb[107].mxu1 }
 0x1e8   :  { %v4235_v59 = vadd.f32 %v4234_v44, %v2854_v51  ;;  %v4370_v60 = vmul.f32 %v2854_v51, %v2854_v51  ;;  %v2857_v61 = vadd.f32 %v2856_v55, %v2311_v53  ;;  %v2858_v62 = vpop.f32.mrb[107].mxu0  ;;  %v6018_v53 = vld [vmem:[%s7181_s0 + $0x708] ss:$16 sps:$4 sm:$0xff]   ;;  %v6019_v56 = vld [vmem:[%s7181_s0 + $0x724] ss:$16 sps:$4 sm:$0xff]  }
 0x1e9   :  { %2523 = vmatmul.mubr.bf16.gmra.mrb[212].mxu1 %v5999_v50 }
 0x1ea   :  { %v4497_v63 = vadd.f32 %v4496_v46, %v4370_v60  ;;  %v5265_v0 = vpack.c.bf16 %v2857_v61, %v2854_v51  ;;  %v4236_v1 = vadd.f32 %v4235_v59, %v2857_v61  ;;  %v4371_v2 = vmul.f32 %v2857_v61, %v2857_v61  ;;  %3068 = vmatmul.mubr.bf16.gmra.mrb[212].mxu0 %v6000_v54 }
 0x1eb   :  { %2530 = vmatprep.mubr.bf16.mxu1 %v6001_v57  ;;  %3075 = vmatprep.mubr.bf16.mxu0 %v6003_v58  ;;  %v6021_v57 = vld [vmem:[%s7181_s0 + $0x72c] ss:$16 sps:$4 sm:$0xff]  }
 0x1ec   :  { %5477 = vst [vmem:[%s7182_s2 + $0xd0] sm:$0xff] %v5265_v0   ;;  %v4498_v3 = vadd.f32 %v4497_v63, %v4371_v2  ;;  %v2316_v4 = vpop.f32.mrb[108].mxu1 }
 0x1ed   :  { %v2861_v5 = vpop.f32.mrb[108].mxu0  ;;  %v2318_v6 = vpop.f32.mrb[109].mxu1 }
 0x1ee   :  { %v2862_v8 = vadd.f32 %v2861_v5, %v2316_v4  ;;  %v2863_v9 = vpop.f32.mrb[109].mxu0  ;;  %v2319_v10 = vpop.f32.mrb[110].mxu1  ;;  %v6023_v6 = vld [vmem:[%s7181_s0 + $0x720] ss:$16 sps:$4 sm:$0xff]  }
 0x1ef   :  { %v2864_v12 = vpop.f32.mrb[110].mxu0  ;;  %v2321_v13 = vpop.f32.mrb[111].mxu1 }
 0x1f0   :  { %v4237_v16 = vadd.f32 %v4236_v1, %v2862_v8  ;;  %v4372_v17 = vmul.f32 %v2862_v8, %v2862_v8  ;;  %v2865_v18 = vadd.f32 %v2864_v12, %v2319_v10  ;;  %v2866_v19 = vpop.f32.mrb[111].mxu0  ;;  %v6024_v10 = vld [vmem:[%s7181_s0 + $0x728] ss:$16 sps:$4 sm:$0xff]   ;;  %v6025_v13 = vld [vmem:[%s7181_s0 + $0x744] ss:$16 sps:$4 sm:$0xff]  }
 0x1f1   :  { %2531 = vmatmul.mubr.bf16.gmra.mrb[216].mxu1 %v6005_v7 }
 0x1f2   :  { %v4499_v20 = vadd.f32 %v4498_v3, %v4372_v17  ;;  %v5270_v21 = vpack.c.bf16 %v2865_v18, %v2862_v8  ;;  %v4238_v22 = vadd.f32 %v4237_v16, %v2865_v18  ;;  %v4373_v23 = vmul.f32 %v2865_v18, %v2865_v18  ;;  %3076 = vmatmul.mubr.bf16.gmra.mrb[216].mxu0 %v6006_v11 }
 0x1f3   :  { %2538 = vmatprep.mubr.bf16.mxu1 %v6007_v14  ;;  %3083 = vmatprep.mubr.bf16.mxu0 %v6009_v15  ;;  %v6027_v14 = vld [vmem:[%s7181_s0 + $0x74c] ss:$16 sps:$4 sm:$0xff]  }
 0x1f4   :  { %5478 = vst [vmem:[%s7182_s2 + $0xd8] sm:$0xff] %v5270_v21   ;;  %v4500_v24 = vadd.f32 %v4499_v20, %v4373_v23  ;;  %v2324_v25 = vpop.f32.mrb[112].mxu1 }
 0x1f5   :  { %v2869_v26 = vpop.f32.mrb[112].mxu0  ;;  %v2326_v27 = vpop.f32.mrb[113].mxu1 }
 0x1f6   :  { %v2870_v29 = vadd.f32 %v2869_v26, %v2324_v25  ;;  %v2871_v30 = vpop.f32.mrb[113].mxu0  ;;  %v2327_v31 = vpop.f32.mrb[114].mxu1  ;;  %v6029_v27 = vld [vmem:[%s7181_s0 + $0x740] ss:$16 sps:$4 sm:$0xff]  }
 0x1f7   :  { %v2872_v33 = vpop.f32.mrb[114].mxu0  ;;  %v2329_v34 = vpop.f32.mrb[115].mxu1 }
 0x1f8   :  { %v4239_v37 = vadd.f32 %v4238_v22, %v2870_v29  ;;  %v4374_v38 = vmul.f32 %v2870_v29, %v2870_v29  ;;  %v2873_v39 = vadd.f32 %v2872_v33, %v2327_v31  ;;  %v2874_v40 = vpop.f32.mrb[115].mxu0  ;;  %v6030_v31 = vld [vmem:[%s7181_s0 + $0x748] ss:$16 sps:$4 sm:$0xff]   ;;  %v6031_v34 = vld [vmem:[%s7181_s0 + $0x764] ss:$16 sps:$4 sm:$0xff]  }
 0x1f9   :  { %2539 = vmatmul.mubr.bf16.gmra.mrb[220].mxu1 %v6011_v28 }
 0x1fa   :  { %v4501_v41 = vadd.f32 %v4500_v24, %v4374_v38  ;;  %v5275_v42 = vpack.c.bf16 %v2873_v39, %v2870_v29  ;;  %v4240_v43 = vadd.f32 %v4239_v37, %v2873_v39  ;;  %v4375_v44 = vmul.f32 %v2873_v39, %v2873_v39  ;;  %3084 = vmatmul.mubr.bf16.gmra.mrb[220].mxu0 %v6012_v32 }
 0x1fb   :  { %2546 = vmatprep.mubr.bf16.mxu1 %v6013_v35  ;;  %3091 = vmatprep.mubr.bf16.mxu0 %v6015_v36  ;;  %v6033_v35 = vld [vmem:[%s7181_s0 + $0x76c] ss:$16 sps:$4 sm:$0xff]  }
 0x1fc   :  { %5479 = vst [vmem:[%s7182_s2 + $0xe0] sm:$0xff] %v5275_v42   ;;  %v4502_v45 = vadd.f32 %v4501_v41, %v4375_v44  ;;  %v2332_v46 = vpop.f32.mrb[116].mxu1 }
 0x1fd   :  { %v2877_v47 = vpop.f32.mrb[116].mxu0  ;;  %v2334_v48 = vpop.f32.mrb[117].mxu1 }
 0x1fe   :  { %v2878_v50 = vadd.f32 %v2877_v47, %v2332_v46  ;;  %v2879_v51 = vpop.f32.mrb[117].mxu0  ;;  %v2335_v52 = vpop.f32.mrb[118].mxu1  ;;  %v6035_v48 = vld [vmem:[%s7181_s0 + $0x760] ss:$16 sps:$4 sm:$0xff]  }
 0x1ff   :  { %v2880_v54 = vpop.f32.mrb[118].mxu0  ;;  %v2337_v55 = vpop.f32.mrb[119].mxu1 }
 0x200   :  { %v4241_v58 = vadd.f32 %v4240_v43, %v2878_v50  ;;  %v4376_v59 = vmul.f32 %v2878_v50, %v2878_v50  ;;  %v2881_v60 = vadd.f32 %v2880_v54, %v2335_v52  ;;  %v2882_v61 = vpop.f32.mrb[119].mxu0  ;;  %v6036_v52 = vld [vmem:[%s7181_s0 + $0x768] ss:$16 sps:$4 sm:$0xff]   ;;  %v6037_v55 = vld [vmem:[%s7181_s0 + $0x784] ss:$16 sps:$4 sm:$0xff]  }
 0x201   :  { %2547 = vmatmul.mubr.bf16.gmra.mrb[224].mxu1 %v6017_v49 }
 0x202   :  { %v4503_v62 = vadd.f32 %v4502_v45, %v4376_v59  ;;  %v5280_v63 = vpack.c.bf16 %v2881_v60, %v2878_v50  ;;  %v4242_v0 = vadd.f32 %v4241_v58, %v2881_v60  ;;  %v4377_v1 = vmul.f32 %v2881_v60, %v2881_v60  ;;  %3092 = vmatmul.mubr.bf16.gmra.mrb[224].mxu0 %v6018_v53 }
 0x203   :  { %2554 = vmatprep.mubr.bf16.mxu1 %v6019_v56  ;;  %3099 = vmatprep.mubr.bf16.mxu0 %v6021_v57  ;;  %v6039_v56 = vld [vmem:[%s7181_s0 + $0x78c] ss:$16 sps:$4 sm:$0xff]  }
 0x204   :  { %5480 = vst [vmem:[%s7182_s2 + $0xe8] sm:$0xff] %v5280_v63   ;;  %v4504_v2 = vadd.f32 %v4503_v62, %v4377_v1  ;;  %v2340_v3 = vpop.f32.mrb[120].mxu1 }
 0x205   :  { %v2885_v4 = vpop.f32.mrb[120].mxu0  ;;  %v2342_v5 = vpop.f32.mrb[121].mxu1 }
 0x206   :  { %v2886_v7 = vadd.f32 %v2885_v4, %v2340_v3  ;;  %v2887_v8 = vpop.f32.mrb[121].mxu0  ;;  %v2343_v9 = vpop.f32.mrb[122].mxu1  ;;  %v6041_v5 = vld [vmem:[%s7181_s0 + $0x780] ss:$16 sps:$4 sm:$0xff]  }
 0x207   :  { %v2888_v11 = vpop.f32.mrb[122].mxu0  ;;  %v2345_v12 = vpop.f32.mrb[123].mxu1 }
 0x208   :  { %v4243_v15 = vadd.f32 %v4242_v0, %v2886_v7  ;;  %v4378_v16 = vmul.f32 %v2886_v7, %v2886_v7  ;;  %v2889_v17 = vadd.f32 %v2888_v11, %v2343_v9  ;;  %v2890_v18 = vpop.f32.mrb[123].mxu0  ;;  %v6042_v9 = vld [vmem:[%s7181_s0 + $0x788] ss:$16 sps:$4 sm:$0xff]   ;;  %v6043_v12 = vld [vmem:[%s7181_s0 + $0x7a4] ss:$16 sps:$4 sm:$0xff]  }
 0x209   :  { %2555 = vmatmul.mubr.bf16.gmra.mrb[228].mxu1 %v6023_v6 }
 0x20a   :  { %v4505_v19 = vadd.f32 %v4504_v2, %v4378_v16  ;;  %v5285_v20 = vpack.c.bf16 %v2889_v17, %v2886_v7  ;;  %v4244_v21 = vadd.f32 %v4243_v15, %v2889_v17  ;;  %v4379_v22 = vmul.f32 %v2889_v17, %v2889_v17  ;;  %3100 = vmatmul.mubr.bf16.gmra.mrb[228].mxu0 %v6024_v10 }
 0x20b   :  { %2562 = vmatprep.mubr.bf16.mxu1 %v6025_v13  ;;  %3107 = vmatprep.mubr.bf16.mxu0 %v6027_v14  ;;  %v6045_v13 = vld [vmem:[%s7181_s0 + $0x7ac] ss:$16 sps:$4 sm:$0xff]  }
 0x20c   :  { %5481 = vst [vmem:[%s7182_s2 + $0xf0] sm:$0xff] %v5285_v20   ;;  %v4506_v23 = vadd.f32 %v4505_v19, %v4379_v22  ;;  %v2348_v24 = vpop.f32.mrb[124].mxu1 }
 0x20d   :  { %v2893_v25 = vpop.f32.mrb[124].mxu0  ;;  %v2350_v26 = vpop.f32.mrb[125].mxu1 }
 0x20e   :  { %v2894_v28 = vadd.f32 %v2893_v25, %v2348_v24  ;;  %v2895_v29 = vpop.f32.mrb[125].mxu0  ;;  %v2351_v30 = vpop.f32.mrb[126].mxu1  ;;  %v6047_v26 = vld [vmem:[%s7181_s0 + $0x7a0] ss:$16 sps:$4 sm:$0xff]  }
 0x20f   :  { %v2896_v32 = vpop.f32.mrb[126].mxu0  ;;  %v2353_v33 = vpop.f32.mrb[127].mxu1 }
 0x210   :  { %v4245_v36 = vadd.f32 %v4244_v21, %v2894_v28  ;;  %v4380_v37 = vmul.f32 %v2894_v28, %v2894_v28  ;;  %v2897_v38 = vadd.f32 %v2896_v32, %v2351_v30  ;;  %v2898_v39 = vpop.f32.mrb[127].mxu0  ;;  %v6048_v30 = vld [vmem:[%s7181_s0 + $0x7a8] ss:$16 sps:$4 sm:$0xff]   ;;  %v6049_v33 = vld [vmem:[%s7181_s0 + $0x7c4] ss:$16 sps:$4 sm:$0xff]  }
 0x211   :  { %2563 = vmatmul.mubr.bf16.gmra.mrb[232].mxu1 %v6029_v27 }
 0x212   :  { %v4507_v40 = vadd.f32 %v4506_v23, %v4380_v37  ;;  %v5290_v41 = vpack.c.bf16 %v2897_v38, %v2894_v28  ;;  %v4246_v42 = vadd.f32 %v4245_v36, %v2897_v38  ;;  %v4381_v43 = vmul.f32 %v2897_v38, %v2897_v38  ;;  %3108 = vmatmul.mubr.bf16.gmra.mrb[232].mxu0 %v6030_v31 }
 0x213   :  { %2570 = vmatprep.mubr.bf16.mxu1 %v6031_v34  ;;  %3115 = vmatprep.mubr.bf16.mxu0 %v6033_v35  ;;  %v6051_v34 = vld [vmem:[%s7181_s0 + $0x7cc] ss:$16 sps:$4 sm:$0xff]  }
 0x214   :  { %5482 = vst [vmem:[%s7182_s2 + $0xf8] sm:$0xff] %v5290_v41   ;;  %v4508_v44 = vadd.f32 %v4507_v40, %v4381_v43  ;;  %v2356_v45 = vpop.f32.mrb[128].mxu1 }
 0x215   :  { %v2901_v46 = vpop.f32.mrb[128].mxu0  ;;  %v2358_v47 = vpop.f32.mrb[129].mxu1 }
 0x216   :  { %v2902_v49 = vadd.f32 %v2901_v46, %v2356_v45  ;;  %v2903_v50 = vpop.f32.mrb[129].mxu0  ;;  %v2359_v51 = vpop.f32.mrb[130].mxu1  ;;  %v6053_v47 = vld [vmem:[%s7181_s0 + $0x7c0] ss:$16 sps:$4 sm:$0xff]  }
 0x217   :  { %v2904_v53 = vpop.f32.mrb[130].mxu0  ;;  %v2361_v54 = vpop.f32.mrb[131].mxu1 }
 0x218   :  { %v4247_v57 = vadd.f32 %v4246_v42, %v2902_v49  ;;  %v4382_v58 = vmul.f32 %v2902_v49, %v2902_v49  ;;  %v2905_v59 = vadd.f32 %v2904_v53, %v2359_v51  ;;  %v2906_v60 = vpop.f32.mrb[131].mxu0  ;;  %v6054_v51 = vld [vmem:[%s7181_s0 + $0x7c8] ss:$16 sps:$4 sm:$0xff]   ;;  %v6055_v54 = vld [vmem:[%s7181_s0 + $0x7e4] ss:$16 sps:$4 sm:$0xff]  }
 0x219   :  { %2571 = vmatmul.mubr.bf16.gmra.mrb[236].mxu1 %v6035_v48 }
 0x21a   :  { %v4509_v61 = vadd.f32 %v4508_v44, %v4382_v58  ;;  %v5295_v62 = vpack.c.bf16 %v2905_v59, %v2902_v49  ;;  %v4248_v63 = vadd.f32 %v4247_v57, %v2905_v59  ;;  %v4383_v0 = vmul.f32 %v2905_v59, %v2905_v59  ;;  %3116 = vmatmul.mubr.bf16.gmra.mrb[236].mxu0 %v6036_v52 }
 0x21b   :  { %2578 = vmatprep.mubr.bf16.mxu1 %v6037_v55  ;;  %3123 = vmatprep.mubr.bf16.mxu0 %v6039_v56  ;;  %v6057_v55 = vld [vmem:[%s7181_s0 + $0x7ec] ss:$16 sps:$4 sm:$0xff]  }
 0x21c   :  { %5483 = vst [vmem:[%s7182_s2 + $0x100] sm:$0xff] %v5295_v62   ;;  %v4510_v1 = vadd.f32 %v4509_v61, %v4383_v0  ;;  %v2364_v2 = vpop.f32.mrb[132].mxu1 }
 0x21d   :  { %v2909_v3 = vpop.f32.mrb[132].mxu0  ;;  %v2366_v4 = vpop.f32.mrb[133].mxu1 }
 0x21e   :  { %v2910_v6 = vadd.f32 %v2909_v3, %v2364_v2  ;;  %v2911_v7 = vpop.f32.mrb[133].mxu0  ;;  %v2367_v8 = vpop.f32.mrb[134].mxu1  ;;  %v6059_v4 = vld [vmem:[%s7181_s0 + $0x7e0] ss:$16 sps:$4 sm:$0xff]  }
 0x21f   :  { %v2912_v10 = vpop.f32.mrb[134].mxu0  ;;  %v2369_v11 = vpop.f32.mrb[135].mxu1 }
 0x220   :  { %v4249_v14 = vadd.f32 %v4248_v63, %v2910_v6  ;;  %v4384_v15 = vmul.f32 %v2910_v6, %v2910_v6  ;;  %v2913_v16 = vadd.f32 %v2912_v10, %v2367_v8  ;;  %v2914_v17 = vpop.f32.mrb[135].mxu0  ;;  %v6060_v8 = vld [vmem:[%s7181_s0 + $0x7e8] ss:$16 sps:$4 sm:$0xff]  }
 0x221   :  { %2579 = vmatmul.mubr.bf16.gmra.mrb[240].mxu1 %v6041_v5 }
 0x222   :  { %v4511_v18 = vadd.f32 %v4510_v1, %v4384_v15  ;;  %v5300_v19 = vpack.c.bf16 %v2913_v16, %v2910_v6  ;;  %v4250_v20 = vadd.f32 %v4249_v14, %v2913_v16  ;;  %v4385_v21 = vmul.f32 %v2913_v16, %v2913_v16  ;;  %3124 = vmatmul.mubr.bf16.gmra.mrb[240].mxu0 %v6042_v9 }
 0x223   :  { %2586 = vmatprep.mubr.bf16.mxu1 %v6043_v12  ;;  %3131 = vmatprep.mubr.bf16.mxu0 %v6045_v13 }
 0x224   :  { %5484 = vst [vmem:[%s7182_s2 + $0x108] sm:$0xff] %v5300_v19   ;;  %v4512_v22 = vadd.f32 %v4511_v18, %v4385_v21  ;;  %v2372_v23 = vpop.f32.mrb[136].mxu1 }
 0x225   :  { %v2917_v24 = vpop.f32.mrb[136].mxu0  ;;  %v2374_v25 = vpop.f32.mrb[137].mxu1 }
 0x226   :  { %v2918_v27 = vadd.f32 %v2917_v24, %v2372_v23  ;;  %v2919_v28 = vpop.f32.mrb[137].mxu0  ;;  %v2375_v29 = vpop.f32.mrb[138].mxu1 }
 0x227   :  { %v2920_v31 = vpop.f32.mrb[138].mxu0  ;;  %v2377_v32 = vpop.f32.mrb[139].mxu1 }
 0x228   :  { %v4251_v35 = vadd.f32 %v4250_v20, %v2918_v27  ;;  %v4386_v36 = vmul.f32 %v2918_v27, %v2918_v27  ;;  %v2921_v37 = vadd.f32 %v2920_v31, %v2375_v29  ;;  %v2922_v38 = vpop.f32.mrb[139].mxu0 }
 0x229   :  { %2587 = vmatmul.mubr.bf16.gmra.mrb[244].mxu1 %v6047_v26 }
 0x22a   :  { %v4513_v39 = vadd.f32 %v4512_v22, %v4386_v36  ;;  %v5305_v40 = vpack.c.bf16 %v2921_v37, %v2918_v27  ;;  %v4252_v41 = vadd.f32 %v4251_v35, %v2921_v37  ;;  %v4387_v42 = vmul.f32 %v2921_v37, %v2921_v37  ;;  %3132 = vmatmul.mubr.bf16.gmra.mrb[244].mxu0 %v6048_v30 }
 0x22b   :  { %2594 = vmatprep.mubr.bf16.mxu1 %v6049_v33  ;;  %3139 = vmatprep.mubr.bf16.mxu0 %v6051_v34 }
 0x22c   :  { %5485 = vst [vmem:[%s7182_s2 + $0x110] sm:$0xff] %v5305_v40   ;;  %v4514_v43 = vadd.f32 %v4513_v39, %v4387_v42  ;;  %v2380_v44 = vpop.f32.mrb[140].mxu1 }
 0x22d   :  { %v2925_v45 = vpop.f32.mrb[140].mxu0  ;;  %v2382_v46 = vpop.f32.mrb[141].mxu1 }
 0x22e   :  { %v2926_v48 = vadd.f32 %v2925_v45, %v2380_v44  ;;  %v2927_v49 = vpop.f32.mrb[141].mxu0  ;;  %v2383_v50 = vpop.f32.mrb[142].mxu1 }
 0x22f   :  { %v2928_v52 = vpop.f32.mrb[142].mxu0  ;;  %v2385_v53 = vpop.f32.mrb[143].mxu1 }
 0x230   :  { %v4253_v56 = vadd.f32 %v4252_v41, %v2926_v48  ;;  %v4388_v57 = vmul.f32 %v2926_v48, %v2926_v48  ;;  %v2929_v58 = vadd.f32 %v2928_v52, %v2383_v50  ;;  %v2930_v59 = vpop.f32.mrb[143].mxu0 }
 0x231   :  { %2595 = vmatmul.mubr.bf16.gmra.mrb[248].mxu1 %v6053_v47 }
 0x232   :  { %v4515_v60 = vadd.f32 %v4514_v43, %v4388_v57  ;;  %v5310_v61 = vpack.c.bf16 %v2929_v58, %v2926_v48  ;;  %v4254_v62 = vadd.f32 %v4253_v56, %v2929_v58  ;;  %v4389_v63 = vmul.f32 %v2929_v58, %v2929_v58  ;;  %3140 = vmatmul.mubr.bf16.gmra.mrb[248].mxu0 %v6054_v51 }
 0x233   :  { %2602 = vmatprep.mubr.bf16.mxu1 %v6055_v54  ;;  %3147 = vmatprep.mubr.bf16.mxu0 %v6057_v55 }
 0x234   :  { %5486 = vst [vmem:[%s7182_s2 + $0x118] sm:$0xff] %v5310_v61   ;;  %v4516_v0 = vadd.f32 %v4515_v60, %v4389_v63  ;;  %v2388_v1 = vpop.f32.mrb[144].mxu1 }
 0x235   :  { %v2933_v2 = vpop.f32.mrb[144].mxu0  ;;  %v2390_v3 = vpop.f32.mrb[145].mxu1 }
 0x236   :  { %v2934_v5 = vadd.f32 %v2933_v2, %v2388_v1  ;;  %v2935_v6 = vpop.f32.mrb[145].mxu0  ;;  %v2391_v7 = vpop.f32.mrb[146].mxu1 }
 0x237   :  { %v2936_v9 = vpop.f32.mrb[146].mxu0  ;;  %v2393_v10 = vpop.f32.mrb[147].mxu1 }
 0x238   :  { %v4255_v11 = vadd.f32 %v4254_v62, %v2934_v5  ;;  %v4390_v12 = vmul.f32 %v2934_v5, %v2934_v5  ;;  %v2937_v13 = vadd.f32 %v2936_v9, %v2391_v7  ;;  %v2938_v14 = vpop.f32.mrb[147].mxu0 }
 0x239   :  { %2603 = vmatmul.mubr.bf16.gmra.mrb[252].mxu1 %v6059_v4 }
 0x23a   :  { %v4517_v15 = vadd.f32 %v4516_v0, %v4390_v12  ;;  %v5315_v16 = vpack.c.bf16 %v2937_v13, %v2934_v5  ;;  %v4256_v17 = vadd.f32 %v4255_v11, %v2937_v13  ;;  %v4391_v18 = vmul.f32 %v2937_v13, %v2937_v13  ;;  %3148 = vmatmul.mubr.bf16.gmra.mrb[252].mxu0 %v6060_v8 }
 0x23c   :  { %5487 = vst [vmem:[%s7182_s2 + $0x120] sm:$0xff] %v5315_v16   ;;  %v4518_v19 = vadd.f32 %v4517_v15, %v4391_v18  ;;  %v2396_v20 = vpop.f32.mrb[148].mxu1 }
 0x23d   :  { %v2941_v21 = vpop.f32.mrb[148].mxu0  ;;  %v2398_v22 = vpop.f32.mrb[149].mxu1 }
 0x23e   :  { %v2942_v23 = vadd.f32 %v2941_v21, %v2396_v20  ;;  %v2943_v24 = vpop.f32.mrb[149].mxu0  ;;  %v2399_v25 = vpop.f32.mrb[150].mxu1 }
 0x23f   :  { %v2944_v26 = vpop.f32.mrb[150].mxu0  ;;  %v2401_v27 = vpop.f32.mrb[151].mxu1 }
 0x240   :  { %v4257_v28 = vadd.f32 %v4256_v17, %v2942_v23  ;;  %v4392_v29 = vmul.f32 %v2942_v23, %v2942_v23  ;;  %v2945_v30 = vadd.f32 %v2944_v26, %v2399_v25  ;;  %v2946_v31 = vpop.f32.mrb[151].mxu0 }
 0x242   :  { %v4519_v32 = vadd.f32 %v4518_v19, %v4392_v29  ;;  %v5320_v33 = vpack.c.bf16 %v2945_v30, %v2942_v23  ;;  %v4258_v34 = vadd.f32 %v4257_v28, %v2945_v30  ;;  %v4393_v35 = vmul.f32 %v2945_v30, %v2945_v30 }
 0x244   :  { %5488 = vst [vmem:[%s7182_s2 + $0x128] sm:$0xff] %v5320_v33   ;;  %v4520_v36 = vadd.f32 %v4519_v32, %v4393_v35  ;;  %v2404_v37 = vpop.f32.mrb[152].mxu1 }
 0x245   :  { %v2949_v38 = vpop.f32.mrb[152].mxu0  ;;  %v2406_v39 = vpop.f32.mrb[153].mxu1 }
 0x246   :  { %v2950_v40 = vadd.f32 %v2949_v38, %v2404_v37  ;;  %v2951_v41 = vpop.f32.mrb[153].mxu0  ;;  %v2407_v42 = vpop.f32.mrb[154].mxu1 }
 0x247   :  { %v2952_v43 = vpop.f32.mrb[154].mxu0  ;;  %v2409_v44 = vpop.f32.mrb[155].mxu1 }
 0x248   :  { %v4259_v45 = vadd.f32 %v4258_v34, %v2950_v40  ;;  %v4394_v46 = vmul.f32 %v2950_v40, %v2950_v40  ;;  %v2953_v47 = vadd.f32 %v2952_v43, %v2407_v42  ;;  %v2954_v48 = vpop.f32.mrb[155].mxu0 }
 0x24a   :  { %v4521_v49 = vadd.f32 %v4520_v36, %v4394_v46  ;;  %v5325_v50 = vpack.c.bf16 %v2953_v47, %v2950_v40  ;;  %v4260_v51 = vadd.f32 %v4259_v45, %v2953_v47  ;;  %v4395_v52 = vmul.f32 %v2953_v47, %v2953_v47 }
 0x24c   :  { %5489 = vst [vmem:[%s7182_s2 + $0x130] sm:$0xff] %v5325_v50   ;;  %v4522_v53 = vadd.f32 %v4521_v49, %v4395_v52  ;;  %v2412_v54 = vpop.f32.mrb[156].mxu1 }
 0x24d   :  { %v2957_v55 = vpop.f32.mrb[156].mxu0  ;;  %v2414_v56 = vpop.f32.mrb[157].mxu1 }
 0x24e   :  { %v2958_v57 = vadd.f32 %v2957_v55, %v2412_v54  ;;  %v2959_v58 = vpop.f32.mrb[157].mxu0  ;;  %v2415_v59 = vpop.f32.mrb[158].mxu1 }
 0x24f   :  { %v2960_v60 = vpop.f32.mrb[158].mxu0  ;;  %v2417_v61 = vpop.f32.mrb[159].mxu1 }
 0x250   :  { %v4261_v62 = vadd.f32 %v4260_v51, %v2958_v57  ;;  %v4396_v63 = vmul.f32 %v2958_v57, %v2958_v57  ;;  %v2961_v0 = vadd.f32 %v2960_v60, %v2415_v59  ;;  %v2962_v1 = vpop.f32.mrb[159].mxu0 }
 0x252   :  { %v4523_v2 = vadd.f32 %v4522_v53, %v4396_v63  ;;  %v5330_v3 = vpack.c.bf16 %v2961_v0, %v2958_v57  ;;  %v4262_v4 = vadd.f32 %v4261_v62, %v2961_v0  ;;  %v4397_v5 = vmul.f32 %v2961_v0, %v2961_v0 }
 0x254   :  { %5490 = vst [vmem:[%s7182_s2 + $0x138] sm:$0xff] %v5330_v3   ;;  %v4524_v6 = vadd.f32 %v4523_v2, %v4397_v5  ;;  %v2420_v7 = vpop.f32.mrb[160].mxu1 }
 0x255   :  { %v2965_v8 = vpop.f32.mrb[160].mxu0  ;;  %v2422_v9 = vpop.f32.mrb[161].mxu1 }
 0x256   :  { %v2966_v10 = vadd.f32 %v2965_v8, %v2420_v7  ;;  %v2967_v11 = vpop.f32.mrb[161].mxu0  ;;  %v2423_v12 = vpop.f32.mrb[162].mxu1 }
 0x257   :  { %v2968_v13 = vpop.f32.mrb[162].mxu0  ;;  %v2425_v14 = vpop.f32.mrb[163].mxu1 }
 0x258   :  { %v4263_v15 = vadd.f32 %v4262_v4, %v2966_v10  ;;  %v4398_v16 = vmul.f32 %v2966_v10, %v2966_v10  ;;  %v2969_v17 = vadd.f32 %v2968_v13, %v2423_v12  ;;  %v2970_v18 = vpop.f32.mrb[163].mxu0 }
 0x25a   :  { %v4525_v19 = vadd.f32 %v4524_v6, %v4398_v16  ;;  %v5335_v20 = vpack.c.bf16 %v2969_v17, %v2966_v10  ;;  %v4264_v21 = vadd.f32 %v4263_v15, %v2969_v17  ;;  %v4399_v22 = vmul.f32 %v2969_v17, %v2969_v17 }
 0x25c   :  { %5491 = vst [vmem:[%s7182_s2 + $0x140] sm:$0xff] %v5335_v20   ;;  %v4526_v23 = vadd.f32 %v4525_v19, %v4399_v22  ;;  %v2428_v24 = vpop.f32.mrb[164].mxu1 }
 0x25d   :  { %v2973_v25 = vpop.f32.mrb[164].mxu0  ;;  %v2430_v26 = vpop.f32.mrb[165].mxu1 }
 0x25e   :  { %v2974_v27 = vadd.f32 %v2973_v25, %v2428_v24  ;;  %v2975_v28 = vpop.f32.mrb[165].mxu0  ;;  %v2431_v29 = vpop.f32.mrb[166].mxu1 }
 0x25f   :  { %v2976_v30 = vpop.f32.mrb[166].mxu0  ;;  %v2433_v31 = vpop.f32.mrb[167].mxu1 }
 0x260   :  { %v4265_v32 = vadd.f32 %v4264_v21, %v2974_v27  ;;  %v4400_v33 = vmul.f32 %v2974_v27, %v2974_v27  ;;  %v2977_v34 = vadd.f32 %v2976_v30, %v2431_v29  ;;  %v2978_v35 = vpop.f32.mrb[167].mxu0 }
 0x262   :  { %v4527_v36 = vadd.f32 %v4526_v23, %v4400_v33  ;;  %v5340_v37 = vpack.c.bf16 %v2977_v34, %v2974_v27  ;;  %v4266_v38 = vadd.f32 %v4265_v32, %v2977_v34  ;;  %v4401_v39 = vmul.f32 %v2977_v34, %v2977_v34 }
 0x264   :  { %5492 = vst [vmem:[%s7182_s2 + $0x148] sm:$0xff] %v5340_v37   ;;  %v4528_v40 = vadd.f32 %v4527_v36, %v4401_v39  ;;  %v2436_v41 = vpop.f32.mrb[168].mxu1 }
 0x265   :  { %v2981_v42 = vpop.f32.mrb[168].mxu0  ;;  %v2438_v43 = vpop.f32.mrb[169].mxu1 }
 0x266   :  { %v2982_v44 = vadd.f32 %v2981_v42, %v2436_v41  ;;  %v2983_v45 = vpop.f32.mrb[169].mxu0  ;;  %v2439_v46 = vpop.f32.mrb[170].mxu1 }
 0x267   :  { %v2984_v47 = vpop.f32.mrb[170].mxu0  ;;  %v2441_v48 = vpop.f32.mrb[171].mxu1 }
 0x268   :  { %v4267_v49 = vadd.f32 %v4266_v38, %v2982_v44  ;;  %v4402_v50 = vmul.f32 %v2982_v44, %v2982_v44  ;;  %v2985_v51 = vadd.f32 %v2984_v47, %v2439_v46  ;;  %v2986_v52 = vpop.f32.mrb[171].mxu0 }
 0x26a   :  { %v4529_v53 = vadd.f32 %v4528_v40, %v4402_v50  ;;  %v5345_v54 = vpack.c.bf16 %v2985_v51, %v2982_v44  ;;  %v4268_v55 = vadd.f32 %v4267_v49, %v2985_v51  ;;  %v4403_v56 = vmul.f32 %v2985_v51, %v2985_v51 }
 0x26c   :  { %5493 = vst [vmem:[%s7182_s2 + $0x150] sm:$0xff] %v5345_v54   ;;  %v4530_v57 = vadd.f32 %v4529_v53, %v4403_v56  ;;  %v2444_v58 = vpop.f32.mrb[172].mxu1 }
 0x26d   :  { %v2989_v59 = vpop.f32.mrb[172].mxu0  ;;  %v2446_v60 = vpop.f32.mrb[173].mxu1 }
 0x26e   :  { %v2990_v61 = vadd.f32 %v2989_v59, %v2444_v58  ;;  %v2991_v62 = vpop.f32.mrb[173].mxu0  ;;  %v2447_v63 = vpop.f32.mrb[174].mxu1 }
 0x26f   :  { %v2992_v0 = vpop.f32.mrb[174].mxu0  ;;  %v2449_v1 = vpop.f32.mrb[175].mxu1 }
 0x270   :  { %v4269_v2 = vadd.f32 %v4268_v55, %v2990_v61  ;;  %v4404_v3 = vmul.f32 %v2990_v61, %v2990_v61  ;;  %v2993_v4 = vadd.f32 %v2992_v0, %v2447_v63  ;;  %v2994_v5 = vpop.f32.mrb[175].mxu0 }
 0x272   :  { %v4531_v6 = vadd.f32 %v4530_v57, %v4404_v3  ;;  %v5350_v7 = vpack.c.bf16 %v2993_v4, %v2990_v61  ;;  %v4270_v8 = vadd.f32 %v4269_v2, %v2993_v4  ;;  %v4405_v9 = vmul.f32 %v2993_v4, %v2993_v4 }
 0x274   :  { %5494 = vst [vmem:[%s7182_s2 + $0x158] sm:$0xff] %v5350_v7   ;;  %v4532_v10 = vadd.f32 %v4531_v6, %v4405_v9  ;;  %v2452_v11 = vpop.f32.mrb[176].mxu1 }
 0x275   :  { %v2997_v12 = vpop.f32.mrb[176].mxu0  ;;  %v2454_v13 = vpop.f32.mrb[177].mxu1 }
 0x276   :  { %v2998_v14 = vadd.f32 %v2997_v12, %v2452_v11  ;;  %v2999_v15 = vpop.f32.mrb[177].mxu0  ;;  %v2455_v16 = vpop.f32.mrb[178].mxu1 }
 0x277   :  { %v3000_v17 = vpop.f32.mrb[178].mxu0  ;;  %v2457_v18 = vpop.f32.mrb[179].mxu1 }
 0x278   :  { %v4271_v19 = vadd.f32 %v4270_v8, %v2998_v14  ;;  %v4406_v20 = vmul.f32 %v2998_v14, %v2998_v14  ;;  %v3001_v21 = vadd.f32 %v3000_v17, %v2455_v16  ;;  %v3002_v22 = vpop.f32.mrb[179].mxu0  ;;  %v6062_v18 = vmov 0.0  }
 0x279   :  { %4183 = vst [vmem:[%s7183_s3] sm:$0xff] %v6062_v18 }
 0x27a   :  { %v4533_v23 = vadd.f32 %v4532_v10, %v4406_v20  ;;  %v5355_v24 = vpack.c.bf16 %v3001_v21, %v2998_v14  ;;  %v4272_v25 = vadd.f32 %v4271_v19, %v3001_v21  ;;  %v4407_v26 = vmul.f32 %v3001_v21, %v3001_v21 }
 0x27c   :  { %5495 = vst [vmem:[%s7182_s2 + $0x160] sm:$0xff] %v5355_v24   ;;  %v4534_v27 = vadd.f32 %v4533_v23, %v4407_v26  ;;  %v2460_v28 = vpop.f32.mrb[180].mxu1 }
 0x27d   :  { %v3005_v29 = vpop.f32.mrb[180].mxu0  ;;  %v2462_v30 = vpop.f32.mrb[181].mxu1 }
 0x27e   :  { %v3006_v31 = vadd.f32 %v3005_v29, %v2460_v28  ;;  %v3007_v32 = vpop.f32.mrb[181].mxu0  ;;  %v2463_v33 = vpop.f32.mrb[182].mxu1 }
 0x27f   :  { %v3008_v34 = vpop.f32.mrb[182].mxu0  ;;  %v2465_v35 = vpop.f32.mrb[183].mxu1 }
 0x280   :  { %v4273_v36 = vadd.f32 %v4272_v25, %v3006_v31  ;;  %v4408_v37 = vmul.f32 %v3006_v31, %v3006_v31  ;;  %v3009_v38 = vadd.f32 %v3008_v34, %v2463_v33  ;;  %v3010_v39 = vpop.f32.mrb[183].mxu0 }
 0x282   :  { %v4535_v40 = vadd.f32 %v4534_v27, %v4408_v37  ;;  %v5360_v41 = vpack.c.bf16 %v3009_v38, %v3006_v31  ;;  %v4274_v42 = vadd.f32 %v4273_v36, %v3009_v38  ;;  %v4409_v43 = vmul.f32 %v3009_v38, %v3009_v38 }
 0x284   :  { %5496 = vst [vmem:[%s7182_s2 + $0x168] sm:$0xff] %v5360_v41   ;;  %v4536_v44 = vadd.f32 %v4535_v40, %v4409_v43  ;;  %v2468_v45 = vpop.f32.mrb[184].mxu1 }
 0x285   :  { %v3013_v46 = vpop.f32.mrb[184].mxu0  ;;  %v2470_v47 = vpop.f32.mrb[185].mxu1 }
 0x286   :  { %v3014_v48 = vadd.f32 %v3013_v46, %v2468_v45  ;;  %v3015_v49 = vpop.f32.mrb[185].mxu0  ;;  %v2471_v50 = vpop.f32.mrb[186].mxu1 }
 0x287   :  { %v3016_v51 = vpop.f32.mrb[186].mxu0  ;;  %v2473_v52 = vpop.f32.mrb[187].mxu1 }
 0x288   :  { %v4275_v53 = vadd.f32 %v4274_v42, %v3014_v48  ;;  %v4410_v54 = vmul.f32 %v3014_v48, %v3014_v48  ;;  %v3017_v55 = vadd.f32 %v3016_v51, %v2471_v50  ;;  %v3018_v56 = vpop.f32.mrb[187].mxu0 }
 0x28a   :  { %v4537_v57 = vadd.f32 %v4536_v44, %v4410_v54  ;;  %v5365_v58 = vpack.c.bf16 %v3017_v55, %v3014_v48  ;;  %v4276_v59 = vadd.f32 %v4275_v53, %v3017_v55  ;;  %v4411_v60 = vmul.f32 %v3017_v55, %v3017_v55 }
 0x28c   :  { %5497 = vst [vmem:[%s7182_s2 + $0x170] sm:$0xff] %v5365_v58   ;;  %v4538_v61 = vadd.f32 %v4537_v57, %v4411_v60  ;;  %v2476_v62 = vpop.f32.mrb[188].mxu1 }
 0x28d   :  { %v3021_v63 = vpop.f32.mrb[188].mxu0  ;;  %v2478_v0 = vpop.f32.mrb[189].mxu1 }
 0x28e   :  { %v3022_v1 = vadd.f32 %v3021_v63, %v2476_v62  ;;  %v3023_v2 = vpop.f32.mrb[189].mxu0  ;;  %v2479_v3 = vpop.f32.mrb[190].mxu1 }
 0x28f   :  { %v3024_v4 = vpop.f32.mrb[190].mxu0  ;;  %v2481_v5 = vpop.f32.mrb[191].mxu1 }
 0x290   :  { %v4277_v6 = vadd.f32 %v4276_v59, %v3022_v1  ;;  %v4412_v7 = vmul.f32 %v3022_v1, %v3022_v1  ;;  %v3025_v8 = vadd.f32 %v3024_v4, %v2479_v3  ;;  %v3026_v9 = vpop.f32.mrb[191].mxu0 }
 0x292   :  { %v4539_v10 = vadd.f32 %v4538_v61, %v4412_v7  ;;  %v5370_v11 = vpack.c.bf16 %v3025_v8, %v3022_v1  ;;  %v4278_v12 = vadd.f32 %v4277_v6, %v3025_v8  ;;  %v4413_v13 = vmul.f32 %v3025_v8, %v3025_v8 }
 0x294   :  { %5498 = vst [vmem:[%s7182_s2 + $0x178] sm:$0xff] %v5370_v11   ;;  %v4540_v14 = vadd.f32 %v4539_v10, %v4413_v13  ;;  %v2484_v15 = vpop.f32.mrb[192].mxu1 }
 0x295   :  { %v3029_v16 = vpop.f32.mrb[192].mxu0  ;;  %v2486_v17 = vpop.f32.mrb[193].mxu1 }
 0x296   :  { %v3030_v19 = vadd.f32 %v3029_v16, %v2484_v15  ;;  %v3031_v20 = vpop.f32.mrb[193].mxu0  ;;  %v2487_v21 = vpop.f32.mrb[194].mxu1 }
 0x297   :  { %v3032_v22 = vpop.f32.mrb[194].mxu0  ;;  %v2489_v23 = vpop.f32.mrb[195].mxu1 }
 0x298   :  { %v4279_v24 = vadd.f32 %v4278_v12, %v3030_v19  ;;  %v4414_v25 = vmul.f32 %v3030_v19, %v3030_v19  ;;  %v3033_v26 = vadd.f32 %v3032_v22, %v2487_v21  ;;  %v3034_v27 = vpop.f32.mrb[195].mxu0 }
 0x29a   :  { %v4541_v28 = vadd.f32 %v4540_v14, %v4414_v25  ;;  %v5375_v29 = vpack.c.bf16 %v3033_v26, %v3030_v19  ;;  %v4280_v30 = vadd.f32 %v4279_v24, %v3033_v26  ;;  %v4415_v31 = vmul.f32 %v3033_v26, %v3033_v26 }
 0x29c   :  { %5499 = vst [vmem:[%s7182_s2 + $0x180] sm:$0xff] %v5375_v29   ;;  %v4542_v32 = vadd.f32 %v4541_v28, %v4415_v31  ;;  %v2492_v33 = vpop.f32.mrb[196].mxu1 }
 0x29d   :  { %v3037_v34 = vpop.f32.mrb[196].mxu0  ;;  %v2494_v35 = vpop.f32.mrb[197].mxu1 }
 0x29e   :  { %v3038_v36 = vadd.f32 %v3037_v34, %v2492_v33  ;;  %v3039_v37 = vpop.f32.mrb[197].mxu0  ;;  %v2495_v38 = vpop.f32.mrb[198].mxu1 }
 0x29f   :  { %v3040_v39 = vpop.f32.mrb[198].mxu0  ;;  %v2497_v40 = vpop.f32.mrb[199].mxu1 }
 0x2a0   :  { %v4281_v41 = vadd.f32 %v4280_v30, %v3038_v36  ;;  %v4416_v42 = vmul.f32 %v3038_v36, %v3038_v36  ;;  %v3041_v43 = vadd.f32 %v3040_v39, %v2495_v38  ;;  %v3042_v44 = vpop.f32.mrb[199].mxu0 }
 0x2a2   :  { %v4543_v45 = vadd.f32 %v4542_v32, %v4416_v42  ;;  %v5380_v46 = vpack.c.bf16 %v3041_v43, %v3038_v36  ;;  %v4282_v47 = vadd.f32 %v4281_v41, %v3041_v43  ;;  %v4417_v48 = vmul.f32 %v3041_v43, %v3041_v43 }
 0x2a4   :  { %5500 = vst [vmem:[%s7182_s2 + $0x188] sm:$0xff] %v5380_v46   ;;  %v4544_v49 = vadd.f32 %v4543_v45, %v4417_v48  ;;  %v2500_v50 = vpop.f32.mrb[200].mxu1 }
 0x2a5   :  { %v3045_v51 = vpop.f32.mrb[200].mxu0  ;;  %v2502_v52 = vpop.f32.mrb[201].mxu1 }
 0x2a6   :  { %v3046_v53 = vadd.f32 %v3045_v51, %v2500_v50  ;;  %v3047_v54 = vpop.f32.mrb[201].mxu0  ;;  %v2503_v55 = vpop.f32.mrb[202].mxu1 }
 0x2a7   :  { %v3048_v56 = vpop.f32.mrb[202].mxu0  ;;  %v2505_v57 = vpop.f32.mrb[203].mxu1 }
 0x2a8   :  { %v4283_v58 = vadd.f32 %v4282_v47, %v3046_v53  ;;  %v4418_v59 = vmul.f32 %v3046_v53, %v3046_v53  ;;  %v3049_v60 = vadd.f32 %v3048_v56, %v2503_v55  ;;  %v3050_v61 = vpop.f32.mrb[203].mxu0 }
 0x2aa   :  { %v4545_v62 = vadd.f32 %v4544_v49, %v4418_v59  ;;  %v5385_v63 = vpack.c.bf16 %v3049_v60, %v3046_v53  ;;  %v4284_v0 = vadd.f32 %v4283_v58, %v3049_v60  ;;  %v4419_v1 = vmul.f32 %v3049_v60, %v3049_v60 }
 0x2ac   :  { %5501 = vst [vmem:[%s7182_s2 + $0x190] sm:$0xff] %v5385_v63   ;;  %v4546_v2 = vadd.f32 %v4545_v62, %v4419_v1  ;;  %v2508_v3 = vpop.f32.mrb[204].mxu1 }
 0x2ad   :  { %v3053_v4 = vpop.f32.mrb[204].mxu0  ;;  %v2510_v5 = vpop.f32.mrb[205].mxu1 }
 0x2ae   :  { %v3054_v6 = vadd.f32 %v3053_v4, %v2508_v3  ;;  %v3055_v7 = vpop.f32.mrb[205].mxu0  ;;  %v2511_v8 = vpop.f32.mrb[206].mxu1 }
 0x2af   :  { %v3056_v9 = vpop.f32.mrb[206].mxu0  ;;  %v2513_v10 = vpop.f32.mrb[207].mxu1 }
 0x2b0   :  { %v4285_v11 = vadd.f32 %v4284_v0, %v3054_v6  ;;  %v4420_v12 = vmul.f32 %v3054_v6, %v3054_v6  ;;  %v3057_v13 = vadd.f32 %v3056_v9, %v2511_v8  ;;  %v3058_v14 = vpop.f32.mrb[207].mxu0 }
 0x2b2   :  { %v4547_v15 = vadd.f32 %v4546_v2, %v4420_v12  ;;  %v5390_v16 = vpack.c.bf16 %v3057_v13, %v3054_v6  ;;  %v4286_v17 = vadd.f32 %v4285_v11, %v3057_v13  ;;  %v4421_v18 = vmul.f32 %v3057_v13, %v3057_v13 }
 0x2b4   :  { %5502 = vst [vmem:[%s7182_s2 + $0x198] sm:$0xff] %v5390_v16   ;;  %v4548_v19 = vadd.f32 %v4547_v15, %v4421_v18  ;;  %v2516_v20 = vpop.f32.mrb[208].mxu1 }
 0x2b5   :  { %v3061_v21 = vpop.f32.mrb[208].mxu0  ;;  %v2518_v22 = vpop.f32.mrb[209].mxu1 }
 0x2b6   :  { %v3062_v23 = vadd.f32 %v3061_v21, %v2516_v20  ;;  %v3063_v24 = vpop.f32.mrb[209].mxu0  ;;  %v2519_v25 = vpop.f32.mrb[210].mxu1 }
 0x2b7   :  { %v3064_v26 = vpop.f32.mrb[210].mxu0  ;;  %v2521_v27 = vpop.f32.mrb[211].mxu1 }
 0x2b8   :  { %v4287_v28 = vadd.f32 %v4286_v17, %v3062_v23  ;;  %v4422_v29 = vmul.f32 %v3062_v23, %v3062_v23  ;;  %v3065_v30 = vadd.f32 %v3064_v26, %v2519_v25  ;;  %v3066_v31 = vpop.f32.mrb[211].mxu0 }
 0x2ba   :  { %v4549_v32 = vadd.f32 %v4548_v19, %v4422_v29  ;;  %v5395_v33 = vpack.c.bf16 %v3065_v30, %v3062_v23  ;;  %v4288_v34 = vadd.f32 %v4287_v28, %v3065_v30  ;;  %v4423_v35 = vmul.f32 %v3065_v30, %v3065_v30 }
 0x2bc   :  { %5503 = vst [vmem:[%s7182_s2 + $0x1a0] sm:$0xff] %v5395_v33   ;;  %v4550_v36 = vadd.f32 %v4549_v32, %v4423_v35  ;;  %v2524_v37 = vpop.f32.mrb[212].mxu1 }
 0x2bd   :  { %v3069_v38 = vpop.f32.mrb[212].mxu0  ;;  %v2526_v39 = vpop.f32.mrb[213].mxu1 }
 0x2be   :  { %v3070_v40 = vadd.f32 %v3069_v38, %v2524_v37  ;;  %v3071_v41 = vpop.f32.mrb[213].mxu0  ;;  %v2527_v42 = vpop.f32.mrb[214].mxu1 }
 0x2bf   :  { %v3072_v43 = vpop.f32.mrb[214].mxu0  ;;  %v2529_v44 = vpop.f32.mrb[215].mxu1 }
 0x2c0   :  { %v4289_v45 = vadd.f32 %v4288_v34, %v3070_v40  ;;  %v4424_v46 = vmul.f32 %v3070_v40, %v3070_v40  ;;  %v3073_v47 = vadd.f32 %v3072_v43, %v2527_v42  ;;  %v3074_v48 = vpop.f32.mrb[215].mxu0 }
 0x2c2   :  { %v4551_v49 = vadd.f32 %v4550_v36, %v4424_v46  ;;  %v5400_v50 = vpack.c.bf16 %v3073_v47, %v3070_v40  ;;  %v4290_v51 = vadd.f32 %v4289_v45, %v3073_v47  ;;  %v4425_v52 = vmul.f32 %v3073_v47, %v3073_v47 }
 0x2c4   :  { %5504 = vst [vmem:[%s7182_s2 + $0x1a8] sm:$0xff] %v5400_v50   ;;  %v4552_v53 = vadd.f32 %v4551_v49, %v4425_v52  ;;  %v2532_v54 = vpop.f32.mrb[216].mxu1 }
 0x2c5   :  { %v3077_v55 = vpop.f32.mrb[216].mxu0  ;;  %v2534_v56 = vpop.f32.mrb[217].mxu1 }
 0x2c6   :  { %v3078_v57 = vadd.f32 %v3077_v55, %v2532_v54  ;;  %v3079_v58 = vpop.f32.mrb[217].mxu0  ;;  %v2535_v59 = vpop.f32.mrb[218].mxu1 }
 0x2c7   :  { %v3080_v60 = vpop.f32.mrb[218].mxu0  ;;  %v2537_v61 = vpop.f32.mrb[219].mxu1 }
 0x2c8   :  { %v4291_v62 = vadd.f32 %v4290_v51, %v3078_v57  ;;  %v4426_v63 = vmul.f32 %v3078_v57, %v3078_v57  ;;  %v3081_v0 = vadd.f32 %v3080_v60, %v2535_v59  ;;  %v3082_v1 = vpop.f32.mrb[219].mxu0 }
 0x2ca   :  { %v4553_v2 = vadd.f32 %v4552_v53, %v4426_v63  ;;  %v5405_v3 = vpack.c.bf16 %v3081_v0, %v3078_v57  ;;  %v4292_v4 = vadd.f32 %v4291_v62, %v3081_v0  ;;  %v4427_v5 = vmul.f32 %v3081_v0, %v3081_v0 }
 0x2cc   :  { %5505 = vst [vmem:[%s7182_s2 + $0x1b0] sm:$0xff] %v5405_v3   ;;  %v4554_v6 = vadd.f32 %v4553_v2, %v4427_v5  ;;  %v2540_v7 = vpop.f32.mrb[220].mxu1 }
 0x2cd   :  { %v3085_v8 = vpop.f32.mrb[220].mxu0  ;;  %v2542_v9 = vpop.f32.mrb[221].mxu1 }
 0x2ce   :  { %v3086_v10 = vadd.f32 %v3085_v8, %v2540_v7  ;;  %v3087_v11 = vpop.f32.mrb[221].mxu0  ;;  %v2543_v12 = vpop.f32.mrb[222].mxu1 }
 0x2cf   :  { %v3088_v13 = vpop.f32.mrb[222].mxu0  ;;  %v2545_v14 = vpop.f32.mrb[223].mxu1 }
 0x2d0   :  { %v4293_v15 = vadd.f32 %v4292_v4, %v3086_v10  ;;  %v4428_v16 = vmul.f32 %v3086_v10, %v3086_v10  ;;  %v3089_v17 = vadd.f32 %v3088_v13, %v2543_v12  ;;  %v3090_v18 = vpop.f32.mrb[223].mxu0 }
 0x2d2   :  { %v4555_v19 = vadd.f32 %v4554_v6, %v4428_v16  ;;  %v5410_v20 = vpack.c.bf16 %v3089_v17, %v3086_v10  ;;  %v4294_v21 = vadd.f32 %v4293_v15, %v3089_v17  ;;  %v4429_v22 = vmul.f32 %v3089_v17, %v3089_v17 }
 0x2d4   :  { %5506 = vst [vmem:[%s7182_s2 + $0x1b8] sm:$0xff] %v5410_v20   ;;  %v4556_v23 = vadd.f32 %v4555_v19, %v4429_v22  ;;  %v2548_v24 = vpop.f32.mrb[224].mxu1 }
 0x2d5   :  { %v3093_v25 = vpop.f32.mrb[224].mxu0  ;;  %v2550_v26 = vpop.f32.mrb[225].mxu1 }
 0x2d6   :  { %v3094_v27 = vadd.f32 %v3093_v25, %v2548_v24  ;;  %v3095_v28 = vpop.f32.mrb[225].mxu0  ;;  %v2551_v29 = vpop.f32.mrb[226].mxu1 }
 0x2d7   :  { %v3096_v30 = vpop.f32.mrb[226].mxu0  ;;  %v2553_v31 = vpop.f32.mrb[227].mxu1 }
 0x2d8   :  { %v4295_v32 = vadd.f32 %v4294_v21, %v3094_v27  ;;  %v4430_v33 = vmul.f32 %v3094_v27, %v3094_v27  ;;  %v3097_v34 = vadd.f32 %v3096_v30, %v2551_v29  ;;  %v3098_v35 = vpop.f32.mrb[227].mxu0 }
 0x2da   :  { %v4557_v36 = vadd.f32 %v4556_v23, %v4430_v33  ;;  %v5415_v37 = vpack.c.bf16 %v3097_v34, %v3094_v27  ;;  %v4296_v38 = vadd.f32 %v4295_v32, %v3097_v34  ;;  %v4431_v39 = vmul.f32 %v3097_v34, %v3097_v34 }
 0x2dc   :  { %5507 = vst [vmem:[%s7182_s2 + $0x1c0] sm:$0xff] %v5415_v37   ;;  %v4558_v40 = vadd.f32 %v4557_v36, %v4431_v39  ;;  %v2556_v41 = vpop.f32.mrb[228].mxu1 }
 0x2dd   :  { %v3101_v42 = vpop.f32.mrb[228].mxu0  ;;  %v2558_v43 = vpop.f32.mrb[229].mxu1 }
 0x2de   :  { %v3102_v44 = vadd.f32 %v3101_v42, %v2556_v41  ;;  %v3103_v45 = vpop.f32.mrb[229].mxu0  ;;  %v2559_v46 = vpop.f32.mrb[230].mxu1 }
 0x2df   :  { %v3104_v47 = vpop.f32.mrb[230].mxu0  ;;  %v2561_v48 = vpop.f32.mrb[231].mxu1 }
 0x2e0   :  { %v4297_v49 = vadd.f32 %v4296_v38, %v3102_v44  ;;  %v4432_v50 = vmul.f32 %v3102_v44, %v3102_v44  ;;  %v3105_v51 = vadd.f32 %v3104_v47, %v2559_v46  ;;  %v3106_v52 = vpop.f32.mrb[231].mxu0 }
 0x2e2   :  { %v4559_v53 = vadd.f32 %v4558_v40, %v4432_v50  ;;  %v5420_v54 = vpack.c.bf16 %v3105_v51, %v3102_v44  ;;  %v4298_v55 = vadd.f32 %v4297_v49, %v3105_v51  ;;  %v4433_v56 = vmul.f32 %v3105_v51, %v3105_v51 }
 0x2e4   :  { %5508 = vst [vmem:[%s7182_s2 + $0x1c8] sm:$0xff] %v5420_v54   ;;  %v4560_v57 = vadd.f32 %v4559_v53, %v4433_v56  ;;  %v2564_v58 = vpop.f32.mrb[232].mxu1 }
 0x2e5   :  { %v3109_v59 = vpop.f32.mrb[232].mxu0  ;;  %v2566_v60 = vpop.f32.mrb[233].mxu1 }
 0x2e6   :  { %v3110_v61 = vadd.f32 %v3109_v59, %v2564_v58  ;;  %v3111_v62 = vpop.f32.mrb[233].mxu0  ;;  %v2567_v63 = vpop.f32.mrb[234].mxu1 }
 0x2e7   :  { %v3112_v0 = vpop.f32.mrb[234].mxu0  ;;  %v2569_v1 = vpop.f32.mrb[235].mxu1 }
 0x2e8   :  { %v4299_v2 = vadd.f32 %v4298_v55, %v3110_v61  ;;  %v4434_v3 = vmul.f32 %v3110_v61, %v3110_v61  ;;  %v3113_v4 = vadd.f32 %v3112_v0, %v2567_v63  ;;  %v3114_v5 = vpop.f32.mrb[235].mxu0 }
 0x2ea   :  { %v4561_v6 = vadd.f32 %v4560_v57, %v4434_v3  ;;  %v5425_v7 = vpack.c.bf16 %v3113_v4, %v3110_v61  ;;  %v4300_v8 = vadd.f32 %v4299_v2, %v3113_v4  ;;  %v4435_v9 = vmul.f32 %v3113_v4, %v3113_v4 }
 0x2ec   :  { %5509 = vst [vmem:[%s7182_s2 + $0x1d0] sm:$0xff] %v5425_v7   ;;  %v4562_v10 = vadd.f32 %v4561_v6, %v4435_v9  ;;  %v2572_v11 = vpop.f32.mrb[236].mxu1 }
 0x2ed   :  { %v3117_v12 = vpop.f32.mrb[236].mxu0  ;;  %v2574_v13 = vpop.f32.mrb[237].mxu1 }
 0x2ee   :  { %v3118_v14 = vadd.f32 %v3117_v12, %v2572_v11  ;;  %v3119_v15 = vpop.f32.mrb[237].mxu0  ;;  %v2575_v16 = vpop.f32.mrb[238].mxu1 }
 0x2ef   :  { %v3120_v17 = vpop.f32.mrb[238].mxu0  ;;  %v2577_v18 = vpop.f32.mrb[239].mxu1 }
 0x2f0   :  { %v4301_v19 = vadd.f32 %v4300_v8, %v3118_v14  ;;  %v4436_v20 = vmul.f32 %v3118_v14, %v3118_v14  ;;  %v3121_v21 = vadd.f32 %v3120_v17, %v2575_v16  ;;  %v3122_v22 = vpop.f32.mrb[239].mxu0 }
 0x2f2   :  { %v4563_v23 = vadd.f32 %v4562_v10, %v4436_v20  ;;  %v5430_v24 = vpack.c.bf16 %v3121_v21, %v3118_v14  ;;  %v4302_v25 = vadd.f32 %v4301_v19, %v3121_v21  ;;  %v4437_v26 = vmul.f32 %v3121_v21, %v3121_v21 }
 0x2f4   :  { %5510 = vst [vmem:[%s7182_s2 + $0x1d8] sm:$0xff] %v5430_v24   ;;  %v4564_v27 = vadd.f32 %v4563_v23, %v4437_v26  ;;  %v2580_v28 = vpop.f32.mrb[240].mxu1 }
 0x2f5   :  { %v3125_v29 = vpop.f32.mrb[240].mxu0  ;;  %v2582_v30 = vpop.f32.mrb[241].mxu1 }
 0x2f6   :  { %v3126_v31 = vadd.f32 %v3125_v29, %v2580_v28  ;;  %v3127_v32 = vpop.f32.mrb[241].mxu0  ;;  %v2583_v33 = vpop.f32.mrb[242].mxu1 }
 0x2f7   :  { %v3128_v34 = vpop.f32.mrb[242].mxu0  ;;  %v2585_v35 = vpop.f32.mrb[243].mxu1 }
 0x2f8   :  { %v4303_v36 = vadd.f32 %v4302_v25, %v3126_v31  ;;  %v4438_v37 = vmul.f32 %v3126_v31, %v3126_v31  ;;  %v3129_v38 = vadd.f32 %v3128_v34, %v2583_v33  ;;  %v3130_v39 = vpop.f32.mrb[243].mxu0 }
 0x2fa   :  { %v4565_v40 = vadd.f32 %v4564_v27, %v4438_v37  ;;  %v5435_v41 = vpack.c.bf16 %v3129_v38, %v3126_v31  ;;  %v4304_v42 = vadd.f32 %v4303_v36, %v3129_v38  ;;  %v4439_v43 = vmul.f32 %v3129_v38, %v3129_v38 }
 0x2fc   :  { %5511 = vst [vmem:[%s7182_s2 + $0x1e0] sm:$0xff] %v5435_v41   ;;  %v4566_v44 = vadd.f32 %v4565_v40, %v4439_v43  ;;  %v2588_v45 = vpop.f32.mrb[244].mxu1 }
 0x2fd   :  { %v3133_v46 = vpop.f32.mrb[244].mxu0  ;;  %v2590_v47 = vpop.f32.mrb[245].mxu1 }
 0x2fe   :  { %v3134_v48 = vadd.f32 %v3133_v46, %v2588_v45  ;;  %v3135_v49 = vpop.f32.mrb[245].mxu0  ;;  %v2591_v50 = vpop.f32.mrb[246].mxu1 }
 0x2ff   :  { %v3136_v51 = vpop.f32.mrb[246].mxu0  ;;  %v2593_v52 = vpop.f32.mrb[247].mxu1 }
 0x300   :  { %v4305_v53 = vadd.f32 %v4304_v42, %v3134_v48  ;;  %v4440_v54 = vmul.f32 %v3134_v48, %v3134_v48  ;;  %v3137_v55 = vadd.f32 %v3136_v51, %v2591_v50  ;;  %v3138_v56 = vpop.f32.mrb[247].mxu0 }
 0x302   :  { %v4567_v57 = vadd.f32 %v4566_v44, %v4440_v54  ;;  %v5440_v58 = vpack.c.bf16 %v3137_v55, %v3134_v48  ;;  %v4306_v59 = vadd.f32 %v4305_v53, %v3137_v55  ;;  %v4441_v60 = vmul.f32 %v3137_v55, %v3137_v55 }
 0x304   :  { %5512 = vst [vmem:[%s7182_s2 + $0x1e8] sm:$0xff] %v5440_v58   ;;  %v4568_v61 = vadd.f32 %v4567_v57, %v4441_v60  ;;  %v2596_v62 = vpop.f32.mrb[248].mxu1 }
 0x305   :  { %v3141_v63 = vpop.f32.mrb[248].mxu0  ;;  %v2598_v0 = vpop.f32.mrb[249].mxu1 }
 0x306   :  { %v3142_v1 = vadd.f32 %v3141_v63, %v2596_v62  ;;  %v3143_v2 = vpop.f32.mrb[249].mxu0  ;;  %v2599_v3 = vpop.f32.mrb[250].mxu1 }
 0x307   :  { %v3144_v4 = vpop.f32.mrb[250].mxu0  ;;  %v2601_v5 = vpop.f32.mrb[251].mxu1 }
 0x308   :  { %v4307_v6 = vadd.f32 %v4306_v59, %v3142_v1  ;;  %v4442_v7 = vmul.f32 %v3142_v1, %v3142_v1  ;;  %v3145_v8 = vadd.f32 %v3144_v4, %v2599_v3  ;;  %v3146_v9 = vpop.f32.mrb[251].mxu0 }
 0x30a   :  { %v4569_v10 = vadd.f32 %v4568_v61, %v4442_v7  ;;  %v5445_v11 = vpack.c.bf16 %v3145_v8, %v3142_v1  ;;  %v4308_v12 = vadd.f32 %v4307_v6, %v3145_v8  ;;  %v4443_v13 = vmul.f32 %v3145_v8, %v3145_v8 }
 0x30c   :  { %5513 = vst [vmem:[%s7182_s2 + $0x1f0] sm:$0xff] %v5445_v11   ;;  %v4570_v14 = vadd.f32 %v4569_v10, %v4443_v13  ;;  %v2604_v15 = vpop.f32.mrb[252].mxu1 }
 0x30d   :  { %v3149_v16 = vpop.f32.mrb[252].mxu0  ;;  %v2606_v17 = vpop.f32.mrb[253].mxu1 }
 0x30e   :  { %v3150_v18 = vadd.f32 %v3149_v16, %v2604_v15  ;;  %v3151_v19 = vpop.f32.mrb[253].mxu0  ;;  %v2607_v20 = vpop.f32.mrb[254].mxu1 }
 0x30f   :  { %v3152_v21 = vpop.f32.mrb[254].mxu0  ;;  %v2609_v22 = vpop.f32.mrb[255].mxu1 }
 0x310   :  { %v4309_v23 = vadd.f32 %v4308_v12, %v3150_v18  ;;  %v4444_v24 = vmul.f32 %v3150_v18, %v3150_v18  ;;  %v3153_v25 = vadd.f32 %v3152_v21, %v2607_v20  ;;  %v3154_v26 = vpop.f32.mrb[255].mxu0 }
 0x312   :  { %v4571_v27 = vadd.f32 %v4570_v14, %v4444_v24  ;;  %v5450_v28 = vpack.c.bf16 %v3153_v25, %v3150_v18  ;;  %v4310_v29 = vadd.f32 %v4309_v23, %v3153_v25  ;;  %v4445_v30 = vmul.f32 %v3153_v25, %v3153_v25 }
 0x314   :  { %5514 = vst [vmem:[%s7182_s2 + $0x1f8] sm:$0xff] %v5450_v28   ;;  %v4311_v31 = vrot.slane %v4310_v29, 4  ;;  %v4572_v32 = vadd.f32 %v4571_v27, %v4445_v30 }
 0x316   :  { %v4312_v33 = vadd.f32 %v4311_v31, %v4310_v29  ;;  %v4573_v34 = vrot.slane %v4572_v32, 4 }
 0x318   :  { %v4313_v35 = vrot.slane %v4312_v33, 2  ;;  %v4574_v36 = vadd.f32 %v4573_v34, %v4572_v32 }
 0x31a   :  { %v4314_v37 = vadd.f32 %v4313_v35, %v4312_v33  ;;  %v4575_v38 = vrot.slane %v4574_v36, 2 }
 0x31c   :  { %v4315_v39 = vrot.slane %v4314_v37, 1  ;;  %v4576_v40 = vadd.f32 %v4575_v38, %v4574_v36 }
 0x31e   :  { %v4316_v41 = vadd.f32 %v4315_v39, %v4314_v37  ;;  %v4577_v42 = vrot.slane %v4576_v40, 1 }
 0x320   :  { %4317 = vst [vmem:[%s7183_s3] sm:$0x1] %v4316_v41  ;;  %v4578_v43 = vadd.f32 %v4577_v42, %v4576_v40 }
 0x322   :  { %4579 = vst [vmem:[%s7183_s3 + $0x1] sm:$0x1] %v4578_v43 }

</bundles_post_ra>
